<compile_context>
chip_gen: v7x
topology: tpu7x:2x2x1
jax: 0.10.0
libtpu: 0.0.40
codegen_flags: <defaults>
</compile_context>

<pallas_src>
import functools

import jax
import jax.numpy as jnp
from jax import lax
from jax.experimental import pallas as pl
from jax.experimental.pallas import tpu as pltpu

LEAKY_SLOPE = 0.2
BN_EPS = 1e-5
VMEM_LIMIT = 48 * 1024 * 1024   # explicit scoped-VMEM budget, safe on v5e/v6e/v7x


def _leaky(x):
    return jnp.where(x > 0, x, LEAKY_SLOPE * x)


def _cparams(semantics):
    return pltpu.CompilerParams(dimension_semantics=semantics,
                                vmem_limit_bytes=VMEM_LIMIT)


# ---------------------------------------------------------------------------
# Kernel 1: pairwise similarity for kNN (f32 accumulation, ranking-exact)
# ---------------------------------------------------------------------------
def _pairwise_kernel(x_ref, o_ref):
    x = x_ref[0]                                                    # (N, C)
    inner = lax.dot_general(x, x, (((1,), (1,)), ((), ())),
                            preferred_element_type=jnp.float32)     # (N, N) = x @ x.T
    xf = x.astype(jnp.float32)
    norm = jnp.sum(xf * xf, axis=1, keepdims=True)                  # (N, 1)
    # The per-row -||x_i||^2 term is dropped: constant per row, cannot change top_k.
    o_ref[0] = 2.0 * inner - norm.T


def pairwise_similarity(feat):
    # feat: (B, N, C) f32/bf16 -> (B, N, N) f32 similarity (ranking == PyTorch knn()).
    B, N, C = feat.shape
    cost = pl.CostEstimate(
        flops=int(2 * B * N * N * C), transcendentals=0,
        bytes_accessed=int(feat.size * feat.dtype.itemsize + B * N * N * 4))
    return pl.pallas_call(
        _pairwise_kernel,
        out_shape=jax.ShapeDtypeStruct((B, N, N), jnp.float32),
        grid=(B,),
        in_specs=[pl.BlockSpec((1, N, C), lambda b: (b, 0, 0))],
        out_specs=pl.BlockSpec((1, N, N), lambda b: (b, 0, 0)),
        compiler_params=_cparams(("parallel",)),
        cost_estimate=cost,
    )(feat)


def knn_indices(feat, k):
    sim = pairwise_similarity(feat)                     # Pallas, f32
    # TODO(synk): top-k neighbour selection has no clean Pallas TPU primitive; stays XLA.
    _, idx = lax.top_k(sim, k)                          # (B, N, K) int32
    return idx


# ---------------------------------------------------------------------------
# Kernel 2: fused edge conv = in-kernel neighbor gather + decomposed 1x1 Conv2d
#           + max over k + BN + LeakyReLU.
#   concat([n_j - c, c]) @ W == n_j @ W_a + c @ (W_b - W_a)
#   The N unique points are projected once; neighbor rows are then selected from
#   the projected table with per-k one-hot MXU matmuls and max-folded immediately.
# ---------------------------------------------------------------------------
def _edge_conv_kernel(idx_ref, x_ref, wa_ref, wd_ref, s_ref, b_ref, o_ref, *, k):
    x = x_ref[0]                                                     # (N, C) bf16
    n = x.shape[0]
    t = jnp.dot(x, wa_ref[...], preferred_element_type=jnp.float32)  # (N, Cout) f32
    cq = jnp.dot(x, wd_ref[...], preferred_element_type=jnp.float32) # (N, Cout) f32
    t_bf = t.astype(jnp.bfloat16)
    idx = idx_ref[0]                                                 # (N, K) int32
    iota = lax.broadcasted_iota(jnp.int32, (n, n), 1)
    acc = None
    for j in range(k):            # static unroll; per-j intermediate is only (N, Cout)
        onehot = (idx[:, j:j + 1] == iota).astype(jnp.bfloat16)      # (N, N) row-select
        g = jnp.dot(onehot, t_bf, preferred_element_type=jnp.float32)
        acc = g if acc is None else jnp.maximum(acc, g)
    # BN scale > 0 (asserted at init) and leaky-relu is monotone, so the affine +
    # activation epilogue commutes with the max over k: applied ONCE after the max.
    y = _leaky((acc + cq) * s_ref[...] + b_ref[...])
    o_ref[0] = y.astype(o_ref.dtype)


def edge_conv(idx, x_bf, wa, wd, scale, bias, k):
    # idx: (B, N, K) int32, x_bf: (B, N, C) bf16 -> (B, N, Cout) bf16
    B, N, C = x_bf.shape
    Cout = wa.shape[1]
    cost = pl.CostEstimate(
        flops=int(2 * B * N * Cout * (2 * C + k * N)),
        transcendentals=0,
        bytes_accessed=int(idx.size * 4 + x_bf.size * 2 + 2 * C * Cout * 2
                           + 2 * Cout * 4 + B * N * Cout * 2))
    return pl.pallas_call(
        functools.partial(_edge_conv_kernel, k=k),
        out_shape=jax.ShapeDtypeStruct((B, N, Cout), jnp.bfloat16),
        grid=(B,),
        in_specs=[
            pl.BlockSpec((1, N, k), lambda b: (b, 0, 0)),
            pl.BlockSpec((1, N, C), lambda b: (b, 0, 0)),
            pl.BlockSpec((C, Cout), lambda b: (0, 0)),
            pl.BlockSpec((C, Cout), lambda b: (0, 0)),
            pl.BlockSpec((1, Cout), lambda b: (0, 0)),
            pl.BlockSpec((1, Cout), lambda b: (0, 0)),
        ],
        out_specs=pl.BlockSpec((1, N, Cout), lambda b: (b, 0, 0)),
        compiler_params=_cparams(("parallel",)),
        cost_estimate=cost,
    )(idx, x_bf, wa, wd, scale, bias)


# ---------------------------------------------------------------------------
# Kernel 3: gridded conv5 + BN + leaky + max/avg pool over N + full MLP head.
#   grid = (B, N-tiles); running max / running sum live in VMEM scratch and the
#   post-pool head runs under pl.when on the last N-tile.
#   cat([x1..x4]) @ W5 == x1@W5_1 + x2@W5_2 + x3@W5_3 + x4@W5_4  (no concat).
#   linear1 (no bias) split into max-half / avg-half (no pooled concat either).
# ---------------------------------------------------------------------------
def _conv5_head_kernel(x1_ref, x2_ref, x3_ref, x4_ref,
                       w51_ref, w52_ref, w53_ref, w54_ref, s5_ref, b5_ref,
                       wl1a_ref, wl1b_ref, s6_ref, b6_ref,
                       wl2_ref, bl2_ref, s7_ref, b7_ref, wl3_ref, bl3_ref,
                       o_ref, mx_ref, sm_ref, *, n_total):
    t = pl.program_id(1)

    @pl.when(t == 0)
    def _():
        mx_ref[...] = jnp.full(mx_ref.shape, -jnp.inf, mx_ref.dtype)
        sm_ref[...] = jnp.zeros(sm_ref.shape, sm_ref.dtype)

    h = (jnp.dot(x1_ref[0], w51_ref[...], preferred_element_type=jnp.float32)
         + jnp.dot(x2_ref[0], w52_ref[...], preferred_element_type=jnp.float32)
         + jnp.dot(x3_ref[0], w53_ref[...], preferred_element_type=jnp.float32)
         + jnp.dot(x4_ref[0], w54_ref[...], preferred_element_type=jnp.float32))
    h = _leaky(h * s5_ref[...] + b5_ref[...])                        # (tn, emb) f32
    mx_ref[...] = jnp.maximum(mx_ref[...], jnp.max(h, axis=0, keepdims=True))
    sm_ref[...] = sm_ref[...] + jnp.sum(h, axis=0, keepdims=True)

    @pl.when(t == pl.num_programs(1) - 1)
    def _():
        mx = mx_ref[...]                                             # (1, emb)
        av = sm_ref[...] * (1.0 / n_total)                           # (1, emb)
        h1 = (jnp.dot(mx.astype(jnp.bfloat16), wl1a_ref[...],
                      preferred_element_type=jnp.float32)
              + jnp.dot(av.astype(jnp.bfloat16), wl1b_ref[...],
                        preferred_element_type=jnp.float32))         # (1, 512)
        h1 = _leaky(h1 * s6_ref[...] + b6_ref[...])
        # dropout dp1: identity in eval mode
        h2 = jnp.dot(h1.astype(jnp.bfloat16), wl2_ref[...],
                     preferred_element_type=jnp.float32) + bl2_ref[...]
        h2 = _leaky(h2 * s7_ref[...] + b7_ref[...])
        # dropout dp2: identity in eval mode
        out = jnp.dot(h2.astype(jnp.bfloat16), wl3_ref[...],
                      preferred_element_type=jnp.float32) + bl3_ref[...]
        o_ref[0] = out.astype(o_ref.dtype)


def conv5_head(x1, x2, x3, x4, p):
    B, N, c1 = x1.shape
    c2, c3, c4 = x2.shape[2], x3.shape[2], x4.shape[2]
    emb = p["w51"].shape[1]
    out_ch = p["wl3"].shape[1]
    tn = 128 if N % 128 == 0 else N          # lane/sublane-friendly N tile
    grid = (B, N // tn)
    csum = c1 + c2 + c3 + c4
    cost = pl.CostEstimate(
        flops=int(2 * B * N * csum * emb
                  + 2 * B * (2 * emb * 512 + 512 * 256 + 256 * out_ch)),
        transcendentals=0,
        bytes_accessed=int(B * N * csum * 2 + csum * emb * 2 + 2 * emb * 512 * 2
                           + 512 * 256 * 2 + 256 * out_ch * 2 + B * out_ch * 4))
    bcast = lambda b, t: (0, 0)
    out = pl.pallas_call(
        functools.partial(_conv5_head_kernel, n_total=N),
        out_shape=jax.ShapeDtypeStruct((B, 1, out_ch), jnp.float32),
        grid=grid,
        in_specs=[
            pl.BlockSpec((1, tn, c1), lambda b, t: (b, t, 0)),
            pl.BlockSpec((1, tn, c2), lambda b, t: (b, t, 0)),
            pl.BlockSpec((1, tn, c3), lambda b, t: (b, t, 0)),
            pl.BlockSpec((1, tn, c4), lambda b, t: (b, t, 0)),
            pl.BlockSpec((c1, emb), bcast),
            pl.BlockSpec((c2, emb), bcast),
            pl.BlockSpec((c3, emb), bcast),
            pl.BlockSpec((c4, emb), bcast),
            pl.BlockSpec((1, emb), bcast),
            pl.BlockSpec((1, emb), bcast),
            pl.BlockSpec((emb, 512), bcast),
            pl.BlockSpec((emb, 512), bcast),
            pl.BlockSpec((1, 512), bcast),
            pl.BlockSpec((1, 512), bcast),
            pl.BlockSpec((512, 256), bcast),
            pl.BlockSpec((1, 256), bcast),
            pl.BlockSpec((1, 256), bcast),
            pl.BlockSpec((1, 256), bcast),
            pl.BlockSpec((256, out_ch), bcast),
            pl.BlockSpec((1, out_ch), bcast),
        ],
        out_specs=pl.BlockSpec((1, 1, out_ch), lambda b, t: (b, 0, 0)),
        scratch_shapes=[pltpu.VMEM((1, emb), jnp.float32),    # running max
                        pltpu.VMEM((1, emb), jnp.float32)],   # running sum
        compiler_params=_cparams(("parallel", "arbitrary")),
        cost_estimate=cost,
    )(x1, x2, x3, x4,
      p["w51"], p["w52"], p["w53"], p["w54"], p["s5"], p["b5"],
      p["wl1a"], p["wl1b"], p["s6"], p["b6"],
      p["wl2"], p["bl2"], p["s7"], p["b7"], p["wl3"], p["bl3"])
    return out.reshape(B, out_ch)


# ---------------------------------------------------------------------------
# Full forward pass
# ---------------------------------------------------------------------------
def dgcnn_forward(x, p, k):
    # x: (B, 3, N)  (PyTorch input layout)
    x_cl = jnp.transpose(x, (0, 2, 1))                               # (B, N, 3) f32

    idx = knn_indices(x_cl, k)                                       # layer-1 kNN on raw coords
    x1 = edge_conv(idx, x_cl.astype(jnp.bfloat16),
                   p["w1a"], p["w1d"], p["s1"], p["b1"], k)          # (B, N, 64) bf16
    idx = knn_indices(x1, k)
    x2 = edge_conv(idx, x1, p["w2a"], p["w2d"], p["s2"], p["b2"], k) # (B, N, 64)
    idx = knn_indices(x2, k)
    x3 = edge_conv(idx, x2, p["w3a"], p["w3d"], p["s3"], p["b3"], k) # (B, N, 128)
    idx = knn_indices(x3, k)
    x4 = edge_conv(idx, x3, p["w4a"], p["w4d"], p["s4"], p["b4"], k) # (B, N, 256)

    return conv5_head(x1, x2, x3, x4, p)                             # (B, output_channels)


# ---------------------------------------------------------------------------
# Deterministic parameter init (fresh-module semantics, inference mode)
# ---------------------------------------------------------------------------
def init_params(key, emb_dims, output_channels):
    keys = iter(jax.random.split(key, 40))
    p = {}

    def mat(cin, cout):
        return jax.random.normal(next(keys), (cin, cout), jnp.float32) / jnp.sqrt(cin)

    def bn(c):
        gamma = jax.random.uniform(next(keys), (c,), jnp.float32, 0.5, 1.5)
        beta = 0.1 * jax.random.normal(next(keys), (c,), jnp.float32)
        mean = jnp.zeros((c,), jnp.float32)
        var = jnp.ones((c,), jnp.float32)
        scale = gamma / jnp.sqrt(var + BN_EPS)
        bias = beta - mean * scale
        # Edge-conv applies BN+LeakyReLU *after* the max over k; only valid for
        # strictly positive BN scales — guard it on the concrete init values.
        assert float(jnp.min(scale)) > 0.0
        return scale.reshape(1, c), bias.reshape(1, c)

    def edge_w(cin, cout, name):
        w = mat(2 * cin, cout)                     # full (2C, Cout) 1x1-conv weight
        p[name + "a"] = w[:cin].astype(jnp.bfloat16)              # W_a
        p[name + "d"] = (w[cin:] - w[:cin]).astype(jnp.bfloat16)  # W_b - W_a

    edge_w(3, 64, "w1");    p["s1"], p["b1"] = bn(64)
    edge_w(64, 64, "w2");   p["s2"], p["b2"] = bn(64)
    edge_w(64, 128, "w3");  p["s3"], p["b3"] = bn(128)
    edge_w(128, 256, "w4"); p["s4"], p["b4"] = bn(256)

    w5 = mat(512, emb_dims)                         # conv5, split per cat member
    p["w51"] = w5[0:64].astype(jnp.bfloat16)
    p["w52"] = w5[64:128].astype(jnp.bfloat16)
    p["w53"] = w5[128:256].astype(jnp.bfloat16)
    p["w54"] = w5[256:512].astype(jnp.bfloat16)
    p["s5"], p["b5"] = bn(emb_dims)

    wl1 = mat(emb_dims * 2, 512)
    p["wl1a"] = wl1[:emb_dims].astype(jnp.bfloat16)   # acts on max-pooled half
    p["wl1b"] = wl1[emb_dims:].astype(jnp.bfloat16)   # acts on avg-pooled half
    p["s6"], p["b6"] = bn(512)
    p["wl2"] = mat(512, 256).astype(jnp.bfloat16)
    p["bl2"] = (0.01 * jax.random.normal(next(keys), (256,), jnp.float32)).reshape(1, 256)
    p["s7"], p["b7"] = bn(256)
    p["wl3"] = mat(256, output_channels).astype(jnp.bfloat16)
    p["bl3"] = (0.01 * jax.random.normal(next(keys), (output_channels,),
                                         jnp.float32)).reshape(1, output_channels)
    return p


if __name__ == "__main__":
    B, N, K = 2, 32, 8            # small shapes: batch=2, 32 points, k=8 neighbors
    EMB_DIMS, OUT_CH = 64, 40

    key = jax.random.PRNGKey(0)
    kx, kp = jax.random.split(key)
    x = jax.random.normal(kx, (B, 3, N), jnp.float32)   # PyTorch input layout (B, 3, N)
    params = init_params(kp, EMB_DIMS, OUT_CH)

    fwd = jax.jit(functools.partial(dgcnn_forward, k=K))
    out = fwd(x, params)
    out = jax.block_until_ready(out)

    assert out.shape == (B, OUT_CH), out.shape
    assert bool(jnp.all(jnp.isfinite(out)))
    print("KERNEL_OK")
</pallas_src>

<mosaic_0001>
module attributes {stable_mosaic.version = 11 : i64} {
  func.func @_pairwise_kernel(%arg0: i32, %arg1: memref<1x32x3xf32, #tpu.memory_space<vmem>>, %arg2: memref<1x32x32xf32, #tpu.memory_space<vmem>>) attributes {dimension_semantics = [#tpu.dimension_semantics<parallel>], iteration_bounds = array<i64: 2>, scalar_prefetch = 0 : i64, scratch_operands = 0 : i64, tpu.core_type = #tpu.core_type<tc>, window_params = [{transform_indices = @transform_0, window_bounds = array<i64: 1, 32, 3>}, {transform_indices = @transform_1, window_bounds = array<i64: 1, 32, 32>}]} {
    %c0 = arith.constant 0 : index
    %c0_0 = arith.constant 0 : index
    %c0_1 = arith.constant 0 : index
    %0 = vector.load %arg1[%c0, %c0_0, %c0_1] : memref<1x32x3xf32, #tpu.memory_space<vmem>>, vector<1x32x3xf32>
    %1 = vector.shape_cast %0 : vector<1x32x3xf32> to vector<32x3xf32>
    %cst = arith.constant dense<0.000000e+00> : vector<32x32xf32>
    %2 = tpu.matmul %1, %1, %cst {dimension_numbers = #tpu.dot_dimension_numbers<[1], [1], [0], [0], [0, 0, 1, 0], [], []>} : vector<32x3xf32>, vector<32x3xf32>, vector<32x32xf32> -> vector<32x32xf32>
    %3 = arith.mulf %1, %1 : vector<32x3xf32>
    %cst_2 = arith.constant dense<0.000000e+00> : vector<32xf32>
    %4 = vector.multi_reduction <add>, %3, %cst_2 [1] : vector<32x3xf32> to vector<32xf32>
    %5 = vector.shape_cast %4 : vector<32xf32> to vector<32x1xf32>
    %cst_3 = arith.constant 2.000000e+00 : f32
    %6 = vector.broadcast %cst_3 : f32 to vector<32x32xf32>
    %7 = arith.mulf %6, %2 : vector<32x32xf32>
    %8 = tpu.transpose %5, [1, 0] : vector<32x1xf32> -> vector<1x32xf32>
    %9 = vector.broadcast %8 : vector<1x32xf32> to vector<32x32xf32>
    %10 = arith.subf %7, %9 : vector<32x32xf32>
    %c0_4 = arith.constant 0 : index
    %c0_5 = arith.constant 0 : index
    %c0_6 = arith.constant 0 : index
    %11 = vector.load %arg2[%c0_4, %c0_5, %c0_6] : memref<1x32x32xf32, #tpu.memory_space<vmem>>, vector<1x32x32xf32>
    %12 = vector.shape_cast %11 : vector<1x32x32xf32> to vector<32x32xf32>
    %13 = vector.shape_cast %10 : vector<32x32xf32> to vector<1x32x32xf32>
    tpu.vector_store %arg2[%c0_4, %c0_5, %c0_6], %13 {strides = array<i32>} : memref<1x32x32xf32, #tpu.memory_space<vmem>>, vector<1x32x32xf32>,
    return
  }
  func.func @transform_0(%arg0: i32) -> (i32, i32, i32) {
    %c0_i32 = arith.constant 0 : i32
    %c0_i32_0 = arith.constant 0 : i32
    %c0_i32_1 = arith.constant 0 : i32
    return %arg0, %c0_i32, %c0_i32_0 : i32, i32, i32
  }
  func.func @transform_1(%arg0: i32) -> (i32, i32, i32) {
    %c0_i32 = arith.constant 0 : i32
    %c0_i32_0 = arith.constant 0 : i32
    %c0_i32_1 = arith.constant 0 : i32
    return %arg0, %c0_i32, %c0_i32_0 : i32, i32, i32
  }
}

module attributes {stable_mosaic.version = 11 : i64} {
  func.func @_edge_conv_kernel(%arg0: i32, %arg1: memref<1x32x8xi32, #tpu.memory_space<vmem>>, %arg2: memref<1x32x3xbf16, #tpu.memory_space<vmem>>, %arg3: memref<3x64xbf16, #tpu.memory_space<vmem>>, %arg4: memref<3x64xbf16, #tpu.memory_space<vmem>>, %arg5: memref<1x64xf32, #tpu.memory_space<vmem>>, %arg6: memref<1x64xf32, #tpu.memory_space<vmem>>, %arg7: memref<1x32x64xbf16, #tpu.memory_space<vmem>>) attributes {dimension_semantics = [#tpu.dimension_semantics<parallel>], iteration_bounds = array<i64: 2>, scalar_prefetch = 0 : i64, scratch_operands = 0 : i64, tpu.core_type = #tpu.core_type<tc>, window_params = [{transform_indices = @transform_0, window_bounds = array<i64: 1, 32, 8>}, {transform_indices = @transform_1, window_bounds = array<i64: 1, 32, 3>}, {pipeline_mode = #tpu.pipeline_mode<synchronous>, transform_indices = @transform_2, window_bounds = array<i64: 3, 64>}, {pipeline_mode = #tpu.pipeline_mode<synchronous>, transform_indices = @transform_3, window_bounds = array<i64: 3, 64>}, {pipeline_mode = #tpu.pipeline_mode<synchronous>, transform_indices = @transform_4, window_bounds = array<i64: 1, 64>}, {pipeline_mode = #tpu.pipeline_mode<synchronous>, transform_indices = @transform_5, window_bounds = array<i64: 1, 64>}, {transform_indices = @transform_6, window_bounds = array<i64: 1, 32, 64>}]} {
    %c0 = arith.constant 0 : index
    %c0_0 = arith.constant 0 : index
    %c0_1 = arith.constant 0 : index
    %0 = vector.load %arg2[%c0, %c0_0, %c0_1] : memref<1x32x3xbf16, #tpu.memory_space<vmem>>, vector<1x32x3xbf16>
    %1 = vector.shape_cast %0 : vector<1x32x3xbf16> to vector<32x3xbf16>
    %c0_2 = arith.constant 0 : index
    %c0_3 = arith.constant 0 : index
    %2 = vector.load %arg3[%c0_2, %c0_3] : memref<3x64xbf16, #tpu.memory_space<vmem>>, vector<3x64xbf16>
    %cst = arith.constant dense<0.000000e+00> : vector<32x64xf32>
    %3 = tpu.matmul %1, %2, %cst {dimension_numbers = #tpu.dot_dimension_numbers<[1], [0], [0], [1], [0, 0, 1, 1], [], []>} : vector<32x3xbf16>, vector<3x64xbf16>, vector<32x64xf32> -> vector<32x64xf32>
    %c0_4 = arith.constant 0 : index
    %c0_5 = arith.constant 0 : index
    %4 = vector.load %arg4[%c0_4, %c0_5] : memref<3x64xbf16, #tpu.memory_space<vmem>>, vector<3x64xbf16>
    %cst_6 = arith.constant dense<0.000000e+00> : vector<32x64xf32>
    %5 = tpu.matmul %1, %4, %cst_6 {dimension_numbers = #tpu.dot_dimension_numbers<[1], [0], [0], [1], [0, 0, 1, 1], [], []>} : vector<32x3xbf16>, vector<3x64xbf16>, vector<32x64xf32> -> vector<32x64xf32>
    %6 = arith.truncf %3 : vector<32x64xf32> to vector<32x64xbf16>
    %c0_7 = arith.constant 0 : index
    %c0_8 = arith.constant 0 : index
    %c0_9 = arith.constant 0 : index
    %7 = vector.load %arg1[%c0_7, %c0_8, %c0_9] : memref<1x32x8xi32, #tpu.memory_space<vmem>>, vector<1x32x8xi32>
    %8 = vector.shape_cast %7 : vector<1x32x8xi32> to vector<32x8xi32>
    %9 = tpu.iota {dimensions = array<i32: 1>} : vector<32x32xi32>
    %10 = vector.extract_strided_slice %8 {offsets = [0, 0], sizes = [32, 1], strides = [1, 1]} : vector<32x8xi32> to vector<32x1xi32>
    %11 = vector.broadcast %10 : vector<32x1xi32> to vector<32x32xi32>
    %12 = arith.cmpi eq, %11, %9 : vector<32x32xi32>
    %13 = arith.extui %12 : vector<32x32xi1> to vector<32x32xi32>
    %14 = arith.sitofp %13 : vector<32x32xi32> to vector<32x32xf32>
    %15 = arith.truncf %14 : vector<32x32xf32> to vector<32x32xbf16>
    %cst_10 = arith.constant dense<0.000000e+00> : vector<32x64xf32>
    %16 = tpu.matmul %15, %6, %cst_10 {dimension_numbers = #tpu.dot_dimension_numbers<[1], [0], [0], [1], [0, 0, 1, 1], [], []>} : vector<32x32xbf16>, vector<32x64xbf16>, vector<32x64xf32> -> vector<32x64xf32>
    %17 = vector.extract_strided_slice %8 {offsets = [0, 1], sizes = [32, 1], strides = [1, 1]} : vector<32x8xi32> to vector<32x1xi32>
    %18 = vector.broadcast %17 : vector<32x1xi32> to vector<32x32xi32>
    %19 = arith.cmpi eq, %18, %9 : vector<32x32xi32>
    %20 = arith.extui %19 : vector<32x32xi1> to vector<32x32xi32>
    %21 = arith.sitofp %20 : vector<32x32xi32> to vector<32x32xf32>
    %22 = arith.truncf %21 : vector<32x32xf32> to vector<32x32xbf16>
    %cst_11 = arith.constant dense<0.000000e+00> : vector<32x64xf32>
    %23 = tpu.matmul %22, %6, %cst_11 {dimension_numbers = #tpu.dot_dimension_numbers<[1], [0], [0], [1], [0, 0, 1, 1], [], []>} : vector<32x32xbf16>, vector<32x64xbf16>, vector<32x64xf32> -> vector<32x64xf32>
    %24 = arith.maximumf %16, %23 : vector<32x64xf32>
    %25 = vector.extract_strided_slice %8 {offsets = [0, 2], sizes = [32, 1], strides = [1, 1]} : vector<32x8xi32> to vector<32x1xi32>
    %26 = vector.broadcast %25 : vector<32x1xi32> to vector<32x32xi32>
    %27 = arith.cmpi eq, %26, %9 : vector<32x32xi32>
    %28 = arith.extui %27 : vector<32x32xi1> to vector<32x32xi32>
    %29 = arith.sitofp %28 : vector<32x32xi32> to vector<32x32xf32>
    %30 = arith.truncf %29 : vector<32x32xf32> to vector<32x32xbf16>
    %cst_12 = arith.constant dense<0.000000e+00> : vector<32x64xf32>
    %31 = tpu.matmul %30, %6, %cst_12 {dimension_numbers = #tpu.dot_dimension_numbers<[1], [0], [0], [1], [0, 0, 1, 1], [], []>} : vector<32x32xbf16>, vector<32x64xbf16>, vector<32x64xf32> -> vector<32x64xf32>
    %32 = arith.maximumf %24, %31 : vector<32x64xf32>
    %33 = vector.extract_strided_slice %8 {offsets = [0, 3], sizes = [32, 1], strides = [1, 1]} : vector<32x8xi32> to vector<32x1xi32>
    %34 = vector.broadcast %33 : vector<32x1xi32> to vector<32x32xi32>
    %35 = arith.cmpi eq, %34, %9 : vector<32x32xi32>
    %36 = arith.extui %35 : vector<32x32xi1> to vector<32x32xi32>
    %37 = arith.sitofp %36 : vector<32x32xi32> to vector<32x32xf32>
    %38 = arith.truncf %37 : vector<32x32xf32> to vector<32x32xbf16>
    %cst_13 = arith.constant dense<0.000000e+00> : vector<32x64xf32>
    %39 = tpu.matmul %38, %6, %cst_13 {dimension_numbers = #tpu.dot_dimension_numbers<[1], [0], [0], [1], [0, 0, 1, 1], [], []>} : vector<32x32xbf16>, vector<32x64xbf16>, vector<32x64xf32> -> vector<32x64xf32>
    %40 = arith.maximumf %32, %39 : vector<32x64xf32>
    %41 = vector.extract_strided_slice %8 {offsets = [0, 4], sizes = [32, 1], strides = [1, 1]} : vector<32x8xi32> to vector<32x1xi32>
    %42 = vector.broadcast %41 : vector<32x1xi32> to vector<32x32xi32>
    %43 = arith.cmpi eq, %42, %9 : vector<32x32xi32>
    %44 = arith.extui %43 : vector<32x32xi1> to vector<32x32xi32>
    %45 = arith.sitofp %44 : vector<32x32xi32> to vector<32x32xf32>
    %46 = arith.truncf %45 : vector<32x32xf32> to vector<32x32xbf16>
    %cst_14 = arith.constant dense<0.000000e+00> : vector<32x64xf32>
    %47 = tpu.matmul %46, %6, %cst_14 {dimension_numbers = #tpu.dot_dimension_numbers<[1], [0], [0], [1], [0, 0, 1, 1], [], []>} : vector<32x32xbf16>, vector<32x64xbf16>, vector<32x64xf32> -> vector<32x64xf32>
    %48 = arith.maximumf %40, %47 : vector<32x64xf32>
    %49 = vector.extract_strided_slice %8 {offsets = [0, 5], sizes = [32, 1], strides = [1, 1]} : vector<32x8xi32> to vector<32x1xi32>
    %50 = vector.broadcast %49 : vector<32x1xi32> to vector<32x32xi32>
    %51 = arith.cmpi eq, %50, %9 : vector<32x32xi32>
    %52 = arith.extui %51 : vector<32x32xi1> to vector<32x32xi32>
    %53 = arith.sitofp %52 : vector<32x32xi32> to vector<32x32xf32>
    %54 = arith.truncf %53 : vector<32x32xf32> to vector<32x32xbf16>
    %cst_15 = arith.constant dense<0.000000e+00> : vector<32x64xf32>
    %55 = tpu.matmul %54, %6, %cst_15 {dimension_numbers = #tpu.dot_dimension_numbers<[1], [0], [0], [1], [0, 0, 1, 1], [], []>} : vector<32x32xbf16>, vector<32x64xbf16>, vector<32x64xf32> -> vector<32x64xf32>
    %56 = arith.maximumf %48, %55 : vector<32x64xf32>
    %57 = vector.extract_strided_slice %8 {offsets = [0, 6], sizes = [32, 1], strides = [1, 1]} : vector<32x8xi32> to vector<32x1xi32>
    %58 = vector.broadcast %57 : vector<32x1xi32> to vector<32x32xi32>
    %59 = arith.cmpi eq, %58, %9 : vector<32x32xi32>
    %60 = arith.extui %59 : vector<32x32xi1> to vector<32x32xi32>
    %61 = arith.sitofp %60 : vector<32x32xi32> to vector<32x32xf32>
    %62 = arith.truncf %61 : vector<32x32xf32> to vector<32x32xbf16>
    %cst_16 = arith.constant dense<0.000000e+00> : vector<32x64xf32>
    %63 = tpu.matmul %62, %6, %cst_16 {dimension_numbers = #tpu.dot_dimension_numbers<[1], [0], [0], [1], [0, 0, 1, 1], [], []>} : vector<32x32xbf16>, vector<32x64xbf16>, vector<32x64xf32> -> vector<32x64xf32>
    %64 = arith.maximumf %56, %63 : vector<32x64xf32>
    %65 = vector.extract_strided_slice %8 {offsets = [0, 7], sizes = [32, 1], strides = [1, 1]} : vector<32x8xi32> to vector<32x1xi32>
    %66 = vector.broadcast %65 : vector<32x1xi32> to vector<32x32xi32>
    %67 = arith.cmpi eq, %66, %9 : vector<32x32xi32>
    %68 = arith.extui %67 : vector<32x32xi1> to vector<32x32xi32>
    %69 = arith.sitofp %68 : vector<32x32xi32> to vector<32x32xf32>
    %70 = arith.truncf %69 : vector<32x32xf32> to vector<32x32xbf16>
    %cst_17 = arith.constant dense<0.000000e+00> : vector<32x64xf32>
    %71 = tpu.matmul %70, %6, %cst_17 {dimension_numbers = #tpu.dot_dimension_numbers<[1], [0], [0], [1], [0, 0, 1, 1], [], []>} : vector<32x32xbf16>, vector<32x64xbf16>, vector<32x64xf32> -> vector<32x64xf32>
    %72 = arith.maximumf %64, %71 : vector<32x64xf32>
    %73 = arith.addf %72, %5 : vector<32x64xf32>
    %c0_18 = arith.constant 0 : index
    %c0_19 = arith.constant 0 : index
    %74 = vector.load %arg5[%c0_18, %c0_19] : memref<1x64xf32, #tpu.memory_space<vmem>>, vector<1x64xf32>
    %75 = vector.broadcast %74 : vector<1x64xf32> to vector<32x64xf32>
    %76 = arith.mulf %73, %75 : vector<32x64xf32>
    %c0_20 = arith.constant 0 : index
    %c0_21 = arith.constant 0 : index
    %77 = vector.load %arg6[%c0_20, %c0_21] : memref<1x64xf32, #tpu.memory_space<vmem>>, vector<1x64xf32>
    %78 = vector.broadcast %77 : vector<1x64xf32> to vector<32x64xf32>
    %79 = arith.addf %76, %78 : vector<32x64xf32>
    %cst_22 = arith.constant 0.000000e+00 : f32
    %80 = vector.broadcast %cst_22 : f32 to vector<32x64xf32>
    %81 = arith.cmpf ogt, %79, %80 : vector<32x64xf32>
    %cst_23 = arith.constant 2.000000e-01 : f32
    %82 = vector.broadcast %cst_23 : f32 to vector<32x64xf32>
    %83 = arith.mulf %82, %79 : vector<32x64xf32>
    %84 = arith.select %81, %79, %83 : vector<32x64xi1>, vector<32x64xf32>
    %85 = arith.truncf %84 : vector<32x64xf32> to vector<32x64xbf16>
    %c0_24 = arith.constant 0 : index
    %c0_25 = arith.constant 0 : index
    %c0_26 = arith.constant 0 : index
    %86 = vector.load %arg7[%c0_24, %c0_25, %c0_26] : memref<1x32x64xbf16, #tpu.memory_space<vmem>>, vector<1x32x64xbf16>
    %87 = vector.shape_cast %86 : vector<1x32x64xbf16> to vector<32x64xbf16>
    %88 = vector.shape_cast %85 : vector<32x64xbf16> to vector<1x32x64xbf16>
    tpu.vector_store %arg7[%c0_24, %c0_25, %c0_26], %88 {strides = array<i32>} : memref<1x32x64xbf16, #tpu.memory_space<vmem>>, vector<1x32x64xbf16>,
    return
  }
  func.func @transform_0(%arg0: i32) -> (i32, i32, i32) {
    %c0_i32 = arith.constant 0 : i32
    %c0_i32_0 = arith.constant 0 : i32
    %c0_i32_1 = arith.constant 0 : i32
    return %arg0, %c0_i32, %c0_i32_0 : i32, i32, i32
  }
  func.func @transform_1(%arg0: i32) -> (i32, i32, i32) {
    %c0_i32 = arith.constant 0 : i32
    %c0_i32_0 = arith.constant 0 : i32
    %c0_i32_1 = arith.constant 0 : i32
    return %arg0, %c0_i32, %c0_i32_0 : i32, i32, i32
  }
  func.func @transform_2(%arg0: i32) -> (i32, i32) {
    %c0_i32 = arith.constant 0 : i32
    %c0_i32_0 = arith.constant 0 : i32
    %c0_i32_1 = arith.constant 0 : i32
    return %c0_i32, %c0_i32_0 : i32, i32
  }
  func.func @transform_3(%arg0: i32) -> (i32, i32) {
    %c0_i32 = arith.constant 0 : i32
    %c0_i32_0 = arith.constant 0 : i32
    %c0_i32_1 = arith.constant 0 : i32
    return %c0_i32, %c0_i32_0 : i32, i32
  }
  func.func @transform_4(%arg0: i32) -> (i32, i32) {
    %c0_i32 = arith.constant 0 : i32
    %c0_i32_0 = arith.constant 0 : i32
    %c0_i32_1 = arith.constant 0 : i32
    return %c0_i32, %c0_i32_0 : i32, i32
  }
  func.func @transform_5(%arg0: i32) -> (i32, i32) {
    %c0_i32 = arith.constant 0 : i32
    %c0_i32_0 = arith.constant 0 : i32
    %c0_i32_1 = arith.constant 0 : i32
    return %c0_i32, %c0_i32_0 : i32, i32
  }
  func.func @transform_6(%arg0: i32) -> (i32, i32, i32) {
    %c0_i32 = arith.constant 0 : i32
    %c0_i32_0 = arith.constant 0 : i32
    %c0_i32_1 = arith.constant 0 : i32
    return %arg0, %c0_i32, %c0_i32_0 : i32, i32, i32
  }
}

module attributes {stable_mosaic.version = 11 : i64} {
  func.func @_pairwise_kernel(%arg0: i32, %arg1: memref<1x32x64xbf16, #tpu.memory_space<vmem>>, %arg2: memref<1x32x32xf32, #tpu.memory_space<vmem>>) attributes {dimension_semantics = [#tpu.dimension_semantics<parallel>], iteration_bounds = array<i64: 2>, scalar_prefetch = 0 : i64, scratch_operands = 0 : i64, tpu.core_type = #tpu.core_type<tc>, window_params = [{transform_indices = @transform_0, window_bounds = array<i64: 1, 32, 64>}, {transform_indices = @transform_1, window_bounds = array<i64: 1, 32, 32>}]} {
    %c0 = arith.constant 0 : index
    %c0_0 = arith.constant 0 : index
    %c0_1 = arith.constant 0 : index
    %0 = vector.load %arg1[%c0, %c0_0, %c0_1] : memref<1x32x64xbf16, #tpu.memory_space<vmem>>, vector<1x32x64xbf16>
    %1 = vector.shape_cast %0 : vector<1x32x64xbf16> to vector<32x64xbf16>
    %cst = arith.constant dense<0.000000e+00> : vector<32x32xf32>
    %2 = tpu.matmul %1, %1, %cst {dimension_numbers = #tpu.dot_dimension_numbers<[1], [1], [0], [0], [0, 0, 1, 0], [], []>} : vector<32x64xbf16>, vector<32x64xbf16>, vector<32x32xf32> -> vector<32x32xf32>
    %3 = arith.extf %1 : vector<32x64xbf16> to vector<32x64xf32>
    %4 = arith.mulf %3, %3 : vector<32x64xf32>
    %cst_2 = arith.constant dense<0.000000e+00> : vector<32xf32>
    %5 = vector.multi_reduction <add>, %4, %cst_2 [1] : vector<32x64xf32> to vector<32xf32>
    %6 = vector.shape_cast %5 : vector<32xf32> to vector<32x1xf32>
    %cst_3 = arith.constant 2.000000e+00 : f32
    %7 = vector.broadcast %cst_3 : f32 to vector<32x32xf32>
    %8 = arith.mulf %7, %2 : vector<32x32xf32>
    %9 = tpu.transpose %6, [1, 0] : vector<32x1xf32> -> vector<1x32xf32>
    %10 = vector.broadcast %9 : vector<1x32xf32> to vector<32x32xf32>
    %11 = arith.subf %8, %10 : vector<32x32xf32>
    %c0_4 = arith.constant 0 : index
    %c0_5 = arith.constant 0 : index
    %c0_6 = arith.constant 0 : index
    %12 = vector.load %arg2[%c0_4, %c0_5, %c0_6] : memref<1x32x32xf32, #tpu.memory_space<vmem>>, vector<1x32x32xf32>
    %13 = vector.shape_cast %12 : vector<1x32x32xf32> to vector<32x32xf32>
    %14 = vector.shape_cast %11 : vector<32x32xf32> to vector<1x32x32xf32>
    tpu.vector_store %arg2[%c0_4, %c0_5, %c0_6], %14 {strides = array<i32>} : memref<1x32x32xf32, #tpu.memory_space<vmem>>, vector<1x32x32xf32>,
    return
  }
  func.func @transform_0(%arg0: i32) -> (i32, i32, i32) {
    %c0_i32 = arith.constant 0 : i32
    %c0_i32_0 = arith.constant 0 : i32
    %c0_i32_1 = arith.constant 0 : i32
    return %arg0, %c0_i32, %c0_i32_0 : i32, i32, i32
  }
  func.func @transform_1(%arg0: i32) -> (i32, i32, i32) {
    %c0_i32 = arith.constant 0 : i32
    %c0_i32_0 = arith.constant 0 : i32
    %c0_i32_1 = arith.constant 0 : i32
    return %arg0, %c0_i32, %c0_i32_0 : i32, i32, i32
  }
}

module attributes {stable_mosaic.version = 11 : i64} {
  func.func @_edge_conv_kernel(%arg0: i32, %arg1: memref<1x32x8xi32, #tpu.memory_space<vmem>>, %arg2: memref<1x32x64xbf16, #tpu.memory_space<vmem>>, %arg3: memref<64x64xbf16, #tpu.memory_space<vmem>>, %arg4: memref<64x64xbf16, #tpu.memory_space<vmem>>, %arg5: memref<1x64xf32, #tpu.memory_space<vmem>>, %arg6: memref<1x64xf32, #tpu.memory_space<vmem>>, %arg7: memref<1x32x64xbf16, #tpu.memory_space<vmem>>) attributes {dimension_semantics = [#tpu.dimension_semantics<parallel>], iteration_bounds = array<i64: 2>, scalar_prefetch = 0 : i64, scratch_operands = 0 : i64, tpu.core_type = #tpu.core_type<tc>, window_params = [{transform_indices = @transform_0, window_bounds = array<i64: 1, 32, 8>}, {transform_indices = @transform_1, window_bounds = array<i64: 1, 32, 64>}, {pipeline_mode = #tpu.pipeline_mode<synchronous>, transform_indices = @transform_2, window_bounds = array<i64: 64, 64>}, {pipeline_mode = #tpu.pipeline_mode<synchronous>, transform_indices = @transform_3, window_bounds = array<i64: 64, 64>}, {pipeline_mode = #tpu.pipeline_mode<synchronous>, transform_indices = @transform_4, window_bounds = array<i64: 1, 64>}, {pipeline_mode = #tpu.pipeline_mode<synchronous>, transform_indices = @transform_5, window_bounds = array<i64: 1, 64>}, {transform_indices = @transform_6, window_bounds = array<i64: 1, 32, 64>}]} {
    %c0 = arith.constant 0 : index
    %c0_0 = arith.constant 0 : index
    %c0_1 = arith.constant 0 : index
    %0 = vector.load %arg2[%c0, %c0_0, %c0_1] : memref<1x32x64xbf16, #tpu.memory_space<vmem>>, vector<1x32x64xbf16>
    %1 = vector.shape_cast %0 : vector<1x32x64xbf16> to vector<32x64xbf16>
    %c0_2 = arith.constant 0 : index
    %c0_3 = arith.constant 0 : index
    %2 = vector.load %arg3[%c0_2, %c0_3] : memref<64x64xbf16, #tpu.memory_space<vmem>>, vector<64x64xbf16>
    %cst = arith.constant dense<0.000000e+00> : vector<32x64xf32>
    %3 = tpu.matmul %1, %2, %cst {dimension_numbers = #tpu.dot_dimension_numbers<[1], [0], [0], [1], [0, 0, 1, 1], [], []>} : vector<32x64xbf16>, vector<64x64xbf16>, vector<32x64xf32> -> vector<32x64xf32>
    %c0_4 = arith.constant 0 : index
    %c0_5 = arith.constant 0 : index
    %4 = vector.load %arg4[%c0_4, %c0_5] : memref<64x64xbf16, #tpu.memory_space<vmem>>, vector<64x64xbf16>
    %cst_6 = arith.constant dense<0.000000e+00> : vector<32x64xf32>
    %5 = tpu.matmul %1, %4, %cst_6 {dimension_numbers = #tpu.dot_dimension_numbers<[1], [0], [0], [1], [0, 0, 1, 1], [], []>} : vector<32x64xbf16>, vector<64x64xbf16>, vector<32x64xf32> -> vector<32x64xf32>
    %6 = arith.truncf %3 : vector<32x64xf32> to vector<32x64xbf16>
    %c0_7 = arith.constant 0 : index
    %c0_8 = arith.constant 0 : index
    %c0_9 = arith.constant 0 : index
    %7 = vector.load %arg1[%c0_7, %c0_8, %c0_9] : memref<1x32x8xi32, #tpu.memory_space<vmem>>, vector<1x32x8xi32>
    %8 = vector.shape_cast %7 : vector<1x32x8xi32> to vector<32x8xi32>
    %9 = tpu.iota {dimensions = array<i32: 1>} : vector<32x32xi32>
    %10 = vector.extract_strided_slice %8 {offsets = [0, 0], sizes = [32, 1], strides = [1, 1]} : vector<32x8xi32> to vector<32x1xi32>
    %11 = vector.broadcast %10 : vector<32x1xi32> to vector<32x32xi32>
    %12 = arith.cmpi eq, %11, %9 : vector<32x32xi32>
    %13 = arith.extui %12 : vector<32x32xi1> to vector<32x32xi32>
    %14 = arith.sitofp %13 : vector<32x32xi32> to vector<32x32xf32>
    %15 = arith.truncf %14 : vector<32x32xf32> to vector<32x32xbf16>
    %cst_10 = arith.constant dense<0.000000e+00> : vector<32x64xf32>
    %16 = tpu.matmul %15, %6, %cst_10 {dimension_numbers = #tpu.dot_dimension_numbers<[1], [0], [0], [1], [0, 0, 1, 1], [], []>} : vector<32x32xbf16>, vector<32x64xbf16>, vector<32x64xf32> -> vector<32x64xf32>
    %17 = vector.extract_strided_slice %8 {offsets = [0, 1], sizes = [32, 1], strides = [1, 1]} : vector<32x8xi32> to vector<32x1xi32>
    %18 = vector.broadcast %17 : vector<32x1xi32> to vector<32x32xi32>
    %19 = arith.cmpi eq, %18, %9 : vector<32x32xi32>
    %20 = arith.extui %19 : vector<32x32xi1> to vector<32x32xi32>
    %21 = arith.sitofp %20 : vector<32x32xi32> to vector<32x32xf32>
    %22 = arith.truncf %21 : vector<32x32xf32> to vector<32x32xbf16>
    %cst_11 = arith.constant dense<0.000000e+00> : vector<32x64xf32>
    %23 = tpu.matmul %22, %6, %cst_11 {dimension_numbers = #tpu.dot_dimension_numbers<[1], [0], [0], [1], [0, 0, 1, 1], [], []>} : vector<32x32xbf16>, vector<32x64xbf16>, vector<32x64xf32> -> vector<32x64xf32>
    %24 = arith.maximumf %16, %23 : vector<32x64xf32>
    %25 = vector.extract_strided_slice %8 {offsets = [0, 2], sizes = [32, 1], strides = [1, 1]} : vector<32x8xi32> to vector<32x1xi32>
    %26 = vector.broadcast %25 : vector<32x1xi32> to vector<32x32xi32>
    %27 = arith.cmpi eq, %26, %9 : vector<32x32xi32>
    %28 = arith.extui %27 : vector<32x32xi1> to vector<32x32xi32>
    %29 = arith.sitofp %28 : vector<32x32xi32> to vector<32x32xf32>
    %30 = arith.truncf %29 : vector<32x32xf32> to vector<32x32xbf16>
    %cst_12 = arith.constant dense<0.000000e+00> : vector<32x64xf32>
    %31 = tpu.matmul %30, %6, %cst_12 {dimension_numbers = #tpu.dot_dimension_numbers<[1], [0], [0], [1], [0, 0, 1, 1], [], []>} : vector<32x32xbf16>, vector<32x64xbf16>, vector<32x64xf32> -> vector<32x64xf32>
    %32 = arith.maximumf %24, %31 : vector<32x64xf32>
    %33 = vector.extract_strided_slice %8 {offsets = [0, 3], sizes = [32, 1], strides = [1, 1]} : vector<32x8xi32> to vector<32x1xi32>
    %34 = vector.broadcast %33 : vector<32x1xi32> to vector<32x32xi32>
    %35 = arith.cmpi eq, %34, %9 : vector<32x32xi32>
    %36 = arith.extui %35 : vector<32x32xi1> to vector<32x32xi32>
    %37 = arith.sitofp %36 : vector<32x32xi32> to vector<32x32xf32>
    %38 = arith.truncf %37 : vector<32x32xf32> to vector<32x32xbf16>
    %cst_13 = arith.constant dense<0.000000e+00> : vector<32x64xf32>
    %39 = tpu.matmul %38, %6, %cst_13 {dimension_numbers = #tpu.dot_dimension_numbers<[1], [0], [0], [1], [0, 0, 1, 1], [], []>} : vector<32x32xbf16>, vector<32x64xbf16>, vector<32x64xf32> -> vector<32x64xf32>
    %40 = arith.maximumf %32, %39 : vector<32x64xf32>
    %41 = vector.extract_strided_slice %8 {offsets = [0, 4], sizes = [32, 1], strides = [1, 1]} : vector<32x8xi32> to vector<32x1xi32>
    %42 = vector.broadcast %41 : vector<32x1xi32> to vector<32x32xi32>
    %43 = arith.cmpi eq, %42, %9 : vector<32x32xi32>
    %44 = arith.extui %43 : vector<32x32xi1> to vector<32x32xi32>
    %45 = arith.sitofp %44 : vector<32x32xi32> to vector<32x32xf32>
    %46 = arith.truncf %45 : vector<32x32xf32> to vector<32x32xbf16>
    %cst_14 = arith.constant dense<0.000000e+00> : vector<32x64xf32>
    %47 = tpu.matmul %46, %6, %cst_14 {dimension_numbers = #tpu.dot_dimension_numbers<[1], [0], [0], [1], [0, 0, 1, 1], [], []>} : vector<32x32xbf16>, vector<32x64xbf16>, vector<32x64xf32> -> vector<32x64xf32>
    %48 = arith.maximumf %40, %47 : vector<32x64xf32>
    %49 = vector.extract_strided_slice %8 {offsets = [0, 5], sizes = [32, 1], strides = [1, 1]} : vector<32x8xi32> to vector<32x1xi32>
    %50 = vector.broadcast %49 : vector<32x1xi32> to vector<32x32xi32>
    %51 = arith.cmpi eq, %50, %9 : vector<32x32xi32>
    %52 = arith.extui %51 : vector<32x32xi1> to vector<32x32xi32>
    %53 = arith.sitofp %52 : vector<32x32xi32> to vector<32x32xf32>
    %54 = arith.truncf %53 : vector<32x32xf32> to vector<32x32xbf16>
    %cst_15 = arith.constant dense<0.000000e+00> : vector<32x64xf32>
    %55 = tpu.matmul %54, %6, %cst_15 {dimension_numbers = #tpu.dot_dimension_numbers<[1], [0], [0], [1], [0, 0, 1, 1], [], []>} : vector<32x32xbf16>, vector<32x64xbf16>, vector<32x64xf32> -> vector<32x64xf32>
    %56 = arith.maximumf %48, %55 : vector<32x64xf32>
    %57 = vector.extract_strided_slice %8 {offsets = [0, 6], sizes = [32, 1], strides = [1, 1]} : vector<32x8xi32> to vector<32x1xi32>
    %58 = vector.broadcast %57 : vector<32x1xi32> to vector<32x32xi32>
    %59 = arith.cmpi eq, %58, %9 : vector<32x32xi32>
    %60 = arith.extui %59 : vector<32x32xi1> to vector<32x32xi32>
    %61 = arith.sitofp %60 : vector<32x32xi32> to vector<32x32xf32>
    %62 = arith.truncf %61 : vector<32x32xf32> to vector<32x32xbf16>
    %cst_16 = arith.constant dense<0.000000e+00> : vector<32x64xf32>
    %63 = tpu.matmul %62, %6, %cst_16 {dimension_numbers = #tpu.dot_dimension_numbers<[1], [0], [0], [1], [0, 0, 1, 1], [], []>} : vector<32x32xbf16>, vector<32x64xbf16>, vector<32x64xf32> -> vector<32x64xf32>
    %64 = arith.maximumf %56, %63 : vector<32x64xf32>
    %65 = vector.extract_strided_slice %8 {offsets = [0, 7], sizes = [32, 1], strides = [1, 1]} : vector<32x8xi32> to vector<32x1xi32>
    %66 = vector.broadcast %65 : vector<32x1xi32> to vector<32x32xi32>
    %67 = arith.cmpi eq, %66, %9 : vector<32x32xi32>
    %68 = arith.extui %67 : vector<32x32xi1> to vector<32x32xi32>
    %69 = arith.sitofp %68 : vector<32x32xi32> to vector<32x32xf32>
    %70 = arith.truncf %69 : vector<32x32xf32> to vector<32x32xbf16>
    %cst_17 = arith.constant dense<0.000000e+00> : vector<32x64xf32>
    %71 = tpu.matmul %70, %6, %cst_17 {dimension_numbers = #tpu.dot_dimension_numbers<[1], [0], [0], [1], [0, 0, 1, 1], [], []>} : vector<32x32xbf16>, vector<32x64xbf16>, vector<32x64xf32> -> vector<32x64xf32>
    %72 = arith.maximumf %64, %71 : vector<32x64xf32>
    %73 = arith.addf %72, %5 : vector<32x64xf32>
    %c0_18 = arith.constant 0 : index
    %c0_19 = arith.constant 0 : index
    %74 = vector.load %arg5[%c0_18, %c0_19] : memref<1x64xf32, #tpu.memory_space<vmem>>, vector<1x64xf32>
    %75 = vector.broadcast %74 : vector<1x64xf32> to vector<32x64xf32>
    %76 = arith.mulf %73, %75 : vector<32x64xf32>
    %c0_20 = arith.constant 0 : index
    %c0_21 = arith.constant 0 : index
    %77 = vector.load %arg6[%c0_20, %c0_21] : memref<1x64xf32, #tpu.memory_space<vmem>>, vector<1x64xf32>
    %78 = vector.broadcast %77 : vector<1x64xf32> to vector<32x64xf32>
    %79 = arith.addf %76, %78 : vector<32x64xf32>
    %cst_22 = arith.constant 0.000000e+00 : f32
    %80 = vector.broadcast %cst_22 : f32 to vector<32x64xf32>
    %81 = arith.cmpf ogt, %79, %80 : vector<32x64xf32>
    %cst_23 = arith.constant 2.000000e-01 : f32
    %82 = vector.broadcast %cst_23 : f32 to vector<32x64xf32>
    %83 = arith.mulf %82, %79 : vector<32x64xf32>
    %84 = arith.select %81, %79, %83 : vector<32x64xi1>, vector<32x64xf32>
    %85 = arith.truncf %84 : vector<32x64xf32> to vector<32x64xbf16>
    %c0_24 = arith.constant 0 : index
    %c0_25 = arith.constant 0 : index
    %c0_26 = arith.constant 0 : index
    %86 = vector.load %arg7[%c0_24, %c0_25, %c0_26] : memref<1x32x64xbf16, #tpu.memory_space<vmem>>, vector<1x32x64xbf16>
    %87 = vector.shape_cast %86 : vector<1x32x64xbf16> to vector<32x64xbf16>
    %88 = vector.shape_cast %85 : vector<32x64xbf16> to vector<1x32x64xbf16>
    tpu.vector_store %arg7[%c0_24, %c0_25, %c0_26], %88 {strides = array<i32>} : memref<1x32x64xbf16, #tpu.memory_space<vmem>>, vector<1x32x64xbf16>,
    return
  }
  func.func @transform_0(%arg0: i32) -> (i32, i32, i32) {
    %c0_i32 = arith.constant 0 : i32
    %c0_i32_0 = arith.constant 0 : i32
    %c0_i32_1 = arith.constant 0 : i32
    return %arg0, %c0_i32, %c0_i32_0 : i32, i32, i32
  }
  func.func @transform_1(%arg0: i32) -> (i32, i32, i32) {
    %c0_i32 = arith.constant 0 : i32
    %c0_i32_0 = arith.constant 0 : i32
    %c0_i32_1 = arith.constant 0 : i32
    return %arg0, %c0_i32, %c0_i32_0 : i32, i32, i32
  }
  func.func @transform_2(%arg0: i32) -> (i32, i32) {
    %c0_i32 = arith.constant 0 : i32
    %c0_i32_0 = arith.constant 0 : i32
    %c0_i32_1 = arith.constant 0 : i32
    return %c0_i32, %c0_i32_0 : i32, i32
  }
  func.func @transform_3(%arg0: i32) -> (i32, i32) {
    %c0_i32 = arith.constant 0 : i32
    %c0_i32_0 = arith.constant 0 : i32
    %c0_i32_1 = arith.constant 0 : i32
    return %c0_i32, %c0_i32_0 : i32, i32
  }
  func.func @transform_4(%arg0: i32) -> (i32, i32) {
    %c0_i32 = arith.constant 0 : i32
    %c0_i32_0 = arith.constant 0 : i32
    %c0_i32_1 = arith.constant 0 : i32
    return %c0_i32, %c0_i32_0 : i32, i32
  }
  func.func @transform_5(%arg0: i32) -> (i32, i32) {
    %c0_i32 = arith.constant 0 : i32
    %c0_i32_0 = arith.constant 0 : i32
    %c0_i32_1 = arith.constant 0 : i32
    return %c0_i32, %c0_i32_0 : i32, i32
  }
  func.func @transform_6(%arg0: i32) -> (i32, i32, i32) {
    %c0_i32 = arith.constant 0 : i32
    %c0_i32_0 = arith.constant 0 : i32
    %c0_i32_1 = arith.constant 0 : i32
    return %arg0, %c0_i32, %c0_i32_0 : i32, i32, i32
  }
}

module attributes {stable_mosaic.version = 11 : i64} {
  func.func @_edge_conv_kernel(%arg0: i32, %arg1: memref<1x32x8xi32, #tpu.memory_space<vmem>>, %arg2: memref<1x32x64xbf16, #tpu.memory_space<vmem>>, %arg3: memref<64x128xbf16, #tpu.memory_space<vmem>>, %arg4: memref<64x128xbf16, #tpu.memory_space<vmem>>, %arg5: memref<1x128xf32, #tpu.memory_space<vmem>>, %arg6: memref<1x128xf32, #tpu.memory_space<vmem>>, %arg7: memref<1x32x128xbf16, #tpu.memory_space<vmem>>) attributes {dimension_semantics = [#tpu.dimension_semantics<parallel>], iteration_bounds = array<i64: 2>, scalar_prefetch = 0 : i64, scratch_operands = 0 : i64, tpu.core_type = #tpu.core_type<tc>, window_params = [{transform_indices = @transform_0, window_bounds = array<i64: 1, 32, 8>}, {transform_indices = @transform_1, window_bounds = array<i64: 1, 32, 64>}, {pipeline_mode = #tpu.pipeline_mode<synchronous>, transform_indices = @transform_2, window_bounds = array<i64: 64, 128>}, {pipeline_mode = #tpu.pipeline_mode<synchronous>, transform_indices = @transform_3, window_bounds = array<i64: 64, 128>}, {pipeline_mode = #tpu.pipeline_mode<synchronous>, transform_indices = @transform_4, window_bounds = array<i64: 1, 128>}, {pipeline_mode = #tpu.pipeline_mode<synchronous>, transform_indices = @transform_5, window_bounds = array<i64: 1, 128>}, {transform_indices = @transform_6, window_bounds = array<i64: 1, 32, 128>}]} {
    %c0 = arith.constant 0 : index
    %c0_0 = arith.constant 0 : index
    %c0_1 = arith.constant 0 : index
    %0 = vector.load %arg2[%c0, %c0_0, %c0_1] : memref<1x32x64xbf16, #tpu.memory_space<vmem>>, vector<1x32x64xbf16>
    %1 = vector.shape_cast %0 : vector<1x32x64xbf16> to vector<32x64xbf16>
    %c0_2 = arith.constant 0 : index
    %c0_3 = arith.constant 0 : index
    %2 = vector.load %arg3[%c0_2, %c0_3] : memref<64x128xbf16, #tpu.memory_space<vmem>>, vector<64x128xbf16>
    %cst = arith.constant dense<0.000000e+00> : vector<32x128xf32>
    %3 = tpu.matmul %1, %2, %cst {dimension_numbers = #tpu.dot_dimension_numbers<[1], [0], [0], [1], [0, 0, 1, 1], [], []>} : vector<32x64xbf16>, vector<64x128xbf16>, vector<32x128xf32> -> vector<32x128xf32>
    %c0_4 = arith.constant 0 : index
    %c0_5 = arith.constant 0 : index
    %4 = vector.load %arg4[%c0_4, %c0_5] : memref<64x128xbf16, #tpu.memory_space<vmem>>, vector<64x128xbf16>
    %cst_6 = arith.constant dense<0.000000e+00> : vector<32x128xf32>
    %5 = tpu.matmul %1, %4, %cst_6 {dimension_numbers = #tpu.dot_dimension_numbers<[1], [0], [0], [1], [0, 0, 1, 1], [], []>} : vector<32x64xbf16>, vector<64x128xbf16>, vector<32x128xf32> -> vector<32x128xf32>
    %6 = arith.truncf %3 : vector<32x128xf32> to vector<32x128xbf16>
    %c0_7 = arith.constant 0 : index
    %c0_8 = arith.constant 0 : index
    %c0_9 = arith.constant 0 : index
    %7 = vector.load %arg1[%c0_7, %c0_8, %c0_9] : memref<1x32x8xi32, #tpu.memory_space<vmem>>, vector<1x32x8xi32>
    %8 = vector.shape_cast %7 : vector<1x32x8xi32> to vector<32x8xi32>
    %9 = tpu.iota {dimensions = array<i32: 1>} : vector<32x32xi32>
    %10 = vector.extract_strided_slice %8 {offsets = [0, 0], sizes = [32, 1], strides = [1, 1]} : vector<32x8xi32> to vector<32x1xi32>
    %11 = vector.broadcast %10 : vector<32x1xi32> to vector<32x32xi32>
    %12 = arith.cmpi eq, %11, %9 : vector<32x32xi32>
    %13 = arith.extui %12 : vector<32x32xi1> to vector<32x32xi32>
    %14 = arith.sitofp %13 : vector<32x32xi32> to vector<32x32xf32>
    %15 = arith.truncf %14 : vector<32x32xf32> to vector<32x32xbf16>
    %cst_10 = arith.constant dense<0.000000e+00> : vector<32x128xf32>
    %16 = tpu.matmul %15, %6, %cst_10 {dimension_numbers = #tpu.dot_dimension_numbers<[1], [0], [0], [1], [0, 0, 1, 1], [], []>} : vector<32x32xbf16>, vector<32x128xbf16>, vector<32x128xf32> -> vector<32x128xf32>
    %17 = vector.extract_strided_slice %8 {offsets = [0, 1], sizes = [32, 1], strides = [1, 1]} : vector<32x8xi32> to vector<32x1xi32>
    %18 = vector.broadcast %17 : vector<32x1xi32> to vector<32x32xi32>
    %19 = arith.cmpi eq, %18, %9 : vector<32x32xi32>
    %20 = arith.extui %19 : vector<32x32xi1> to vector<32x32xi32>
    %21 = arith.sitofp %20 : vector<32x32xi32> to vector<32x32xf32>
    %22 = arith.truncf %21 : vector<32x32xf32> to vector<32x32xbf16>
    %cst_11 = arith.constant dense<0.000000e+00> : vector<32x128xf32>
    %23 = tpu.matmul %22, %6, %cst_11 {dimension_numbers = #tpu.dot_dimension_numbers<[1], [0], [0], [1], [0, 0, 1, 1], [], []>} : vector<32x32xbf16>, vector<32x128xbf16>, vector<32x128xf32> -> vector<32x128xf32>
    %24 = arith.maximumf %16, %23 : vector<32x128xf32>
    %25 = vector.extract_strided_slice %8 {offsets = [0, 2], sizes = [32, 1], strides = [1, 1]} : vector<32x8xi32> to vector<32x1xi32>
    %26 = vector.broadcast %25 : vector<32x1xi32> to vector<32x32xi32>
    %27 = arith.cmpi eq, %26, %9 : vector<32x32xi32>
    %28 = arith.extui %27 : vector<32x32xi1> to vector<32x32xi32>
    %29 = arith.sitofp %28 : vector<32x32xi32> to vector<32x32xf32>
    %30 = arith.truncf %29 : vector<32x32xf32> to vector<32x32xbf16>
    %cst_12 = arith.constant dense<0.000000e+00> : vector<32x128xf32>
    %31 = tpu.matmul %30, %6, %cst_12 {dimension_numbers = #tpu.dot_dimension_numbers<[1], [0], [0], [1], [0, 0, 1, 1], [], []>} : vector<32x32xbf16>, vector<32x128xbf16>, vector<32x128xf32> -> vector<32x128xf32>
    %32 = arith.maximumf %24, %31 : vector<32x128xf32>
    %33 = vector.extract_strided_slice %8 {offsets = [0, 3], sizes = [32, 1], strides = [1, 1]} : vector<32x8xi32> to vector<32x1xi32>
    %34 = vector.broadcast %33 : vector<32x1xi32> to vector<32x32xi32>
    %35 = arith.cmpi eq, %34, %9 : vector<32x32xi32>
    %36 = arith.extui %35 : vector<32x32xi1> to vector<32x32xi32>
    %37 = arith.sitofp %36 : vector<32x32xi32> to vector<32x32xf32>
    %38 = arith.truncf %37 : vector<32x32xf32> to vector<32x32xbf16>
    %cst_13 = arith.constant dense<0.000000e+00> : vector<32x128xf32>
    %39 = tpu.matmul %38, %6, %cst_13 {dimension_numbers = #tpu.dot_dimension_numbers<[1], [0], [0], [1], [0, 0, 1, 1], [], []>} : vector<32x32xbf16>, vector<32x128xbf16>, vector<32x128xf32> -> vector<32x128xf32>
    %40 = arith.maximumf %32, %39 : vector<32x128xf32>
    %41 = vector.extract_strided_slice %8 {offsets = [0, 4], sizes = [32, 1], strides = [1, 1]} : vector<32x8xi32> to vector<32x1xi32>
    %42 = vector.broadcast %41 : vector<32x1xi32> to vector<32x32xi32>
    %43 = arith.cmpi eq, %42, %9 : vector<32x32xi32>
    %44 = arith.extui %43 : vector<32x32xi1> to vector<32x32xi32>
    %45 = arith.sitofp %44 : vector<32x32xi32> to vector<32x32xf32>
    %46 = arith.truncf %45 : vector<32x32xf32> to vector<32x32xbf16>
    %cst_14 = arith.constant dense<0.000000e+00> : vector<32x128xf32>
    %47 = tpu.matmul %46, %6, %cst_14 {dimension_numbers = #tpu.dot_dimension_numbers<[1], [0], [0], [1], [0, 0, 1, 1], [], []>} : vector<32x32xbf16>, vector<32x128xbf16>, vector<32x128xf32> -> vector<32x128xf32>
    %48 = arith.maximumf %40, %47 : vector<32x128xf32>
    %49 = vector.extract_strided_slice %8 {offsets = [0, 5], sizes = [32, 1], strides = [1, 1]} : vector<32x8xi32> to vector<32x1xi32>
    %50 = vector.broadcast %49 : vector<32x1xi32> to vector<32x32xi32>
    %51 = arith.cmpi eq, %50, %9 : vector<32x32xi32>
    %52 = arith.extui %51 : vector<32x32xi1> to vector<32x32xi32>
    %53 = arith.sitofp %52 : vector<32x32xi32> to vector<32x32xf32>
    %54 = arith.truncf %53 : vector<32x32xf32> to vector<32x32xbf16>
    %cst_15 = arith.constant dense<0.000000e+00> : vector<32x128xf32>
    %55 = tpu.matmul %54, %6, %cst_15 {dimension_numbers = #tpu.dot_dimension_numbers<[1], [0], [0], [1], [0, 0, 1, 1], [], []>} : vector<32x32xbf16>, vector<32x128xbf16>, vector<32x128xf32> -> vector<32x128xf32>
    %56 = arith.maximumf %48, %55 : vector<32x128xf32>
    %57 = vector.extract_strided_slice %8 {offsets = [0, 6], sizes = [32, 1], strides = [1, 1]} : vector<32x8xi32> to vector<32x1xi32>
    %58 = vector.broadcast %57 : vector<32x1xi32> to vector<32x32xi32>
    %59 = arith.cmpi eq, %58, %9 : vector<32x32xi32>
    %60 = arith.extui %59 : vector<32x32xi1> to vector<32x32xi32>
    %61 = arith.sitofp %60 : vector<32x32xi32> to vector<32x32xf32>
    %62 = arith.truncf %61 : vector<32x32xf32> to vector<32x32xbf16>
    %cst_16 = arith.constant dense<0.000000e+00> : vector<32x128xf32>
    %63 = tpu.matmul %62, %6, %cst_16 {dimension_numbers = #tpu.dot_dimension_numbers<[1], [0], [0], [1], [0, 0, 1, 1], [], []>} : vector<32x32xbf16>, vector<32x128xbf16>, vector<32x128xf32> -> vector<32x128xf32>
    %64 = arith.maximumf %56, %63 : vector<32x128xf32>
    %65 = vector.extract_strided_slice %8 {offsets = [0, 7], sizes = [32, 1], strides = [1, 1]} : vector<32x8xi32> to vector<32x1xi32>
    %66 = vector.broadcast %65 : vector<32x1xi32> to vector<32x32xi32>
    %67 = arith.cmpi eq, %66, %9 : vector<32x32xi32>
    %68 = arith.extui %67 : vector<32x32xi1> to vector<32x32xi32>
    %69 = arith.sitofp %68 : vector<32x32xi32> to vector<32x32xf32>
    %70 = arith.truncf %69 : vector<32x32xf32> to vector<32x32xbf16>
    %cst_17 = arith.constant dense<0.000000e+00> : vector<32x128xf32>
    %71 = tpu.matmul %70, %6, %cst_17 {dimension_numbers = #tpu.dot_dimension_numbers<[1], [0], [0], [1], [0, 0, 1, 1], [], []>} : vector<32x32xbf16>, vector<32x128xbf16>, vector<32x128xf32> -> vector<32x128xf32>
    %72 = arith.maximumf %64, %71 : vector<32x128xf32>
    %73 = arith.addf %72, %5 : vector<32x128xf32>
    %c0_18 = arith.constant 0 : index
    %c0_19 = arith.constant 0 : index
    %74 = vector.load %arg5[%c0_18, %c0_19] : memref<1x128xf32, #tpu.memory_space<vmem>>, vector<1x128xf32>
    %75 = vector.broadcast %74 : vector<1x128xf32> to vector<32x128xf32>
    %76 = arith.mulf %73, %75 : vector<32x128xf32>
    %c0_20 = arith.constant 0 : index
    %c0_21 = arith.constant 0 : index
    %77 = vector.load %arg6[%c0_20, %c0_21] : memref<1x128xf32, #tpu.memory_space<vmem>>, vector<1x128xf32>
    %78 = vector.broadcast %77 : vector<1x128xf32> to vector<32x128xf32>
    %79 = arith.addf %76, %78 : vector<32x128xf32>
    %cst_22 = arith.constant 0.000000e+00 : f32
    %80 = vector.broadcast %cst_22 : f32 to vector<32x128xf32>
    %81 = arith.cmpf ogt, %79, %80 : vector<32x128xf32>
    %cst_23 = arith.constant 2.000000e-01 : f32
    %82 = vector.broadcast %cst_23 : f32 to vector<32x128xf32>
    %83 = arith.mulf %82, %79 : vector<32x128xf32>
    %84 = arith.select %81, %79, %83 : vector<32x128xi1>, vector<32x128xf32>
    %85 = arith.truncf %84 : vector<32x128xf32> to vector<32x128xbf16>
    %c0_24 = arith.constant 0 : index
    %c0_25 = arith.constant 0 : index
    %c0_26 = arith.constant 0 : index
    %86 = vector.load %arg7[%c0_24, %c0_25, %c0_26] : memref<1x32x128xbf16, #tpu.memory_space<vmem>>, vector<1x32x128xbf16>
    %87 = vector.shape_cast %86 : vector<1x32x128xbf16> to vector<32x128xbf16>
    %88 = vector.shape_cast %85 : vector<32x128xbf16> to vector<1x32x128xbf16>
    tpu.vector_store %arg7[%c0_24, %c0_25, %c0_26], %88 {strides = array<i32>} : memref<1x32x128xbf16, #tpu.memory_space<vmem>>, vector<1x32x128xbf16>,
    return
  }
  func.func @transform_0(%arg0: i32) -> (i32, i32, i32) {
    %c0_i32 = arith.constant 0 : i32
    %c0_i32_0 = arith.constant 0 : i32
    %c0_i32_1 = arith.constant 0 : i32
    return %arg0, %c0_i32, %c0_i32_0 : i32, i32, i32
  }
  func.func @transform_1(%arg0: i32) -> (i32, i32, i32) {
    %c0_i32 = arith.constant 0 : i32
    %c0_i32_0 = arith.constant 0 : i32
    %c0_i32_1 = arith.constant 0 : i32
    return %arg0, %c0_i32, %c0_i32_0 : i32, i32, i32
  }
  func.func @transform_2(%arg0: i32) -> (i32, i32) {
    %c0_i32 = arith.constant 0 : i32
    %c0_i32_0 = arith.constant 0 : i32
    %c0_i32_1 = arith.constant 0 : i32
    return %c0_i32, %c0_i32_0 : i32, i32
  }
  func.func @transform_3(%arg0: i32) -> (i32, i32) {
    %c0_i32 = arith.constant 0 : i32
    %c0_i32_0 = arith.constant 0 : i32
    %c0_i32_1 = arith.constant 0 : i32
    return %c0_i32, %c0_i32_0 : i32, i32
  }
  func.func @transform_4(%arg0: i32) -> (i32, i32) {
    %c0_i32 = arith.constant 0 : i32
    %c0_i32_0 = arith.constant 0 : i32
    %c0_i32_1 = arith.constant 0 : i32
    return %c0_i32, %c0_i32_0 : i32, i32
  }
  func.func @transform_5(%arg0: i32) -> (i32, i32) {
    %c0_i32 = arith.constant 0 : i32
    %c0_i32_0 = arith.constant 0 : i32
    %c0_i32_1 = arith.constant 0 : i32
    return %c0_i32, %c0_i32_0 : i32, i32
  }
  func.func @transform_6(%arg0: i32) -> (i32, i32, i32) {
    %c0_i32 = arith.constant 0 : i32
    %c0_i32_0 = arith.constant 0 : i32
    %c0_i32_1 = arith.constant 0 : i32
    return %arg0, %c0_i32, %c0_i32_0 : i32, i32, i32
  }
}

module attributes {stable_mosaic.version = 11 : i64} {
  func.func @_pairwise_kernel(%arg0: i32, %arg1: memref<1x32x128xbf16, #tpu.memory_space<vmem>>, %arg2: memref<1x32x32xf32, #tpu.memory_space<vmem>>) attributes {dimension_semantics = [#tpu.dimension_semantics<parallel>], iteration_bounds = array<i64: 2>, scalar_prefetch = 0 : i64, scratch_operands = 0 : i64, tpu.core_type = #tpu.core_type<tc>, window_params = [{transform_indices = @transform_0, window_bounds = array<i64: 1, 32, 128>}, {transform_indices = @transform_1, window_bounds = array<i64: 1, 32, 32>}]} {
    %c0 = arith.constant 0 : index
    %c0_0 = arith.constant 0 : index
    %c0_1 = arith.constant 0 : index
    %0 = vector.load %arg1[%c0, %c0_0, %c0_1] : memref<1x32x128xbf16, #tpu.memory_space<vmem>>, vector<1x32x128xbf16>
    %1 = vector.shape_cast %0 : vector<1x32x128xbf16> to vector<32x128xbf16>
    %cst = arith.constant dense<0.000000e+00> : vector<32x32xf32>
    %2 = tpu.matmul %1, %1, %cst {dimension_numbers = #tpu.dot_dimension_numbers<[1], [1], [0], [0], [0, 0, 1, 0], [], []>} : vector<32x128xbf16>, vector<32x128xbf16>, vector<32x32xf32> -> vector<32x32xf32>
    %3 = arith.extf %1 : vector<32x128xbf16> to vector<32x128xf32>
    %4 = arith.mulf %3, %3 : vector<32x128xf32>
    %cst_2 = arith.constant dense<0.000000e+00> : vector<32xf32>
    %5 = vector.multi_reduction <add>, %4, %cst_2 [1] : vector<32x128xf32> to vector<32xf32>
    %6 = vector.shape_cast %5 : vector<32xf32> to vector<32x1xf32>
    %cst_3 = arith.constant 2.000000e+00 : f32
    %7 = vector.broadcast %cst_3 : f32 to vector<32x32xf32>
    %8 = arith.mulf %7, %2 : vector<32x32xf32>
    %9 = tpu.transpose %6, [1, 0] : vector<32x1xf32> -> vector<1x32xf32>
    %10 = vector.broadcast %9 : vector<1x32xf32> to vector<32x32xf32>
    %11 = arith.subf %8, %10 : vector<32x32xf32>
    %c0_4 = arith.constant 0 : index
    %c0_5 = arith.constant 0 : index
    %c0_6 = arith.constant 0 : index
    %12 = vector.load %arg2[%c0_4, %c0_5, %c0_6] : memref<1x32x32xf32, #tpu.memory_space<vmem>>, vector<1x32x32xf32>
    %13 = vector.shape_cast %12 : vector<1x32x32xf32> to vector<32x32xf32>
    %14 = vector.shape_cast %11 : vector<32x32xf32> to vector<1x32x32xf32>
    tpu.vector_store %arg2[%c0_4, %c0_5, %c0_6], %14 {strides = array<i32>} : memref<1x32x32xf32, #tpu.memory_space<vmem>>, vector<1x32x32xf32>,
    return
  }
  func.func @transform_0(%arg0: i32) -> (i32, i32, i32) {
    %c0_i32 = arith.constant 0 : i32
    %c0_i32_0 = arith.constant 0 : i32
    %c0_i32_1 = arith.constant 0 : i32
    return %arg0, %c0_i32, %c0_i32_0 : i32, i32, i32
  }
  func.func @transform_1(%arg0: i32) -> (i32, i32, i32) {
    %c0_i32 = arith.constant 0 : i32
    %c0_i32_0 = arith.constant 0 : i32
    %c0_i32_1 = arith.constant 0 : i32
    return %arg0, %c0_i32, %c0_i32_0 : i32, i32, i32
  }
}

module attributes {stable_mosaic.version = 11 : i64} {
  func.func @_edge_conv_kernel(%arg0: i32, %arg1: memref<1x32x8xi32, #tpu.memory_space<vmem>>, %arg2: memref<1x32x128xbf16, #tpu.memory_space<vmem>>, %arg3: memref<128x256xbf16, #tpu.memory_space<vmem>>, %arg4: memref<128x256xbf16, #tpu.memory_space<vmem>>, %arg5: memref<1x256xf32, #tpu.memory_space<vmem>>, %arg6: memref<1x256xf32, #tpu.memory_space<vmem>>, %arg7: memref<1x32x256xbf16, #tpu.memory_space<vmem>>) attributes {dimension_semantics = [#tpu.dimension_semantics<parallel>], iteration_bounds = array<i64: 2>, scalar_prefetch = 0 : i64, scratch_operands = 0 : i64, tpu.core_type = #tpu.core_type<tc>, window_params = [{transform_indices = @transform_0, window_bounds = array<i64: 1, 32, 8>}, {transform_indices = @transform_1, window_bounds = array<i64: 1, 32, 128>}, {pipeline_mode = #tpu.pipeline_mode<synchronous>, transform_indices = @transform_2, window_bounds = array<i64: 128, 256>}, {pipeline_mode = #tpu.pipeline_mode<synchronous>, transform_indices = @transform_3, window_bounds = array<i64: 128, 256>}, {pipeline_mode = #tpu.pipeline_mode<synchronous>, transform_indices = @transform_4, window_bounds = array<i64: 1, 256>}, {pipeline_mode = #tpu.pipeline_mode<synchronous>, transform_indices = @transform_5, window_bounds = array<i64: 1, 256>}, {transform_indices = @transform_6, window_bounds = array<i64: 1, 32, 256>}]} {
    %c0 = arith.constant 0 : index
    %c0_0 = arith.constant 0 : index
    %c0_1 = arith.constant 0 : index
    %0 = vector.load %arg2[%c0, %c0_0, %c0_1] : memref<1x32x128xbf16, #tpu.memory_space<vmem>>, vector<1x32x128xbf16>
    %1 = vector.shape_cast %0 : vector<1x32x128xbf16> to vector<32x128xbf16>
    %c0_2 = arith.constant 0 : index
    %c0_3 = arith.constant 0 : index
    %2 = vector.load %arg3[%c0_2, %c0_3] : memref<128x256xbf16, #tpu.memory_space<vmem>>, vector<128x256xbf16>
    %cst = arith.constant dense<0.000000e+00> : vector<32x256xf32>
    %3 = tpu.matmul %1, %2, %cst {dimension_numbers = #tpu.dot_dimension_numbers<[1], [0], [0], [1], [0, 0, 1, 1], [], []>} : vector<32x128xbf16>, vector<128x256xbf16>, vector<32x256xf32> -> vector<32x256xf32>
    %c0_4 = arith.constant 0 : index
    %c0_5 = arith.constant 0 : index
    %4 = vector.load %arg4[%c0_4, %c0_5] : memref<128x256xbf16, #tpu.memory_space<vmem>>, vector<128x256xbf16>
    %cst_6 = arith.constant dense<0.000000e+00> : vector<32x256xf32>
    %5 = tpu.matmul %1, %4, %cst_6 {dimension_numbers = #tpu.dot_dimension_numbers<[1], [0], [0], [1], [0, 0, 1, 1], [], []>} : vector<32x128xbf16>, vector<128x256xbf16>, vector<32x256xf32> -> vector<32x256xf32>
    %6 = arith.truncf %3 : vector<32x256xf32> to vector<32x256xbf16>
    %c0_7 = arith.constant 0 : index
    %c0_8 = arith.constant 0 : index
    %c0_9 = arith.constant 0 : index
    %7 = vector.load %arg1[%c0_7, %c0_8, %c0_9] : memref<1x32x8xi32, #tpu.memory_space<vmem>>, vector<1x32x8xi32>
    %8 = vector.shape_cast %7 : vector<1x32x8xi32> to vector<32x8xi32>
    %9 = tpu.iota {dimensions = array<i32: 1>} : vector<32x32xi32>
    %10 = vector.extract_strided_slice %8 {offsets = [0, 0], sizes = [32, 1], strides = [1, 1]} : vector<32x8xi32> to vector<32x1xi32>
    %11 = vector.broadcast %10 : vector<32x1xi32> to vector<32x32xi32>
    %12 = arith.cmpi eq, %11, %9 : vector<32x32xi32>
    %13 = arith.extui %12 : vector<32x32xi1> to vector<32x32xi32>
    %14 = arith.sitofp %13 : vector<32x32xi32> to vector<32x32xf32>
    %15 = arith.truncf %14 : vector<32x32xf32> to vector<32x32xbf16>
    %cst_10 = arith.constant dense<0.000000e+00> : vector<32x256xf32>
    %16 = tpu.matmul %15, %6, %cst_10 {dimension_numbers = #tpu.dot_dimension_numbers<[1], [0], [0], [1], [0, 0, 1, 1], [], []>} : vector<32x32xbf16>, vector<32x256xbf16>, vector<32x256xf32> -> vector<32x256xf32>
    %17 = vector.extract_strided_slice %8 {offsets = [0, 1], sizes = [32, 1], strides = [1, 1]} : vector<32x8xi32> to vector<32x1xi32>
    %18 = vector.broadcast %17 : vector<32x1xi32> to vector<32x32xi32>
    %19 = arith.cmpi eq, %18, %9 : vector<32x32xi32>
    %20 = arith.extui %19 : vector<32x32xi1> to vector<32x32xi32>
    %21 = arith.sitofp %20 : vector<32x32xi32> to vector<32x32xf32>
    %22 = arith.truncf %21 : vector<32x32xf32> to vector<32x32xbf16>
    %cst_11 = arith.constant dense<0.000000e+00> : vector<32x256xf32>
    %23 = tpu.matmul %22, %6, %cst_11 {dimension_numbers = #tpu.dot_dimension_numbers<[1], [0], [0], [1], [0, 0, 1, 1], [], []>} : vector<32x32xbf16>, vector<32x256xbf16>, vector<32x256xf32> -> vector<32x256xf32>
    %24 = arith.maximumf %16, %23 : vector<32x256xf32>
    %25 = vector.extract_strided_slice %8 {offsets = [0, 2], sizes = [32, 1], strides = [1, 1]} : vector<32x8xi32> to vector<32x1xi32>
    %26 = vector.broadcast %25 : vector<32x1xi32> to vector<32x32xi32>
    %27 = arith.cmpi eq, %26, %9 : vector<32x32xi32>
    %28 = arith.extui %27 : vector<32x32xi1> to vector<32x32xi32>
    %29 = arith.sitofp %28 : vector<32x32xi32> to vector<32x32xf32>
    %30 = arith.truncf %29 : vector<32x32xf32> to vector<32x32xbf16>
    %cst_12 = arith.constant dense<0.000000e+00> : vector<32x256xf32>
    %31 = tpu.matmul %30, %6, %cst_12 {dimension_numbers = #tpu.dot_dimension_numbers<[1], [0], [0], [1], [0, 0, 1, 1], [], []>} : vector<32x32xbf16>, vector<32x256xbf16>, vector<32x256xf32> -> vector<32x256xf32>
    %32 = arith.maximumf %24, %31 : vector<32x256xf32>
    %33 = vector.extract_strided_slice %8 {offsets = [0, 3], sizes = [32, 1], strides = [1, 1]} : vector<32x8xi32> to vector<32x1xi32>
    %34 = vector.broadcast %33 : vector<32x1xi32> to vector<32x32xi32>
    %35 = arith.cmpi eq, %34, %9 : vector<32x32xi32>
    %36 = arith.extui %35 : vector<32x32xi1> to vector<32x32xi32>
    %37 = arith.sitofp %36 : vector<32x32xi32> to vector<32x32xf32>
    %38 = arith.truncf %37 : vector<32x32xf32> to vector<32x32xbf16>
    %cst_13 = arith.constant dense<0.000000e+00> : vector<32x256xf32>
    %39 = tpu.matmul %38, %6, %cst_13 {dimension_numbers = #tpu.dot_dimension_numbers<[1], [0], [0], [1], [0, 0, 1, 1], [], []>} : vector<32x32xbf16>, vector<32x256xbf16>, vector<32x256xf32> -> vector<32x256xf32>
    %40 = arith.maximumf %32, %39 : vector<32x256xf32>
    %41 = vector.extract_strided_slice %8 {offsets = [0, 4], sizes = [32, 1], strides = [1, 1]} : vector<32x8xi32> to vector<32x1xi32>
    %42 = vector.broadcast %41 : vector<32x1xi32> to vector<32x32xi32>
    %43 = arith.cmpi eq, %42, %9 : vector<32x32xi32>
    %44 = arith.extui %43 : vector<32x32xi1> to vector<32x32xi32>
    %45 = arith.sitofp %44 : vector<32x32xi32> to vector<32x32xf32>
    %46 = arith.truncf %45 : vector<32x32xf32> to vector<32x32xbf16>
    %cst_14 = arith.constant dense<0.000000e+00> : vector<32x256xf32>
    %47 = tpu.matmul %46, %6, %cst_14 {dimension_numbers = #tpu.dot_dimension_numbers<[1], [0], [0], [1], [0, 0, 1, 1], [], []>} : vector<32x32xbf16>, vector<32x256xbf16>, vector<32x256xf32> -> vector<32x256xf32>
    %48 = arith.maximumf %40, %47 : vector<32x256xf32>
    %49 = vector.extract_strided_slice %8 {offsets = [0, 5], sizes = [32, 1], strides = [1, 1]} : vector<32x8xi32> to vector<32x1xi32>
    %50 = vector.broadcast %49 : vector<32x1xi32> to vector<32x32xi32>
    %51 = arith.cmpi eq, %50, %9 : vector<32x32xi32>
    %52 = arith.extui %51 : vector<32x32xi1> to vector<32x32xi32>
    %53 = arith.sitofp %52 : vector<32x32xi32> to vector<32x32xf32>
    %54 = arith.truncf %53 : vector<32x32xf32> to vector<32x32xbf16>
    %cst_15 = arith.constant dense<0.000000e+00> : vector<32x256xf32>
    %55 = tpu.matmul %54, %6, %cst_15 {dimension_numbers = #tpu.dot_dimension_numbers<[1], [0], [0], [1], [0, 0, 1, 1], [], []>} : vector<32x32xbf16>, vector<32x256xbf16>, vector<32x256xf32> -> vector<32x256xf32>
    %56 = arith.maximumf %48, %55 : vector<32x256xf32>
    %57 = vector.extract_strided_slice %8 {offsets = [0, 6], sizes = [32, 1], strides = [1, 1]} : vector<32x8xi32> to vector<32x1xi32>
    %58 = vector.broadcast %57 : vector<32x1xi32> to vector<32x32xi32>
    %59 = arith.cmpi eq, %58, %9 : vector<32x32xi32>
    %60 = arith.extui %59 : vector<32x32xi1> to vector<32x32xi32>
    %61 = arith.sitofp %60 : vector<32x32xi32> to vector<32x32xf32>
    %62 = arith.truncf %61 : vector<32x32xf32> to vector<32x32xbf16>
    %cst_16 = arith.constant dense<0.000000e+00> : vector<32x256xf32>
    %63 = tpu.matmul %62, %6, %cst_16 {dimension_numbers = #tpu.dot_dimension_numbers<[1], [0], [0], [1], [0, 0, 1, 1], [], []>} : vector<32x32xbf16>, vector<32x256xbf16>, vector<32x256xf32> -> vector<32x256xf32>
    %64 = arith.maximumf %56, %63 : vector<32x256xf32>
    %65 = vector.extract_strided_slice %8 {offsets = [0, 7], sizes = [32, 1], strides = [1, 1]} : vector<32x8xi32> to vector<32x1xi32>
    %66 = vector.broadcast %65 : vector<32x1xi32> to vector<32x32xi32>
    %67 = arith.cmpi eq, %66, %9 : vector<32x32xi32>
    %68 = arith.extui %67 : vector<32x32xi1> to vector<32x32xi32>
    %69 = arith.sitofp %68 : vector<32x32xi32> to vector<32x32xf32>
    %70 = arith.truncf %69 : vector<32x32xf32> to vector<32x32xbf16>
    %cst_17 = arith.constant dense<0.000000e+00> : vector<32x256xf32>
    %71 = tpu.matmul %70, %6, %cst_17 {dimension_numbers = #tpu.dot_dimension_numbers<[1], [0], [0], [1], [0, 0, 1, 1], [], []>} : vector<32x32xbf16>, vector<32x256xbf16>, vector<32x256xf32> -> vector<32x256xf32>
    %72 = arith.maximumf %64, %71 : vector<32x256xf32>
    %73 = arith.addf %72, %5 : vector<32x256xf32>
    %c0_18 = arith.constant 0 : index
    %c0_19 = arith.constant 0 : index
    %74 = vector.load %arg5[%c0_18, %c0_19] : memref<1x256xf32, #tpu.memory_space<vmem>>, vector<1x256xf32>
    %75 = vector.broadcast %74 : vector<1x256xf32> to vector<32x256xf32>
    %76 = arith.mulf %73, %75 : vector<32x256xf32>
    %c0_20 = arith.constant 0 : index
    %c0_21 = arith.constant 0 : index
    %77 = vector.load %arg6[%c0_20, %c0_21] : memref<1x256xf32, #tpu.memory_space<vmem>>, vector<1x256xf32>
    %78 = vector.broadcast %77 : vector<1x256xf32> to vector<32x256xf32>
    %79 = arith.addf %76, %78 : vector<32x256xf32>
    %cst_22 = arith.constant 0.000000e+00 : f32
    %80 = vector.broadcast %cst_22 : f32 to vector<32x256xf32>
    %81 = arith.cmpf ogt, %79, %80 : vector<32x256xf32>
    %cst_23 = arith.constant 2.000000e-01 : f32
    %82 = vector.broadcast %cst_23 : f32 to vector<32x256xf32>
    %83 = arith.mulf %82, %79 : vector<32x256xf32>
    %84 = arith.select %81, %79, %83 : vector<32x256xi1>, vector<32x256xf32>
    %85 = arith.truncf %84 : vector<32x256xf32> to vector<32x256xbf16>
    %c0_24 = arith.constant 0 : index
    %c0_25 = arith.constant 0 : index
    %c0_26 = arith.constant 0 : index
    %86 = vector.load %arg7[%c0_24, %c0_25, %c0_26] : memref<1x32x256xbf16, #tpu.memory_space<vmem>>, vector<1x32x256xbf16>
    %87 = vector.shape_cast %86 : vector<1x32x256xbf16> to vector<32x256xbf16>
    %88 = vector.shape_cast %85 : vector<32x256xbf16> to vector<1x32x256xbf16>
    tpu.vector_store %arg7[%c0_24, %c0_25, %c0_26], %88 {strides = array<i32>} : memref<1x32x256xbf16, #tpu.memory_space<vmem>>, vector<1x32x256xbf16>,
    return
  }
  func.func @transform_0(%arg0: i32) -> (i32, i32, i32) {
    %c0_i32 = arith.constant 0 : i32
    %c0_i32_0 = arith.constant 0 : i32
    %c0_i32_1 = arith.constant 0 : i32
    return %arg0, %c0_i32, %c0_i32_0 : i32, i32, i32
  }
  func.func @transform_1(%arg0: i32) -> (i32, i32, i32) {
    %c0_i32 = arith.constant 0 : i32
    %c0_i32_0 = arith.constant 0 : i32
    %c0_i32_1 = arith.constant 0 : i32
    return %arg0, %c0_i32, %c0_i32_0 : i32, i32, i32
  }
  func.func @transform_2(%arg0: i32) -> (i32, i32) {
    %c0_i32 = arith.constant 0 : i32
    %c0_i32_0 = arith.constant 0 : i32
    %c0_i32_1 = arith.constant 0 : i32
    return %c0_i32, %c0_i32_0 : i32, i32
  }
  func.func @transform_3(%arg0: i32) -> (i32, i32) {
    %c0_i32 = arith.constant 0 : i32
    %c0_i32_0 = arith.constant 0 : i32
    %c0_i32_1 = arith.constant 0 : i32
    return %c0_i32, %c0_i32_0 : i32, i32
  }
  func.func @transform_4(%arg0: i32) -> (i32, i32) {
    %c0_i32 = arith.constant 0 : i32
    %c0_i32_0 = arith.constant 0 : i32
    %c0_i32_1 = arith.constant 0 : i32
    return %c0_i32, %c0_i32_0 : i32, i32
  }
  func.func @transform_5(%arg0: i32) -> (i32, i32) {
    %c0_i32 = arith.constant 0 : i32
    %c0_i32_0 = arith.constant 0 : i32
    %c0_i32_1 = arith.constant 0 : i32
    return %c0_i32, %c0_i32_0 : i32, i32
  }
  func.func @transform_6(%arg0: i32) -> (i32, i32, i32) {
    %c0_i32 = arith.constant 0 : i32
    %c0_i32_0 = arith.constant 0 : i32
    %c0_i32_1 = arith.constant 0 : i32
    return %arg0, %c0_i32, %c0_i32_0 : i32, i32, i32
  }
}

module attributes {stable_mosaic.version = 11 : i64} {
  func.func @_conv5_head_kernel(%arg0: i32, %arg1: i32, %arg2: memref<1x32x64xbf16, #tpu.memory_space<vmem>>, %arg3: memref<1x32x64xbf16, #tpu.memory_space<vmem>>, %arg4: memref<1x32x128xbf16, #tpu.memory_space<vmem>>, %arg5: memref<1x32x256xbf16, #tpu.memory_space<vmem>>, %arg6: memref<64x64xbf16, #tpu.memory_space<vmem>>, %arg7: memref<64x64xbf16, #tpu.memory_space<vmem>>, %arg8: memref<128x64xbf16, #tpu.memory_space<vmem>>, %arg9: memref<256x64xbf16, #tpu.memory_space<vmem>>, %arg10: memref<1x64xf32, #tpu.memory_space<vmem>>, %arg11: memref<1x64xf32, #tpu.memory_space<vmem>>, %arg12: memref<64x512xbf16, #tpu.memory_space<vmem>>, %arg13: memref<64x512xbf16, #tpu.memory_space<vmem>>, %arg14: memref<1x512xf32, #tpu.memory_space<vmem>>, %arg15: memref<1x512xf32, #tpu.memory_space<vmem>>, %arg16: memref<512x256xbf16, #tpu.memory_space<vmem>>, %arg17: memref<1x256xf32, #tpu.memory_space<vmem>>, %arg18: memref<1x256xf32, #tpu.memory_space<vmem>>, %arg19: memref<1x256xf32, #tpu.memory_space<vmem>>, %arg20: memref<256x40xbf16, #tpu.memory_space<vmem>>, %arg21: memref<1x40xf32, #tpu.memory_space<vmem>>, %arg22: memref<1x1x40xf32, #tpu.memory_space<vmem>>, %arg23: memref<1x64xf32, #tpu.memory_space<vmem>>, %arg24: memref<1x64xf32, #tpu.memory_space<vmem>>) attributes {dimension_semantics = [#tpu.dimension_semantics<parallel>, #tpu.dimension_semantics<arbitrary>], iteration_bounds = array<i64: 2, 1>, scalar_prefetch = 0 : i64, scratch_operands = 2 : i64, tpu.core_type = #tpu.core_type<tc>, window_params = [{transform_indices = @transform_0, window_bounds = array<i64: 1, 32, 64>}, {transform_indices = @transform_1, window_bounds = array<i64: 1, 32, 64>}, {transform_indices = @transform_2, window_bounds = array<i64: 1, 32, 128>}, {transform_indices = @transform_3, window_bounds = array<i64: 1, 32, 256>}, {pipeline_mode = #tpu.pipeline_mode<synchronous>, transform_indices = @transform_4, window_bounds = array<i64: 64, 64>}, {pipeline_mode = #tpu.pipeline_mode<synchronous>, transform_indices = @transform_5, window_bounds = array<i64: 64, 64>}, {pipeline_mode = #tpu.pipeline_mode<synchronous>, transform_indices = @transform_6, window_bounds = array<i64: 128, 64>}, {pipeline_mode = #tpu.pipeline_mode<synchronous>, transform_indices = @transform_7, window_bounds = array<i64: 256, 64>}, {pipeline_mode = #tpu.pipeline_mode<synchronous>, transform_indices = @transform_8, window_bounds = array<i64: 1, 64>}, {pipeline_mode = #tpu.pipeline_mode<synchronous>, transform_indices = @transform_9, window_bounds = array<i64: 1, 64>}, {pipeline_mode = #tpu.pipeline_mode<synchronous>, transform_indices = @transform_10, window_bounds = array<i64: 64, 512>}, {pipeline_mode = #tpu.pipeline_mode<synchronous>, transform_indices = @transform_11, window_bounds = array<i64: 64, 512>}, {pipeline_mode = #tpu.pipeline_mode<synchronous>, transform_indices = @transform_12, window_bounds = array<i64: 1, 512>}, {pipeline_mode = #tpu.pipeline_mode<synchronous>, transform_indices = @transform_13, window_bounds = array<i64: 1, 512>}, {pipeline_mode = #tpu.pipeline_mode<synchronous>, transform_indices = @transform_14, window_bounds = array<i64: 512, 256>}, {pipeline_mode = #tpu.pipeline_mode<synchronous>, transform_indices = @transform_15, window_bounds = array<i64: 1, 256>}, {pipeline_mode = #tpu.pipeline_mode<synchronous>, transform_indices = @transform_16, window_bounds = array<i64: 1, 256>}, {pipeline_mode = #tpu.pipeline_mode<synchronous>, transform_indices = @transform_17, window_bounds = array<i64: 1, 256>}, {pipeline_mode = #tpu.pipeline_mode<synchronous>, transform_indices = @transform_18, window_bounds = array<i64: 256, 40>}, {pipeline_mode = #tpu.pipeline_mode<synchronous>, transform_indices = @transform_19, window_bounds = array<i64: 1, 40>}, {transform_indices = @transform_20, window_bounds = array<i64: 1, 1, 40>}]} {
    %c0_i32 = arith.constant 0 : i32
    %0 = arith.cmpi eq, %arg1, %c0_i32 : i32
    %1 = arith.extui %0 : i1 to i32
    %c0_i32_0 = arith.constant 0 : i32
    %2 = arith.cmpi ne, %1, %c0_i32_0 : i32
    scf.if %2 {
      %cst_41 = arith.constant 0xFF800000 : f32
      %46 = vector.broadcast %cst_41 : f32 to vector<1x64xf32>
      %c0_42 = arith.constant 0 : index
      %c0_43 = arith.constant 0 : index
      %47 = vector.load %arg23[%c0_42, %c0_43] : memref<1x64xf32, #tpu.memory_space<vmem>>, vector<1x64xf32>
      tpu.vector_store %arg23[%c0_42, %c0_43], %46 {strides = array<i32>} : memref<1x64xf32, #tpu.memory_space<vmem>>, vector<1x64xf32>,
      %cst_44 = arith.constant 0.000000e+00 : f32
      %48 = vector.broadcast %cst_44 : f32 to vector<1x64xf32>
      %c0_45 = arith.constant 0 : index
      %c0_46 = arith.constant 0 : index
      %49 = vector.load %arg24[%c0_45, %c0_46] : memref<1x64xf32, #tpu.memory_space<vmem>>, vector<1x64xf32>
      tpu.vector_store %arg24[%c0_45, %c0_46], %48 {strides = array<i32>} : memref<1x64xf32, #tpu.memory_space<vmem>>, vector<1x64xf32>,
    } else {
    }
    %c0 = arith.constant 0 : index
    %c0_1 = arith.constant 0 : index
    %c0_2 = arith.constant 0 : index
    %3 = vector.load %arg2[%c0, %c0_1, %c0_2] : memref<1x32x64xbf16, #tpu.memory_space<vmem>>, vector<1x32x64xbf16>
    %4 = vector.shape_cast %3 : vector<1x32x64xbf16> to vector<32x64xbf16>
    %c0_3 = arith.constant 0 : index
    %c0_4 = arith.constant 0 : index
    %5 = vector.load %arg6[%c0_3, %c0_4] : memref<64x64xbf16, #tpu.memory_space<vmem>>, vector<64x64xbf16>
    %cst = arith.constant dense<0.000000e+00> : vector<32x64xf32>
    %6 = tpu.matmul %4, %5, %cst {dimension_numbers = #tpu.dot_dimension_numbers<[1], [0], [0], [1], [0, 0, 1, 1], [], []>} : vector<32x64xbf16>, vector<64x64xbf16>, vector<32x64xf32> -> vector<32x64xf32>
    %c0_5 = arith.constant 0 : index
    %c0_6 = arith.constant 0 : index
    %c0_7 = arith.constant 0 : index
    %7 = vector.load %arg3[%c0_5, %c0_6, %c0_7] : memref<1x32x64xbf16, #tpu.memory_space<vmem>>, vector<1x32x64xbf16>
    %8 = vector.shape_cast %7 : vector<1x32x64xbf16> to vector<32x64xbf16>
    %c0_8 = arith.constant 0 : index
    %c0_9 = arith.constant 0 : index
    %9 = vector.load %arg7[%c0_8, %c0_9] : memref<64x64xbf16, #tpu.memory_space<vmem>>, vector<64x64xbf16>
    %cst_10 = arith.constant dense<0.000000e+00> : vector<32x64xf32>
    %10 = tpu.matmul %8, %9, %cst_10 {dimension_numbers = #tpu.dot_dimension_numbers<[1], [0], [0], [1], [0, 0, 1, 1], [], []>} : vector<32x64xbf16>, vector<64x64xbf16>, vector<32x64xf32> -> vector<32x64xf32>
    %11 = arith.addf %6, %10 : vector<32x64xf32>
    %c0_11 = arith.constant 0 : index
    %c0_12 = arith.constant 0 : index
    %c0_13 = arith.constant 0 : index
    %12 = vector.load %arg4[%c0_11, %c0_12, %c0_13] : memref<1x32x128xbf16, #tpu.memory_space<vmem>>, vector<1x32x128xbf16>
    %13 = vector.shape_cast %12 : vector<1x32x128xbf16> to vector<32x128xbf16>
    %c0_14 = arith.constant 0 : index
    %c0_15 = arith.constant 0 : index
    %14 = vector.load %arg8[%c0_14, %c0_15] : memref<128x64xbf16, #tpu.memory_space<vmem>>, vector<128x64xbf16>
    %cst_16 = arith.constant dense<0.000000e+00> : vector<32x64xf32>
    %15 = tpu.matmul %13, %14, %cst_16 {dimension_numbers = #tpu.dot_dimension_numbers<[1], [0], [0], [1], [0, 0, 1, 1], [], []>} : vector<32x128xbf16>, vector<128x64xbf16>, vector<32x64xf32> -> vector<32x64xf32>
    %16 = arith.addf %11, %15 : vector<32x64xf32>
    %c0_17 = arith.constant 0 : index
    %c0_18 = arith.constant 0 : index
    %c0_19 = arith.constant 0 : index
    %17 = vector.load %arg5[%c0_17, %c0_18, %c0_19] : memref<1x32x256xbf16, #tpu.memory_space<vmem>>, vector<1x32x256xbf16>
    %18 = vector.shape_cast %17 : vector<1x32x256xbf16> to vector<32x256xbf16>
    %c0_20 = arith.constant 0 : index
    %c0_21 = arith.constant 0 : index
    %19 = vector.load %arg9[%c0_20, %c0_21] : memref<256x64xbf16, #tpu.memory_space<vmem>>, vector<256x64xbf16>
    %cst_22 = arith.constant dense<0.000000e+00> : vector<32x64xf32>
    %20 = tpu.matmul %18, %19, %cst_22 {dimension_numbers = #tpu.dot_dimension_numbers<[1], [0], [0], [1], [0, 0, 1, 1], [], []>} : vector<32x256xbf16>, vector<256x64xbf16>, vector<32x64xf32> -> vector<32x64xf32>
    %21 = arith.addf %16, %20 : vector<32x64xf32>
    %c0_23 = arith.constant 0 : index
    %c0_24 = arith.constant 0 : index
    %22 = vector.load %arg10[%c0_23, %c0_24] : memref<1x64xf32, #tpu.memory_space<vmem>>, vector<1x64xf32>
    %23 = vector.broadcast %22 : vector<1x64xf32> to vector<32x64xf32>
    %24 = arith.mulf %21, %23 : vector<32x64xf32>
    %c0_25 = arith.constant 0 : index
    %c0_26 = arith.constant 0 : index
    %25 = vector.load %arg11[%c0_25, %c0_26] : memref<1x64xf32, #tpu.memory_space<vmem>>, vector<1x64xf32>
    %26 = vector.broadcast %25 : vector<1x64xf32> to vector<32x64xf32>
    %27 = arith.addf %24, %26 : vector<32x64xf32>
    %cst_27 = arith.constant 0.000000e+00 : f32
    %28 = vector.broadcast %cst_27 : f32 to vector<32x64xf32>
    %29 = arith.cmpf ogt, %27, %28 : vector<32x64xf32>
    %cst_28 = arith.constant 2.000000e-01 : f32
    %30 = vector.broadcast %cst_28 : f32 to vector<32x64xf32>
    %31 = arith.mulf %30, %27 : vector<32x64xf32>
    %32 = arith.select %29, %27, %31 : vector<32x64xi1>, vector<32x64xf32>
    %c0_29 = arith.constant 0 : index
    %c0_30 = arith.constant 0 : index
    %33 = vector.load %arg23[%c0_29, %c0_30] : memref<1x64xf32, #tpu.memory_space<vmem>>, vector<1x64xf32>
    %cst_31 = arith.constant dense<0xFF800000> : vector<64xf32>
    %34 = vector.multi_reduction <maximumf>, %32, %cst_31 [0] : vector<32x64xf32> to vector<64xf32>
    %35 = vector.shape_cast %34 : vector<64xf32> to vector<1x64xf32>
    %36 = arith.maximumf %33, %35 : vector<1x64xf32>
    %c0_32 = arith.constant 0 : index
    %c0_33 = arith.constant 0 : index
    %37 = vector.load %arg23[%c0_32, %c0_33] : memref<1x64xf32, #tpu.memory_space<vmem>>, vector<1x64xf32>
    tpu.vector_store %arg23[%c0_32, %c0_33], %36 {strides = array<i32>} : memref<1x64xf32, #tpu.memory_space<vmem>>, vector<1x64xf32>,
    %c0_34 = arith.constant 0 : index
    %c0_35 = arith.constant 0 : index
    %38 = vector.load %arg24[%c0_34, %c0_35] : memref<1x64xf32, #tpu.memory_space<vmem>>, vector<1x64xf32>
    %cst_36 = arith.constant dense<0.000000e+00> : vector<64xf32>
    %39 = vector.multi_reduction <add>, %32, %cst_36 [0] : vector<32x64xf32> to vector<64xf32>
    %40 = vector.shape_cast %39 : vector<64xf32> to vector<1x64xf32>
    %41 = arith.addf %38, %40 : vector<1x64xf32>
    %c0_37 = arith.constant 0 : index
    %c0_38 = arith.constant 0 : index
    %42 = vector.load %arg24[%c0_37, %c0_38] : memref<1x64xf32, #tpu.memory_space<vmem>>, vector<1x64xf32>
    tpu.vector_store %arg24[%c0_37, %c0_38], %41 {strides = array<i32>} : memref<1x64xf32, #tpu.memory_space<vmem>>, vector<1x64xf32>,
    %c0_i32_39 = arith.constant 0 : i32
    %43 = arith.cmpi eq, %arg1, %c0_i32_39 : i32
    %44 = arith.extui %43 : i1 to i32
    %c0_i32_40 = arith.constant 0 : i32
    %45 = arith.cmpi ne, %44, %c0_i32_40 : i32
    scf.if %45 {
      %c0_41 = arith.constant 0 : index
      %c0_42 = arith.constant 0 : index
      %46 = vector.load %arg23[%c0_41, %c0_42] : memref<1x64xf32, #tpu.memory_space<vmem>>, vector<1x64xf32>
      %c0_43 = arith.constant 0 : index
      %c0_44 = arith.constant 0 : index
      %47 = vector.load %arg24[%c0_43, %c0_44] : memref<1x64xf32, #tpu.memory_space<vmem>>, vector<1x64xf32>
      %cst_45 = arith.constant 3.125000e-02 : f32
      %48 = vector.broadcast %cst_45 : f32 to vector<1x64xf32>
      %49 = arith.mulf %47, %48 : vector<1x64xf32>
      %50 = arith.truncf %46 : vector<1x64xf32> to vector<1x64xbf16>
      %c0_46 = arith.constant 0 : index
      %c0_47 = arith.constant 0 : index
      %51 = vector.load %arg12[%c0_46, %c0_47] : memref<64x512xbf16, #tpu.memory_space<vmem>>, vector<64x512xbf16>
      %cst_48 = arith.constant dense<0.000000e+00> : vector<1x512xf32>
      %52 = tpu.matmul %50, %51, %cst_48 {dimension_numbers = #tpu.dot_dimension_numbers<[1], [0], [0], [1], [0, 0, 1, 1], [], []>} : vector<1x64xbf16>, vector<64x512xbf16>, vector<1x512xf32> -> vector<1x512xf32>
      %53 = arith.truncf %49 : vector<1x64xf32> to vector<1x64xbf16>
      %c0_49 = arith.constant 0 : index
      %c0_50 = arith.constant 0 : index
      %54 = vector.load %arg13[%c0_49, %c0_50] : memref<64x512xbf16, #tpu.memory_space<vmem>>, vector<64x512xbf16>
      %cst_51 = arith.constant dense<0.000000e+00> : vector<1x512xf32>
      %55 = tpu.matmul %53, %54, %cst_51 {dimension_numbers = #tpu.dot_dimension_numbers<[1], [0], [0], [1], [0, 0, 1, 1], [], []>} : vector<1x64xbf16>, vector<64x512xbf16>, vector<1x512xf32> -> vector<1x512xf32>
      %56 = arith.addf %52, %55 : vector<1x512xf32>
      %c0_52 = arith.constant 0 : index
      %c0_53 = arith.constant 0 : index
      %57 = vector.load %arg14[%c0_52, %c0_53] : memref<1x512xf32, #tpu.memory_space<vmem>>, vector<1x512xf32>
      %58 = arith.mulf %56, %57 : vector<1x512xf32>
      %c0_54 = arith.constant 0 : index
      %c0_55 = arith.constant 0 : index
      %59 = vector.load %arg15[%c0_54, %c0_55] : memref<1x512xf32, #tpu.memory_space<vmem>>, vector<1x512xf32>
      %60 = arith.addf %58, %59 : vector<1x512xf32>
      %cst_56 = arith.constant 0.000000e+00 : f32
      %61 = vector.broadcast %cst_56 : f32 to vector<1x512xf32>
      %62 = arith.cmpf ogt, %60, %61 : vector<1x512xf32>
      %cst_57 = arith.constant 2.000000e-01 : f32
      %63 = vector.broadcast %cst_57 : f32 to vector<1x512xf32>
      %64 = arith.mulf %63, %60 : vector<1x512xf32>
      %65 = arith.select %62, %60, %64 : vector<1x512xi1>, vector<1x512xf32>
      %66 = arith.truncf %65 : vector<1x512xf32> to vector<1x512xbf16>
      %c0_58 = arith.constant 0 : index
      %c0_59 = arith.constant 0 : index
      %67 = vector.load %arg16[%c0_58, %c0_59] : memref<512x256xbf16, #tpu.memory_space<vmem>>, vector<512x256xbf16>
      %cst_60 = arith.constant dense<0.000000e+00> : vector<1x256xf32>
      %68 = tpu.matmul %66, %67, %cst_60 {dimension_numbers = #tpu.dot_dimension_numbers<[1], [0], [0], [1], [0, 0, 1, 1], [], []>} : vector<1x512xbf16>, vector<512x256xbf16>, vector<1x256xf32> -> vector<1x256xf32>
      %c0_61 = arith.constant 0 : index
      %c0_62 = arith.constant 0 : index
      %69 = vector.load %arg17[%c0_61, %c0_62] : memref<1x256xf32, #tpu.memory_space<vmem>>, vector<1x256xf32>
      %70 = arith.addf %68, %69 : vector<1x256xf32>
      %c0_63 = arith.constant 0 : index
      %c0_64 = arith.constant 0 : index
      %71 = vector.load %arg18[%c0_63, %c0_64] : memref<1x256xf32, #tpu.memory_space<vmem>>, vector<1x256xf32>
      %72 = arith.mulf %70, %71 : vector<1x256xf32>
      %c0_65 = arith.constant 0 : index
      %c0_66 = arith.constant 0 : index
      %73 = vector.load %arg19[%c0_65, %c0_66] : memref<1x256xf32, #tpu.memory_space<vmem>>, vector<1x256xf32>
      %74 = arith.addf %72, %73 : vector<1x256xf32>
      %cst_67 = arith.constant 0.000000e+00 : f32
      %75 = vector.broadcast %cst_67 : f32 to vector<1x256xf32>
      %76 = arith.cmpf ogt, %74, %75 : vector<1x256xf32>
      %cst_68 = arith.constant 2.000000e-01 : f32
      %77 = vector.broadcast %cst_68 : f32 to vector<1x256xf32>
      %78 = arith.mulf %77, %74 : vector<1x256xf32>
      %79 = arith.select %76, %74, %78 : vector<1x256xi1>, vector<1x256xf32>
      %80 = arith.truncf %79 : vector<1x256xf32> to vector<1x256xbf16>
      %c0_69 = arith.constant 0 : index
      %c0_70 = arith.constant 0 : index
      %81 = vector.load %arg20[%c0_69, %c0_70] : memref<256x40xbf16, #tpu.memory_space<vmem>>, vector<256x40xbf16>
      %cst_71 = arith.constant dense<0.000000e+00> : vector<1x40xf32>
      %82 = tpu.matmul %80, %81, %cst_71 {dimension_numbers = #tpu.dot_dimension_numbers<[1], [0], [0], [1], [0, 0, 1, 1], [], []>} : vector<1x256xbf16>, vector<256x40xbf16>, vector<1x40xf32> -> vector<1x40xf32>
      %c0_72 = arith.constant 0 : index
      %c0_73 = arith.constant 0 : index
      %83 = vector.load %arg21[%c0_72, %c0_73] : memref<1x40xf32, #tpu.memory_space<vmem>>, vector<1x40xf32>
      %84 = arith.addf %82, %83 : vector<1x40xf32>
      %c0_74 = arith.constant 0 : index
      %c0_75 = arith.constant 0 : index
      %c0_76 = arith.constant 0 : index
      %85 = vector.load %arg22[%c0_74, %c0_75, %c0_76] : memref<1x1x40xf32, #tpu.memory_space<vmem>>, vector<1x1x40xf32>
      %86 = vector.shape_cast %85 : vector<1x1x40xf32> to vector<1x40xf32>
      %87 = vector.shape_cast %84 : vector<1x40xf32> to vector<1x1x40xf32>
      tpu.vector_store %arg22[%c0_74, %c0_75, %c0_76], %87 {strides = array<i32>} : memref<1x1x40xf32, #tpu.memory_space<vmem>>, vector<1x1x40xf32>,
    } else {
    }
    return
  }
  func.func @transform_0(%arg0: i32, %arg1: i32) -> (i32, i32, i32) {
    %c0_i32 = arith.constant 0 : i32
    %c0_i32_0 = arith.constant 0 : i32
    return %arg0, %arg1, %c0_i32 : i32, i32, i32
  }
  func.func @transform_1(%arg0: i32, %arg1: i32) -> (i32, i32, i32) {
    %c0_i32 = arith.constant 0 : i32
    %c0_i32_0 = arith.constant 0 : i32
    return %arg0, %arg1, %c0_i32 : i32, i32, i32
  }
  func.func @transform_2(%arg0: i32, %arg1: i32) -> (i32, i32, i32) {
    %c0_i32 = arith.constant 0 : i32
    %c0_i32_0 = arith.constant 0 : i32
    return %arg0, %arg1, %c0_i32 : i32, i32, i32
  }
  func.func @transform_3(%arg0: i32, %arg1: i32) -> (i32, i32, i32) {
    %c0_i32 = arith.constant 0 : i32
    %c0_i32_0 = arith.constant 0 : i32
    return %arg0, %arg1, %c0_i32 : i32, i32, i32
  }
  func.func @transform_4(%arg0: i32, %arg1: i32) -> (i32, i32) {
    %c0_i32 = arith.constant 0 : i32
    %c0_i32_0 = arith.constant 0 : i32
    %c0_i32_1 = arith.constant 0 : i32
    return %c0_i32, %c0_i32_0 : i32, i32
  }
  func.func @transform_5(%arg0: i32, %arg1: i32) -> (i32, i32) {
    %c0_i32 = arith.constant 0 : i32
    %c0_i32_0 = arith.constant 0 : i32
    %c0_i32_1 = arith.constant 0 : i32
    return %c0_i32, %c0_i32_0 : i32, i32
  }
  func.func @transform_6(%arg0: i32, %arg1: i32) -> (i32, i32) {
    %c0_i32 = arith.constant 0 : i32
    %c0_i32_0 = arith.constant 0 : i32
    %c0_i32_1 = arith.constant 0 : i32
    return %c0_i32, %c0_i32_0 : i32, i32
  }
  func.func @transform_7(%arg0: i32, %arg1: i32) -> (i32, i32) {
    %c0_i32 = arith.constant 0 : i32
    %c0_i32_0 = arith.constant 0 : i32
    %c0_i32_1 = arith.constant 0 : i32
    return %c0_i32, %c0_i32_0 : i32, i32
  }
  func.func @transform_8(%arg0: i32, %arg1: i32) -> (i32, i32) {
    %c0_i32 = arith.constant 0 : i32
    %c0_i32_0 = arith.constant 0 : i32
    %c0_i32_1 = arith.constant 0 : i32
    return %c0_i32, %c0_i32_0 : i32, i32
  }
  func.func @transform_9(%arg0: i32, %arg1: i32) -> (i32, i32) {
    %c0_i32 = arith.constant 0 : i32
    %c0_i32_0 = arith.constant 0 : i32
    %c0_i32_1 = arith.constant 0 : i32
    return %c0_i32, %c0_i32_0 : i32, i32
  }
  func.func @transform_10(%arg0: i32, %arg1: i32) -> (i32, i32) {
    %c0_i32 = arith.constant 0 : i32
    %c0_i32_0 = arith.constant 0 : i32
    %c0_i32_1 = arith.constant 0 : i32
    return %c0_i32, %c0_i32_0 : i32, i32
  }
  func.func @transform_11(%arg0: i32, %arg1: i32) -> (i32, i32) {
    %c0_i32 = arith.constant 0 : i32
    %c0_i32_0 = arith.constant 0 : i32
    %c0_i32_1 = arith.constant 0 : i32
    return %c0_i32, %c0_i32_0 : i32, i32
  }
  func.func @transform_12(%arg0: i32, %arg1: i32) -> (i32, i32) {
    %c0_i32 = arith.constant 0 : i32
    %c0_i32_0 = arith.constant 0 : i32
    %c0_i32_1 = arith.constant 0 : i32
    return %c0_i32, %c0_i32_0 : i32, i32
  }
  func.func @transform_13(%arg0: i32, %arg1: i32) -> (i32, i32) {
    %c0_i32 = arith.constant 0 : i32
    %c0_i32_0 = arith.constant 0 : i32
    %c0_i32_1 = arith.constant 0 : i32
    return %c0_i32, %c0_i32_0 : i32, i32
  }
  func.func @transform_14(%arg0: i32, %arg1: i32) -> (i32, i32) {
    %c0_i32 = arith.constant 0 : i32
    %c0_i32_0 = arith.constant 0 : i32
    %c0_i32_1 = arith.constant 0 : i32
    return %c0_i32, %c0_i32_0 : i32, i32
  }
  func.func @transform_15(%arg0: i32, %arg1: i32) -> (i32, i32) {
    %c0_i32 = arith.constant 0 : i32
    %c0_i32_0 = arith.constant 0 : i32
    %c0_i32_1 = arith.constant 0 : i32
    return %c0_i32, %c0_i32_0 : i32, i32
  }
  func.func @transform_16(%arg0: i32, %arg1: i32) -> (i32, i32) {
    %c0_i32 = arith.constant 0 : i32
    %c0_i32_0 = arith.constant 0 : i32
    %c0_i32_1 = arith.constant 0 : i32
    return %c0_i32, %c0_i32_0 : i32, i32
  }
  func.func @transform_17(%arg0: i32, %arg1: i32) -> (i32, i32) {
    %c0_i32 = arith.constant 0 : i32
    %c0_i32_0 = arith.constant 0 : i32
    %c0_i32_1 = arith.constant 0 : i32
    return %c0_i32, %c0_i32_0 : i32, i32
  }
  func.func @transform_18(%arg0: i32, %arg1: i32) -> (i32, i32) {
    %c0_i32 = arith.constant 0 : i32
    %c0_i32_0 = arith.constant 0 : i32
    %c0_i32_1 = arith.constant 0 : i32
    return %c0_i32, %c0_i32_0 : i32, i32
  }
  func.func @transform_19(%arg0: i32, %arg1: i32) -> (i32, i32) {
    %c0_i32 = arith.constant 0 : i32
    %c0_i32_0 = arith.constant 0 : i32
    %c0_i32_1 = arith.constant 0 : i32
    return %c0_i32, %c0_i32_0 : i32, i32
  }
  func.func @transform_20(%arg0: i32, %arg1: i32) -> (i32, i32, i32) {
    %c0_i32 = arith.constant 0 : i32
    %c0_i32_0 = arith.constant 0 : i32
    %c0_i32_1 = arith.constant 0 : i32
    return %arg0, %c0_i32, %c0_i32_0 : i32, i32, i32
  }
}

</mosaic_0001>

<bundles_post_ra>
// kernel: dgcnn_forward.9
= control target key start
LH: loop header
LB: loop body
LE: loop exit
PB: predicated region body
PF: predicated region fallthrough
CT: control target
= control target key end

     0   :  { %s425_s6 = smov 0   ;;  %s479_s0 = inlined_call_operand.vmem [shape: f32[2,32,3], index: 0, kind: input, shape index: {}]   ;;  %s480_s1 = inlined_call_operand.vmem [shape: f32[2,32,32], index: 1, kind: output, shape index: {}]  }
   0x1 LB: > { %s339_s7 = sadd.s32 4294967295, %s413_s6   ;;  %p343_p0 = scmp.ge.s32.totalorder %s413_s6, 1  ;;  %s413_s6 = sphi %s425_s6, %s11_s6  }
   0x2   : > { %p87_p1 = scmp.lt.s32.totalorder %s413_s6, 3 }
   0x4   : > { %p88_p2 = pnand %p343_p0, %p87_p1 }
   0x5   : > { %p107_p3 = scmp.lt.s32.totalorder (!%p88_p2), %s339_s7, 1  ;;  %vm121_vm0 = vcmask (!%p88_p2), 23552   ;;  %v271_v23 = vlaneseq (!%p88_p2)  ;;  %vm279_vm2 = vcmask (!%p88_p2), 261120  }
   0x6   : > { %91 = sbr.rel (%p88_p2) target bundleno = 297 (0x129), region = 24  ;;  %vm443_vm1 = vmpackc.low (!%p88_p2), %vm121_vm0, %vm121_vm0 }
   0x7   : > { %v272_v24 = vshrl.u32 (!%p88_p2), %v271_v23, 7 }
   0x9   : > { %v273_v25 = vsub.s32 (!%p88_p2), 0, %v272_v24 }
   0xd   : > { %s484_s7 = smov (!%p107_p3, %s339_s7), 1 }
   0xe   : > { %s358_s8 = sshll.u32 %s484_s7, 5 }
   0xf   : > { %s111_s11 = scalar_lea.vmem %s479_s0, %s358_s8  ;;  %s116_s14 = scalar_lea.vmem %s480_s1, %s358_s8 }
  0x10   : > { %v117_v1 = vld [vmem:[%s111_s11] sm:$0xff]  ;;  %v118_v2 = vld [vmem:[%s111_s11 + $0x8] sm:$0xff]  ;;  %v119_v3 = vld [vmem:[%s111_s11 + $0x10] sm:$0xff] }
  0x11   : > { %v219_v4 = vmul.f32 %v117_v1, %v117_v1  ;;  %v220_v5 = vmul.f32 %v118_v2, %v118_v2  ;;  %v382_v6 = vpack.c.bf16 %v118_v2, %v117_v1  ;;  %v221_v7 = vmul.f32 %v119_v3, %v119_v3  ;;  %v120_v8 = vld [vmem:[%s111_s11 + $0x18] sm:$0xff]  ;;  %376 = vmatprep.mubr.msk.f32.mxu0 %vm121_vm0, %v117_v1 }
  0x12   : > { %v222_v9 = vmul.f32 %v120_v8, %v120_v8  ;;  %v388_v10 = vpack.c.bf16 %v120_v8, %v119_v3  ;;  %379 = vmatprep.mubr.msk.f32.mxu1 %vm121_vm0, %v119_v3 }
  0x13   : > { %v223_v11 = vsel %vm121_vm0, %v219_v4, 0.0  ;;  %v229_v12 = vsel %vm121_vm0, %v221_v7, 0.0  ;;  %384 = vmatprep.subr.msk.bf16.mxu0 %vm443_vm1, %v382_v6  ;;  %394 = vmatprep.subr.msk.bf16.mxu1 %vm443_vm1, %v382_v6  ;;  %v226_v13 = vsel %vm121_vm0, %v220_v5, 0.0 }
  0x14   : > { %224 = vadd.xlane.f32.xlu0 %v223_v11  ;;  %230 = vadd.xlane.f32.xlu1 %v229_v12  ;;  %v232_v14 = vsel %vm121_vm0, %v222_v9, 0.0 }
  0x15   : > { %387 = vmatpush3.bf16.xpose.msk.msra.mxu0 %vm443_vm1, %v382_v6  ;;  %396 = vmatpush3.bf16.xpose.msk.msra.mxu1 %vm443_vm1, %v382_v6 }
  0x16   : > { %390 = vmatprep.subr.msk.bf16.mxu0 %vm443_vm1, %v388_v10  ;;  %395 = vmatprep.subr.msk.bf16.mxu1 %vm443_vm1, %v388_v10 }
  0x18   : > { %227 = vadd.xlane.f32.xlu0 %v226_v13  ;;  %233 = vadd.xlane.f32.xlu1 %v232_v14 }
  0x1d   : > { %393 = vmatpush3.bf16.xpose.msk.msra.mxu0 %vm443_vm1, %v388_v10  ;;  %397 = vmatpush3.bf16.xpose.msk.msra.mxu1 %vm443_vm1, %v388_v10 }
  0x24   : > { %377 = vmatmul.mubr.msk.f32.vlgmr.msra.gmra.mrb[0].mxu0 %vm121_vm0, %v118_v2  ;;  %380 = vmatmul.mubr.msk.f32.vlgmr.msra.gmra.mrb[0].mxu1 %vm121_vm0, %v120_v8 }
  0xa1   : > { %v225_v15 = vpop.xlane.xlu0 %224  ;;  %v231_v17 = vpop.xlane.xlu1 %230 }
  0xa2   : > { %239 = vxpose.xlu0.b32.start [1/4] (short) (narrow) %v225_v15, 8 }
  0xa5   : > { %v228_v16 = vpop.xlane.xlu0 %227  ;;  %v234_v18 = vpop.xlane.xlu1 %233 }
  0xa6   : > { %240 = vxpose.xlu0.b32.cont [2/4] (short) (narrow) %v228_v16, 8 }
  0xaa   : > { %241 = vxpose.xlu0.b32.cont [3/4] (short) (narrow) %v231_v17, 8 }
  0xae   : > { %242 = vxpose.xlu0.b32.end [4/4] (short) (narrow) %v234_v18, 8 }
  0xf7   : > { %v378_v19 = vpop.f32.mrb[0].mxu0  ;;  %v381_v20 = vpop.f32.mrb[0].mxu1 }
  0xf8   : > { %v200_v21 = vpop.f32.mrb[1].mxu0  ;;  %v210_v22 = vpop.f32.mrb[1].mxu1  ;;  %v236_v26 = vmul.f32 2.0, %v378_v19  ;;  %v238_v27 = vmul.f32 2.0, %v381_v20 }
  0xf9   : > { %v235_v28 = vmul.f32 2.0, %v200_v21  ;;  %v237_v29 = vmul.f32 2.0, %v210_v22 }
 0x122   : > { %v255_v30 = vpop.trf.xlu0 }
 0x123   : > { %v274_v31 = vrot.slane %v255_v30, %v273_v25 }
 0x125   : > { %v275_v32 = vsub.f32 %v235_v28, %v274_v31  ;;  %v276_v33 = vsub.f32 %v236_v26, %v274_v31  ;;  %v277_v34 = vsub.f32 %v237_v29, %v274_v31  ;;  %v278_v35 = vsub.f32 %v238_v27, %v274_v31 }
 0x127   : > { %280 = vst.msk [vmem:[%s116_s14] sm:$0xff] %vm279_vm2, %v275_v32  ;;  %281 = vst.msk [vmem:[%s116_s14 + $0x8] sm:$0xff] %vm279_vm2, %v276_v33 }
 0x128   : > { %282 = vst.msk [vmem:[%s116_s14 + $0x10] sm:$0xff] %vm279_vm2, %v277_v34  ;;  %283 = vst.msk [vmem:[%s116_s14 + $0x18] sm:$0xff] %vm279_vm2, %v278_v35 }
 0x129 PF: > { %s11_s6 = sadd.s32 1, %s413_s6  }
 0x12a   : > { %p8_p4 = scmp.ge.s32.totalorder %s11_s6, 4  }
 0x12c   :  { %10 = sbr.rel (!%p8_p4) target bundleno = 1 (0x1), region = 54 }

// kernel: dgcnn_forward.10
= control target key start
LH: loop header
LB: loop body
LE: loop exit
PB: predicated region body
PF: predicated region fallthrough
CT: control target
= control target key end

     0   :  { %s1498_s21 = smov 0   ;;  %s1721_s0 = inlined_call_operand.vmem [shape: s32[2,32,8], index: 0, kind: input, shape index: {}]   ;;  %s1722_s1 = inlined_call_operand.vmem [shape: bf16[2,32,3], index: 1, kind: input, shape index: {}]   ;;  %s1723_s2 = inlined_call_operand.vmem [shape: bf16[3,64], index: 2, kind: input, shape index: {}]   ;;  %s1724_s3 = inlined_call_operand.vmem [shape: bf16[3,64], index: 3, kind: input, shape index: {}]   ;;  %s1725_s4 = inlined_call_operand.vmem [shape: f32[1,64], index: 4, kind: input, shape index: {}]   ;;  %s1726_s5 = inlined_call_operand.vmem [shape: f32[1,64], index: 5, kind: input, shape index: {}]   ;;  %s1727_s6 = inlined_call_operand.vmem [shape: bf16[2,32,64], index: 6, kind: output, shape index: {}]  }
   0x1 LB: > { %s1215_s22 = sadd.s32 4294967295, %s1451_s21   ;;  %p1219_p0 = scmp.ge.s32.totalorder %s1451_s21, 1  ;;  %s1451_s21 = sphi %s1498_s21, %s16_s21  }
   0x2   : > { %p222_p1 = scmp.lt.s32.totalorder %s1451_s21, 3 }
   0x4   : > { %p223_p2 = pnand %p1219_p0, %p222_p1 }
   0x5   : > { %v277_v0 = vld [vmem:[%s1723_s2] sm:$0x3] (!%p223_p2)  ;;  %vm295_vm0 = vcmask (!%p223_p2), 1040384   ;;  %vm296_vm1 = vcmask (!%p223_p2), 1041408   ;;  %p257_p3 = scmp.lt.s32.totalorder (!%p223_p2), %s1215_s22, 1  ;;  %v1453_v1 = vmov (!%p223_p2), 65535   ;;  %v410_v21 = vlaneseq (!%p223_p2) }
   0x6   : > { %226 = sbr.rel (%p223_p2) target bundleno = 498 (0x1f2), region = 44  ;;  %v297_v2 = vsel (!%p223_p2), %vm295_vm0, 4294967295, %v1453_v1  ;;  %v1454_v4 = vmov (!%p223_p2), 0   ;;  %vm288_vm2 = vcmask (!%p223_p2), 23552   ;;  %v1455_v12 = vmov (!%p223_p2), 1  }
   0x7   : > { %v298_v3 = vsel (!%p223_p2), %vm296_vm1, %v297_v2, 0  ;;  %1428 = vset.pattern.permute.xlu1 (!%p223_p2), %v1454_v4  ;;  %1427 = vset.pattern.permute.xlu0 (!%p223_p2), %v1454_v4  ;;  %v351_v13 = vld [vmem:[%s1724_s3] sm:$0x3] (!%p223_p2)  ;;  %v1456_v15 = vmov (!%p223_p2), 2   ;;  %v1457_v16 = vmov (!%p223_p2), 3   ;;  %v1458_v17 = vmov (!%p223_p2), 4  }
   0x8   : > { %v300_v5 = vand.u32 (!%p223_p2), %v298_v3, %v277_v0  ;;  %v353_v14 = vand.u32 (!%p223_p2), %v351_v13, %v298_v3  ;;  %v1459_v18 = vmov (!%p223_p2), 5   ;;  %v1460_v19 = vmov (!%p223_p2), 6  }
   0x9   : > { %v1461_v20 = vmov (!%p223_p2), 7   ;;  %v1528_v22 = vand.u32 (!%p223_p2), 127, %v410_v21  ;;  %v1462_v25 = vmov (!%p223_p2), 0.0   ;;  %vm438_vm7 = vcmask (!%p223_p2), 261120  }
   0xa   : > { %1333 = vmatprep.subr.bf16.mxu0 (!%p223_p2), %v300_v5  ;;  %1339 = vmatprep.subr.bf16.mxu1 (!%p223_p2), %v353_v14 }
   0xb   : > { %1334 = vmatpush3.bf16.msra.mxu0 (!%p223_p2), %v300_v5  ;;  %1340 = vmatpush3.bf16.msra.mxu1 (!%p223_p2), %v353_v14 }
   0xd   : > { %s1729_s22 = smov (!%p257_p3, %s1215_s22), 1 }
   0xe   : > { %s1288_s25 = sshll.u32 %s1729_s22, 5  ;;  %s1289_s26 = sshll.u32 %s1729_s22, 4 }
   0xf   : > { %s261_s29 = scalar_lea.vmem %s1721_s0, %s1288_s25  ;;  %s266_s8 = scalar_lea.vmem %s1722_s1, %s1289_s26 }
  0x10   : > { %v1443_v6 = vld [vmem:[%s266_s8] sm:$0xff]   ;;  %v1444_v7 = vld [vmem:[%s266_s8 + $0x8] sm:$0xff]   ;;  %v408_v8 = vld [vmem:[%s261_s29 + $0x10] sm:$0xff]  ;;  %s271_s17 = scalar_lea.vmem %s1727_s6, %s1289_s26 }
  0x11   : > { %1335 = vmatprep.mubr.msk.bf16.mxu0 %vm288_vm2, %v1443_v6  ;;  %v406_v9 = vld [vmem:[%s261_s29] sm:$0xff]  ;;  %1341 = vmatprep.mubr.msk.bf16.mxu1 %vm288_vm2, %v1443_v6  ;;  %v409_v10 = vld [vmem:[%s261_s29 + $0x18] sm:$0xff]  ;;  %v407_v11 = vld [vmem:[%s261_s29 + $0x8] sm:$0xff] }
  0x12   : > { %1336 = vmatmul.mubr.msk.bf16.vlgmr.msra.gmra.mrb[0].mxu0 %vm288_vm2, %v1444_v7  ;;  %419 = vperm.xlu1 %1428, %v408_v8  }
  0x13   : > { %413 = vperm.xlu0 %1427, %v406_v9   ;;  %1342 = vmatmul.mubr.msk.bf16.vlgmr.msra.gmra.mrb[0].mxu1 %vm288_vm2, %v1444_v7 }
  0x16   : > { %422 = vperm.xlu1 %1428, %v409_v10  }
  0x17   : > { %416 = vperm.xlu0 %1427, %v407_v11  }
  0x1a   : > { %1430 = vset.pattern.permute.xlu1 %v1455_v12 }
  0x1b   : > { %498 = vperm.xlu1 %1430, %v407_v11   ;;  %1429 = vset.pattern.permute.xlu0 %v1455_v12 }
  0x1c   : > { %495 = vperm.xlu0 %1429, %v406_v9  }
  0x1f   : > { %501 = vperm.xlu1 %1430, %v408_v8  }
  0x20   : > { %504 = vperm.xlu0 %1429, %v409_v10  }
  0x23   : > { %1431 = vset.pattern.permute.xlu1 %v1456_v15 }
  0x24   : > { %580 = vperm.xlu1 %1431, %v406_v9   ;;  %1432 = vset.pattern.permute.xlu0 %v1456_v15 }
  0x25   : > { %583 = vperm.xlu0 %1432, %v407_v11  }
  0x28   : > { %586 = vperm.xlu1 %1431, %v408_v8  }
  0x29   : > { %1433 = vset.pattern.permute.xlu0 %v1457_v16 }
  0x2a   : > { %665 = vperm.xlu0 %1433, %v406_v9  }
  0x2c   : > { %589 = vperm.xlu1 %1431, %v409_v10  }
  0x2e   : > { %674 = vperm.xlu0 %1433, %v409_v10  }
  0x30   : > { %1434 = vset.pattern.permute.xlu1 %v1457_v16 }
  0x31   : > { %668 = vperm.xlu1 %1434, %v407_v11  }
  0x32   : > { %1436 = vset.pattern.permute.xlu0 %v1458_v17 }
  0x33   : > { %753 = vperm.xlu0 %1436, %v407_v11  }
  0x35   : > { %671 = vperm.xlu1 %1434, %v408_v8  }
  0x37   : > { %1437 = vset.pattern.permute.xlu0 %v1459_v18 }
  0x38   : > { %835 = vperm.xlu0 %1437, %v406_v9  }
  0x39   : > { %1435 = vset.pattern.permute.xlu1 %v1458_v17 }
  0x3a   : > { %750 = vperm.xlu1 %1435, %v406_v9  }
  0x3c   : > { %844 = vperm.xlu0 %1437, %v409_v10  }
  0x3e   : > { %756 = vperm.xlu1 %1435, %v408_v8  }
  0x40   : > { %1440 = vset.pattern.permute.xlu0 %v1460_v19 }
  0x41   : > { %923 = vperm.xlu0 %1440, %v407_v11  }
  0x42   : > { %759 = vperm.xlu1 %1435, %v409_v10  }
  0x45   : > { %1441 = vset.pattern.permute.xlu0 %v1461_v20 }
  0x46   : > { %1438 = vset.pattern.permute.xlu1 %v1459_v18  ;;  %1005 = vperm.xlu0 %1441, %v406_v9  }
  0x47   : > { %838 = vperm.xlu1 %1438, %v407_v11  }
  0x4a   : > { %1014 = vperm.xlu0 %1441, %v409_v10  }
  0x4b   : > { %841 = vperm.xlu1 %1438, %v408_v8  }
  0x4f   : > { %1439 = vset.pattern.permute.xlu1 %v1460_v19 }
  0x50   : > { %920 = vperm.xlu1 %1439, %v406_v9  }
  0x54   : > { %926 = vperm.xlu1 %1439, %v408_v8  }
  0x58   : > { %929 = vperm.xlu1 %1439, %v409_v10  }
  0x5c   : > { %1442 = vset.pattern.permute.xlu1 %v1461_v20 }
  0x5d   : > { %1008 = vperm.xlu1 %1442, %v407_v11  }
  0x61   : > { %1011 = vperm.xlu1 %1442, %v408_v8  }
  0x91   : > { %v420_v23 = vpop.permute.xlu1 %419 }
  0x92   : > { %vm426_vm3 = vcmp.eq.s32.totalorder %v420_v23, %v1528_v22  ;;  %v414_v24 = vpop.permute.xlu0 %413 }
  0x93   : > { %vm424_vm4 = vcmp.eq.s32.totalorder %v414_v24, %v1528_v22  ;;  %v1533_v26 = vsel %vm426_vm3, 1.0, %v1462_v25 }
  0x94   : > { %v1232_v28 = vsel %vm424_vm4, 1.0, %v1462_v25 }
  0x95   : > { %v423_v27 = vpop.permute.xlu1 %422 }
  0x96   : > { %vm427_vm5 = vcmp.eq.s32.totalorder %v423_v27, %v1528_v22  ;;  %v417_v29 = vpop.permute.xlu0 %416 }
  0x97   : > { %v1538_v30 = vsel %vm427_vm5, 1.0, %v1462_v25  ;;  %vm425_vm6 = vcmp.eq.s32.totalorder %v417_v29, %v1528_v22 }
  0x98   : > { %v437_v31 = vpack.c.bf16 %v1538_v30, %v1533_v26  ;;  %v1233_v32 = vsel %vm425_vm6, 1.0, %v1462_v25 }
  0x99   : > { %v436_v33 = vpack.c.bf16 %v1233_v32, %v1232_v28 }
  0x9a   : > { %v499_v34 = vpop.permute.xlu1 %498 }
  0x9b   : > { %vm507_vm8 = vcmp.eq.s32.totalorder %v499_v34, %v1528_v22  ;;  %v496_v35 = vpop.permute.xlu0 %495  ;;  %1349 = vmatprep.mubr.msk.bf16.mxu0 %vm438_vm7, %v436_v33 }
  0x9c   : > { %v1239_v36 = vsel %vm507_vm8, 1.0, %v1462_v25  ;;  %vm506_vm9 = vcmp.eq.s32.totalorder %v496_v35, %v1528_v22 }
  0x9d   : > { %v1238_v37 = vsel %vm506_vm9, 1.0, %v1462_v25 }
  0x9e   : > { %v518_v38 = vpack.c.bf16 %v1239_v36, %v1238_v37  ;;  %v502_v39 = vpop.permute.xlu1 %501 }
  0x9f   : > { %v505_v47 = vpop.permute.xlu0 %504  ;;  %vm508_vm10 = vcmp.eq.s32.totalorder %v502_v39, %v1528_v22 }
  0xa0   : > { %1357 = vmatprep.mubr.msk.bf16.mxu1 %vm438_vm7, %v518_v38  ;;  %vm509_vm11 = vcmp.eq.s32.totalorder %v505_v47, %v1528_v22  ;;  %v1240_v63 = vsel %vm508_vm10, 1.0, %v1462_v25 }
  0xa1   : > { %v1241_v0 = vsel %vm509_vm11, 1.0, %v1462_v25 }
  0xa2   : > { %v519_v5 = vpack.c.bf16 %v1241_v0, %v1240_v63 }
  0xa3   : > { %v581_v40 = vpop.permute.xlu1 %580 }
  0xa4   : > { %v584_v48 = vpop.permute.xlu0 %583  ;;  %vm591_vm12 = vcmp.eq.s32.totalorder %v581_v40, %v1528_v22 }
  0xa5   : > { %vm592_vm13 = vcmp.eq.s32.totalorder %v584_v48, %v1528_v22  ;;  %v1244_v1 = vsel %vm591_vm12, 1.0, %v1462_v25 }
  0xa6   : > { %v1245_v2 = vsel %vm592_vm13, 1.0, %v1462_v25 }
  0xa7   : > { %v587_v41 = vpop.permute.xlu1 %586  ;;  %v603_v7 = vpack.c.bf16 %v1245_v2, %v1244_v1 }
  0xa8   : > { %vm593_vm0 = vcmp.eq.s32.totalorder %v587_v41, %v1528_v22 }
  0xa9   : > { %v666_v50 = vpop.permute.xlu0 %665  ;;  %v1246_v10 = vsel %vm593_vm0, 1.0, %v1462_v25 }
  0xaa   : > { %vm676_vm15 = vcmp.eq.s32.totalorder %v666_v50, %v1528_v22 }
  0xab   : > { %v590_v42 = vpop.permute.xlu1 %589  ;;  %v1250_v4 = vsel %vm676_vm15, 1.0, %v1462_v25 }
  0xac   : > { %vm594_vm1 = vcmp.eq.s32.totalorder %v590_v42, %v1528_v22 }
  0xad   : > { %v675_v52 = vpop.permute.xlu0 %674  ;;  %v1247_v11 = vsel %vm594_vm1, 1.0, %v1462_v25 }
  0xae   : > { %vm679_vm3 = vcmp.eq.s32.totalorder %v675_v52, %v1528_v22  ;;  %v604_v18 = vpack.c.bf16 %v1247_v11, %v1246_v10 }
  0xaf   : > { %v1253_v14 = vsel %vm679_vm3, 1.0, %v1462_v25 }
  0xb0   : > { %v669_v43 = vpop.permute.xlu1 %668 }
  0xb1   : > { %vm677_vm14 = vcmp.eq.s32.totalorder %v669_v43, %v1528_v22 }
  0xb2   : > { %v754_v57 = vpop.permute.xlu0 %753  ;;  %v1251_v3 = vsel %vm677_vm14, 1.0, %v1462_v25 }
  0xb3   : > { %v688_v9 = vpack.c.bf16 %v1251_v3, %v1250_v4  ;;  %vm762_vm5 = vcmp.eq.s32.totalorder %v754_v57, %v1528_v22 }
  0xb4   : > { %v1550_v44 = vpop.permute.xlu1 %671  ;;  %v1257_v17 = vsel %vm762_vm5, 1.0, %v1462_v25 }
  0xb5   : > { %vm678_vm2 = vcmp.eq.s32.totalorder %v1550_v44, %v1528_v22 }
  0xb6   : > { %v1252_v13 = vsel %vm678_vm2, 1.0, %v1462_v25 }
  0xb7   : > { %v836_v62 = vpop.permute.xlu0 %835  ;;  %v689_v21 = vpack.c.bf16 %v1253_v14, %v1252_v13 }
  0xb8   : > { %vm846_vm8 = vcmp.eq.s32.totalorder %v836_v62, %v1528_v22 }
  0xb9   : > { %v1552_v45 = vpop.permute.xlu1 %750  ;;  %v1262_v20 = vsel %vm846_vm8, 1.0, %v1462_v25 }
  0xba   : > { %vm761_vm4 = vcmp.eq.s32.totalorder %v1552_v45, %v1528_v22 }
  0xbb   : > { %v845_v8 = vpop.permute.xlu0 %844  ;;  %v1256_v16 = vsel %vm761_vm4, 1.0, %v1462_v25 }
  0xbc   : > { %v773_v24 = vpack.c.bf16 %v1257_v17, %v1256_v16  ;;  %vm849_vm11 = vcmp.eq.s32.totalorder %v845_v8, %v1528_v22 }
  0xbd   : > { %v1554_v46 = vpop.permute.xlu1 %756  ;;  %v1265_v35 = vsel %vm849_vm11, 1.0, %v1462_v25 }
  0xbe   : > { %vm763_vm9 = vcmp.eq.s32.totalorder %v1554_v46, %v1528_v22 }
  0xc0   : > { %v924_v12 = vpop.permute.xlu0 %923 }
  0xc1   : > { %v1556_v49 = vpop.permute.xlu1 %759  ;;  %vm932_vm13 = vcmp.eq.s32.totalorder %v924_v12, %v1528_v22 }
  0xc2   : > { %vm764_vm10 = vcmp.eq.s32.totalorder %v1556_v49, %v1528_v22  ;;  %v1269_v37 = vsel %vm932_vm13, 1.0, %v1462_v25 }
  0xc3   : > { %v1259_v32 = vsel %vm764_vm10, 1.0, %v1462_v25 }
  0xc5   : > { %v1006_v23 = vpop.permute.xlu0 %1005 }
  0xc6   : > { %v1558_v51 = vpop.permute.xlu1 %838  ;;  %vm1016_vm0 = vcmp.eq.s32.totalorder %v1006_v23, %v1528_v22 }
  0xc7   : > { %vm847_vm6 = vcmp.eq.s32.totalorder %v1558_v51, %v1528_v22  ;;  %v1274_v39 = vsel %vm1016_vm0, 1.0, %v1462_v25 }
  0xc8   : > { %v1263_v19 = vsel %vm847_vm6, 1.0, %v1462_v25  ;;  %vm1143_vm6 = vcmask 519168  }
  0xc9   : > { %v858_v28 = vpack.c.bf16 %v1263_v19, %v1262_v20  ;;  %v1015_v42 = vpop.permute.xlu0 %1014 }
  0xca   : > { %v1560_v54 = vpop.permute.xlu1 %841  ;;  %vm1019_vm4 = vcmp.eq.s32.totalorder %v1015_v42, %v1528_v22 }
  0xcb   : > { %vm848_vm12 = vcmp.eq.s32.totalorder %v1560_v54, %v1528_v22  ;;  %v1277_v49 = vsel %vm1019_vm4, 1.0, %v1462_v25 }
  0xcc   : > { %v1264_v34 = vsel %vm848_vm12, 1.0, %v1462_v25 }
  0xcd   : > { %v859_v43 = vpack.c.bf16 %v1265_v35, %v1264_v34 }
  0xcf   : > { %v1570_v61 = vpop.permute.xlu1 %920 }
  0xd0   : > { %vm931_vm14 = vcmp.eq.s32.totalorder %v1570_v61, %v1528_v22 }
  0xd1   : > { %v1268_v36 = vsel %vm931_vm14, 1.0, %v1462_v25 }
  0xd2   : > { %v943_v44 = vpack.c.bf16 %v1269_v37, %v1268_v36 }
  0xd3   : > { %v1590_v6 = vpop.permute.xlu1 %926 }
  0xd4   : > { %vm933_vm1 = vcmp.eq.s32.totalorder %v1590_v6, %v1528_v22 }
  0xd5   : > { %v1270_v46 = vsel %vm933_vm1, 1.0, %v1462_v25 }
  0xd7   : > { %v1618_v15 = vpop.permute.xlu1 %929 }
  0xd8   : > { %vm934_vm2 = vcmp.eq.s32.totalorder %v1618_v15, %v1528_v22 }
  0xd9   : > { %v1271_v47 = vsel %vm934_vm2, 1.0, %v1462_v25 }
  0xdc   : > { %v1009_v26 = vpop.permute.xlu1 %1008 }
  0xdd   : > { %vm1017_vm15 = vcmp.eq.s32.totalorder %v1009_v26, %v1528_v22 }
  0xde   : > { %v1275_v38 = vsel %vm1017_vm15, 1.0, %v1462_v25 }
  0xdf   : > { %v1028_v45 = vpack.c.bf16 %v1275_v38, %v1274_v39 }
  0xe0   : > { %v1012_v41 = vpop.permute.xlu1 %1011 }
  0xe1   : > { %vm1018_vm3 = vcmp.eq.s32.totalorder %v1012_v41, %v1528_v22  ;;  %v944_v22 = vpack.c.bf16 %v1271_v47, %v1270_v46  ;;  %v1280_v47 = vld [vmem:[%s1725_s4] ss:$0 sm:$0xff] }
  0xe2   : > { %v1276_v48 = vsel %vm1018_vm3, 1.0, %v1462_v25 }
  0xe3   : > { %v1029_v50 = vpack.c.bf16 %v1277_v49, %v1276_v48 }
  0xe5   : > { %v1337_v53 = vpop.f32.mrb[0].mxu0 }
  0xe6   : > { %v336_v55 = vpop.f32.mrb[1].mxu0  ;;  %v1634_v27 = vpop.f32.mrb[0].mxu1 }
  0xe7   : > { %v1338_v56 = vpop.f32.mrb[2].mxu0  ;;  %v1641_v29 = vpop.f32.mrb[1].mxu1 }
  0xe8   : > { %v1562_v58 = vpack.c.bf16 %v1338_v56, %v1337_v53  ;;  %v339_v59 = vpop.f32.mrb[3].mxu0  ;;  %v1649_v30 = vpop.f32.mrb[2].mxu1 }
  0xe9   : > { %v1564_v60 = vpack.c.bf16 %v339_v59, %v336_v55  ;;  %v1661_v33 = vpop.f32.mrb[3].mxu1 }
  0xeb   : > { %1345 = vmatprep.subr.bf16.mxu0 %v1564_v60  ;;  %1353 = vmatprep.subr.bf16.mxu1 %v1564_v60 }
  0xec   : > { %1346 = vmatpush3.bf16.msra.mxu0 %v1564_v60  ;;  %1354 = vmatpush3.bf16.msra.mxu1 %v1564_v60 }
  0xed   : > { %1347 = vmatprep.subr.bf16.mxu0 %v1562_v58  ;;  %1355 = vmatprep.subr.bf16.mxu1 %v1562_v58 }
  0xf0   : > { %1348 = vmatpush3.bf16.msra.mxu0 %v1562_v58  ;;  %1356 = vmatpush3.bf16.msra.mxu1 %v1562_v58 }
  0xf1   : > { %1361 = vmatprep.subr.bf16.mxu0 %v1564_v60  ;;  %1369 = vmatprep.subr.bf16.mxu1 %v1564_v60 }
  0xf3   : > { %1350 = vmatmul.mubr.msk.bf16.vlgmr.msra.gmra.mrb[4].mxu0 %vm438_vm7, %v437_v31  ;;  %1358 = vmatmul.mubr.msk.bf16.vlgmr.msra.gmra.mrb[4].mxu1 %vm438_vm7, %v519_v5  ;;  %v1258_v31 = vsel %vm763_vm9, 1.0, %v1462_v25 }
  0xf4   : > { %1362 = vmatpush3.bf16.msra.mxu0 %v1564_v60  ;;  %1365 = vmatprep.mubr.msk.bf16.mxu0 %vm438_vm7, %v603_v7  ;;  %v774_v40 = vpack.c.bf16 %v1259_v32, %v1258_v31 }
  0xf5   : > { %1370 = vmatpush3.bf16.msra.mxu1 %v1564_v60  ;;  %1373 = vmatprep.mubr.msk.bf16.mxu1 %vm438_vm7, %v688_v9 }
  0xf6   : > { %1363 = vmatprep.subr.bf16.mxu0 %v1562_v58  ;;  %1371 = vmatprep.subr.bf16.mxu1 %v1562_v58 }
  0xf8   : > { %1364 = vmatpush3.bf16.msra.mxu0 %v1562_v58 }
  0xf9   : > { %1372 = vmatpush3.bf16.msra.mxu1 %v1562_v58  ;;  %1377 = vmatprep.subr.bf16.mxu0 %v1564_v60 }
  0xfa   : > { %1385 = vmatprep.subr.bf16.mxu1 %v1564_v60 }
  0xfb   : > { %1366 = vmatmul.mubr.msk.bf16.vlgmr.msra.gmra.mrb[8].mxu0 %vm438_vm7, %v604_v18 }
  0xfc   : > { %1374 = vmatmul.mubr.msk.bf16.vlgmr.msra.gmra.mrb[8].mxu1 %vm438_vm7, %v689_v21  ;;  %1378 = vmatpush3.bf16.msra.mxu0 %v1564_v60 }
  0xfd   : > { %1381 = vmatprep.mubr.msk.bf16.mxu0 %vm438_vm7, %v773_v24  ;;  %1386 = vmatpush3.bf16.msra.mxu1 %v1564_v60 }
  0xfe   : > { %1389 = vmatprep.mubr.msk.bf16.mxu1 %vm438_vm7, %v858_v28  ;;  %1379 = vmatprep.subr.bf16.mxu0 %v1562_v58 }
  0xff   : > { %1387 = vmatprep.subr.bf16.mxu1 %v1562_v58 }
 0x100   : > { %1380 = vmatpush3.bf16.msra.mxu0 %v1562_v58 }
 0x101   : > { %1388 = vmatpush3.bf16.msra.mxu1 %v1562_v58  ;;  %1393 = vmatprep.subr.bf16.mxu0 %v1564_v60 }
 0x102   : > { %1401 = vmatprep.subr.bf16.mxu1 %v1564_v60 }
 0x103   : > { %1382 = vmatmul.mubr.msk.bf16.vlgmr.msra.gmra.mrb[12].mxu0 %vm438_vm7, %v774_v40 }
 0x104   : > { %1390 = vmatmul.mubr.msk.bf16.vlgmr.msra.gmra.mrb[12].mxu1 %vm438_vm7, %v859_v43  ;;  %1394 = vmatpush3.bf16.msra.mxu0 %v1564_v60 }
 0x105   : > { %1397 = vmatprep.mubr.msk.bf16.mxu0 %vm438_vm7, %v943_v44  ;;  %1402 = vmatpush3.bf16.msra.mxu1 %v1564_v60 }
 0x106   : > { %1395 = vmatprep.subr.bf16.mxu0 %v1562_v58  ;;  %1403 = vmatprep.subr.bf16.mxu1 %v1562_v58 }
 0x107   : > { %1405 = vmatprep.mubr.msk.bf16.mxu1 %vm438_vm7, %v1028_v45 }
 0x108   : > { %1396 = vmatpush3.bf16.msra.mxu0 %v1562_v58 }
 0x109   : > { %1404 = vmatpush3.bf16.msra.mxu1 %v1562_v58 }
 0x10b   : > { %1398 = vmatmul.mubr.msk.bf16.vlgmr.msra.gmra.mrb[16].mxu0 %vm438_vm7, %v944_v22 }
 0x10c   : > { %1406 = vmatmul.mubr.msk.bf16.vlgmr.msra.gmra.mrb[16].mxu1 %vm438_vm7, %v1029_v50 }
 0x1c6   : > { %v1351_v51 = vpop.f32.mrb[4].mxu0  ;;  %v1359_v52 = vpop.f32.mrb[4].mxu1 }
 0x1c7   : > { %v577_v53 = vmax.f32 %v1351_v51, %v1359_v52  ;;  %v479_v54 = vpop.f32.mrb[5].mxu0  ;;  %v560_v55 = vpop.f32.mrb[5].mxu1  ;;  %v1281_v52 = vld [vmem:[%s1726_s5] ss:$0 sm:$0xff] }
 0x1c8   : > { %v575_v56 = vmax.f32 %v479_v54, %v560_v55  ;;  %v1352_v57 = vpop.f32.mrb[6].mxu0  ;;  %v1360_v25 = vpop.f32.mrb[6].mxu1 }
 0x1c9   : > { %v578_v59 = vmax.f32 %v1352_v57, %v1360_v25  ;;  %v482_v60 = vpop.f32.mrb[7].mxu0  ;;  %v563_v61 = vpop.f32.mrb[7].mxu1 }
 0x1ca   : > { %v576_v62 = vmax.f32 %v482_v60, %v563_v61 }
 0x1ce   : > { %v1367_v63 = vpop.f32.mrb[8].mxu0 }
 0x1cf   : > { %v662_v0 = vmax.f32 %v577_v53, %v1367_v63  ;;  %v1375_v58 = vpop.f32.mrb[8].mxu1  ;;  %v645_v1 = vpop.f32.mrb[9].mxu0 }
 0x1d0   : > { %v660_v2 = vmax.f32 %v575_v56, %v645_v1  ;;  %v730_v3 = vpop.f32.mrb[9].mxu1  ;;  %v1368_v4 = vpop.f32.mrb[10].mxu0 }
 0x1d1   : > { %v747_v5 = vmax.f32 %v662_v0, %v1375_v58  ;;  %v663_v6 = vmax.f32 %v578_v59, %v1368_v4  ;;  %v1376_v7 = vpop.f32.mrb[10].mxu1  ;;  %v648_v8 = vpop.f32.mrb[11].mxu0 }
 0x1d2   : > { %v745_v9 = vmax.f32 %v660_v2, %v730_v3  ;;  %v661_v10 = vmax.f32 %v576_v62, %v648_v8  ;;  %v733_v11 = vpop.f32.mrb[11].mxu1 }
 0x1d3   : > { %v748_v12 = vmax.f32 %v663_v6, %v1376_v7 }
 0x1d4   : > { %v746_v13 = vmax.f32 %v661_v10, %v733_v11 }
 0x1d6   : > { %v1383_v14 = vpop.f32.mrb[12].mxu0 }
 0x1d7   : > { %v832_v15 = vmax.f32 %v747_v5, %v1383_v14  ;;  %v1391_v16 = vpop.f32.mrb[12].mxu1  ;;  %v815_v17 = vpop.f32.mrb[13].mxu0 }
 0x1d8   : > { %v830_v18 = vmax.f32 %v745_v9, %v815_v17  ;;  %v900_v19 = vpop.f32.mrb[13].mxu1  ;;  %v1384_v20 = vpop.f32.mrb[14].mxu0 }
 0x1d9   : > { %v917_v21 = vmax.f32 %v832_v15, %v1391_v16  ;;  %v833_v23 = vmax.f32 %v748_v12, %v1384_v20  ;;  %v1392_v24 = vpop.f32.mrb[14].mxu1  ;;  %v818_v26 = vpop.f32.mrb[15].mxu0 }
 0x1da   : > { %v915_v28 = vmax.f32 %v830_v18, %v900_v19  ;;  %v831_v31 = vmax.f32 %v746_v13, %v818_v26  ;;  %v903_v32 = vpop.f32.mrb[15].mxu1 }
 0x1db   : > { %v918_v34 = vmax.f32 %v833_v23, %v1392_v24 }
 0x1dc   : > { %v916_v35 = vmax.f32 %v831_v31, %v903_v32 }
 0x1de   : > { %v1399_v36 = vpop.f32.mrb[16].mxu0 }
 0x1df   : > { %v1002_v37 = vmax.f32 %v917_v21, %v1399_v36  ;;  %v1407_v38 = vpop.f32.mrb[16].mxu1  ;;  %v985_v39 = vpop.f32.mrb[17].mxu0 }
 0x1e0   : > { %v1000_v40 = vmax.f32 %v915_v28, %v985_v39  ;;  %v1070_v41 = vpop.f32.mrb[17].mxu1  ;;  %v1400_v42 = vpop.f32.mrb[18].mxu0 }
 0x1e1   : > { %v1087_v43 = vmax.f32 %v1002_v37, %v1407_v38  ;;  %v1003_v44 = vmax.f32 %v918_v34, %v1400_v42  ;;  %v1408_v45 = vpop.f32.mrb[18].mxu1  ;;  %v988_v46 = vpop.f32.mrb[19].mxu0 }
 0x1e2   : > { %v1085_v48 = vmax.f32 %v1000_v40, %v1070_v41  ;;  %v1001_v49 = vmax.f32 %v916_v35, %v988_v46  ;;  %v1073_v22 = vpop.f32.mrb[19].mxu1 }
 0x1e3   : > { %v1091_v50 = vadd.f32 %v1634_v27, %v1087_v43  ;;  %v1088_v51 = vmax.f32 %v1003_v44, %v1408_v45 }
 0x1e4   : > { %v1089_v53 = vadd.f32 %v1085_v48, %v1641_v29  ;;  %v1086_v54 = vmax.f32 %v1001_v49, %v1073_v22 }
 0x1e5   : > { %v1102_v55 = vmul.f32 %v1280_v47, %v1091_v50  ;;  %v1092_v56 = vadd.f32 %v1649_v30, %v1088_v51 }
 0x1e6   : > { %v1100_v57 = vmul.f32 %v1280_v47, %v1089_v53  ;;  %v1090_v25 = vadd.f32 %v1086_v54, %v1661_v33 }
 0x1e7   : > { %v1113_v59 = vadd.f32 %v1281_v52, %v1102_v55  ;;  %v1103_v60 = vmul.f32 %v1280_v47, %v1092_v56 }
 0x1e8   : > { %v1111_v61 = vadd.f32 %v1281_v52, %v1100_v57  ;;  %v1101_v62 = vmul.f32 %v1280_v47, %v1090_v25 }
 0x1e9   : > { %vm1117_vm7 = vcmp.gt.f32.partialorder %v1113_v59, 0.0  ;;  %v1121_v27 = vmul.f32 0.2, %v1113_v59  ;;  %v1114_v63 = vadd.f32 %v1281_v52, %v1103_v60 }
 0x1ea   : > { %vm1115_vm5 = vcmp.gt.f32.partialorder %v1111_v61, 0.0  ;;  %v1119_v0 = vmul.f32 0.2, %v1111_v61  ;;  %v1112_v58 = vadd.f32 %v1281_v52, %v1101_v62 }
 0x1eb   : > { %v1125_v29 = vsel %vm1117_vm7, %v1113_v59, %v1121_v27  ;;  %vm1118_vm8 = vcmp.gt.f32.partialorder %v1114_v63, 0.0  ;;  %v1122_v30 = vmul.f32 0.2, %v1114_v63 }
 0x1ec   : > { %v1293_v33 = vpack.c.bf16 %v1125_v29, %v1125_v29  ;;  %v1123_v1 = vsel %vm1115_vm5, %v1111_v61, %v1119_v0  ;;  %vm1116_vm9 = vcmp.gt.f32.partialorder %v1112_v58, 0.0  ;;  %v1120_v2 = vmul.f32 0.2, %v1112_v58 }
 0x1ed   : > { %v1291_v3 = vpack.c.bf16 %v1123_v1, %v1123_v1  ;;  %v1126_v4 = vsel %vm1118_vm8, %v1114_v63, %v1122_v30 }
 0x1ee   : > { %1146 = vst.msk [vmem:[%s271_s17 + $0x8] sm:$0xf] %vm1143_vm6, %v1293_v33  ;;  %v1294_v5 = vpack.c.bf16 %v1126_v4, %v1126_v4  ;;  %v1124_v6 = vsel %vm1116_vm9, %v1112_v58, %v1120_v2 }
 0x1ef   : > { %1144 = vst.msk [vmem:[%s271_s17] sm:$0xf] %vm1143_vm6, %v1291_v3  ;;  %v1292_v7 = vpack.c.bf16 %v1124_v6, %v1124_v6 }
 0x1f0   : > { %1147 = vst.msk [vmem:[%s271_s17 + $0xc] sm:$0xf] %vm1143_vm6, %v1294_v5 }
 0x1f1   : > { %1145 = vst.msk [vmem:[%s271_s17 + $0x4] sm:$0xf] %vm1143_vm6, %v1292_v7 }
 0x1f2 PF: > { %s16_s21 = sadd.s32 1, %s1451_s21  }
 0x1f3   : > { %p13_p4 = scmp.ge.s32.totalorder %s16_s21, 4  }
 0x1f5   :  { %15 = sbr.rel (!%p13_p4) target bundleno = 1 (0x1), region = 77 }

// kernel: dgcnn_forward.11
= control target key start
LH: loop header
LB: loop body
LE: loop exit
PB: predicated region body
PF: predicated region fallthrough
CT: control target
= control target key end

     0   :  { %s374_s6 = smov 0   ;;  %s405_s0 = inlined_call_operand.vmem [shape: bf16[2,32,64], index: 0, kind: input, shape index: {}]   ;;  %s406_s1 = inlined_call_operand.vmem [shape: f32[2,32,32], index: 1, kind: output, shape index: {}]  }
   0x1 LB: > { %s312_s7 = sadd.s32 4294967295, %s362_s6   ;;  %p316_p0 = scmp.ge.s32.totalorder %s362_s6, 1  ;;  %s362_s6 = sphi %s374_s6, %s11_s6  }
   0x2   : > { %p87_p1 = scmp.lt.s32.totalorder %s362_s6, 3 }
   0x4   : > { %p88_p2 = pnand %p316_p0, %p87_p1 }
   0x5   : > { %p107_p3 = scmp.lt.s32.totalorder (!%p88_p2), %s312_s7, 1  ;;  %vm132_vm0 = vcmask (!%p88_p2), 523264   ;;  %v244_v24 = vlaneseq (!%p88_p2)  ;;  %vm252_vm1 = vcmask (!%p88_p2), 261120  }
   0x6   : > { %91 = sbr.rel (%p88_p2) target bundleno = 299 (0x12b), region = 24 }
   0x7   : > { %v245_v25 = vshrl.u32 (!%p88_p2), %v244_v24, 7 }
   0x9   : > { %v246_v26 = vsub.s32 (!%p88_p2), 0, %v245_v25 }
   0xd   : > { %s408_s7 = smov (!%p107_p3, %s312_s7), 1 }
   0xe   : > { %s327_s8 = sshll.u32 %s408_s7, 4  ;;  %s328_s12 = sshll.u32 %s408_s7, 5 }
   0xf   : > { %s111_s11 = scalar_lea.vmem %s405_s0, %s327_s8  ;;  %s116_s15 = scalar_lea.vmem %s406_s1, %s328_s12 }
  0x10   : > { %v118_v0 = vld [vmem:[%s111_s11] sm:$0xff]   ;;  %v120_v1 = vld [vmem:[%s111_s11 + $0x8] sm:$0xff]  }
  0x11   : > { %v188_v2 = vunpack.c.l.bf16 %v118_v0  ;;  %v189_v3 = vunpack.c.h.bf16 %v118_v0  ;;  %v190_v4 = vunpack.c.l.bf16 %v120_v1  ;;  %v191_v5 = vunpack.c.h.bf16 %v120_v1  ;;  %341 = vmatprep.subr.msk.bf16.mxu0 %vm132_vm0, %v118_v0  ;;  %337 = vmatprep.mubr.msk.bf16.mxu0 %vm132_vm0, %v118_v0 }
  0x12   : > { %v134_v10 = vsel %vm132_vm0, %v118_v0, 0  ;;  %v137_v15 = vsel %vm132_vm0, %v120_v1, 0 }
  0x13   : > { %v192_v6 = vmul.f32 %v188_v2, %v188_v2  ;;  %v193_v7 = vmul.f32 %v189_v3, %v189_v3  ;;  %v194_v8 = vmul.f32 %v190_v4, %v190_v4  ;;  %v195_v9 = vmul.f32 %v191_v5, %v191_v5  ;;  %334 = vmatpush3.bf16.xpose.msra.mxu0 %v134_v10 }
  0x14   : > { %342 = vmatprep.subr.msk.bf16.mxu0 %vm132_vm0, %v120_v1 }
  0x15   : > { %v196_v11 = vsel %vm132_vm0, %v192_v6, 0.0  ;;  %v202_v12 = vsel %vm132_vm0, %v194_v8, 0.0  ;;  %v199_v13 = vsel %vm132_vm0, %v193_v7, 0.0  ;;  %v205_v14 = vsel %vm132_vm0, %v195_v9, 0.0 }
  0x16   : > { %197 = vadd.xlane.f32.xlu0 %v196_v11  ;;  %203 = vadd.xlane.f32.xlu1 %v202_v12 }
  0x1a   : > { %200 = vadd.xlane.f32.xlu0 %v199_v13  ;;  %206 = vadd.xlane.f32.xlu1 %v205_v14 }
  0x1b   : > { %336 = vmatpush3.bf16.xpose.msra.mxu0 %v137_v15 }
  0x22   : > { %338 = vmatmul.mubr.msk.bf16.vlgmr.msra.gmra.mrb[0].mxu0 %vm132_vm0, %v120_v1 }
  0xa3   : > { %v198_v16 = vpop.xlane.xlu0 %197  ;;  %v204_v18 = vpop.xlane.xlu1 %203 }
  0xa4   : > { %212 = vxpose.xlu0.b32.start [1/4] (short) (narrow) %v198_v16, 8 }
  0xa7   : > { %v201_v17 = vpop.xlane.xlu0 %200  ;;  %v207_v19 = vpop.xlane.xlu1 %206 }
  0xa8   : > { %213 = vxpose.xlu0.b32.cont [2/4] (short) (narrow) %v201_v17, 8 }
  0xac   : > { %214 = vxpose.xlu0.b32.cont [3/4] (short) (narrow) %v204_v18, 8 }
  0xb0   : > { %215 = vxpose.xlu0.b32.end [4/4] (short) (narrow) %v207_v19, 8 }
  0xf5   : > { %v339_v20 = vpop.f32.mrb[0].mxu0 }
  0xf6   : > { %v173_v21 = vpop.f32.mrb[1].mxu0  ;;  %v210_v27 = vmul.f32 2.0, %v339_v20 }
  0xf7   : > { %v340_v22 = vpop.f32.mrb[2].mxu0  ;;  %v208_v29 = vmul.f32 2.0, %v173_v21 }
  0xf8   : > { %v176_v23 = vpop.f32.mrb[3].mxu0  ;;  %v211_v30 = vmul.f32 2.0, %v340_v22 }
  0xf9   : > { %v209_v31 = vmul.f32 2.0, %v176_v23 }
 0x124   : > { %v228_v28 = vpop.trf.xlu0 }
 0x125   : > { %v247_v32 = vrot.slane %v228_v28, %v246_v26 }
 0x127   : > { %v248_v33 = vsub.f32 %v208_v29, %v247_v32  ;;  %v249_v34 = vsub.f32 %v209_v31, %v247_v32  ;;  %v250_v35 = vsub.f32 %v210_v27, %v247_v32  ;;  %v251_v36 = vsub.f32 %v211_v30, %v247_v32 }
 0x129   : > { %253 = vst.msk [vmem:[%s116_s15] sm:$0xff] %vm252_vm1, %v248_v33  ;;  %254 = vst.msk [vmem:[%s116_s15 + $0x8] sm:$0xff] %vm252_vm1, %v249_v34 }
 0x12a   : > { %255 = vst.msk [vmem:[%s116_s15 + $0x10] sm:$0xff] %vm252_vm1, %v250_v35  ;;  %256 = vst.msk [vmem:[%s116_s15 + $0x18] sm:$0xff] %vm252_vm1, %v251_v36 }
 0x12b PF: > { %s11_s6 = sadd.s32 1, %s362_s6  }
 0x12c   : > { %p8_p4 = scmp.ge.s32.totalorder %s11_s6, 4  }
 0x12e   :  { %10 = sbr.rel (!%p8_p4) target bundleno = 1 (0x1), region = 54 }

// kernel: dgcnn_forward.14
= control target key start
LH: loop header
LB: loop body
LE: loop exit
PB: predicated region body
PF: predicated region fallthrough
CT: control target
= control target key end

     0   :  { %s1592_s21 = smov 0   ;;  %s1884_s0 = inlined_call_operand.vmem [shape: s32[2,32,8], index: 0, kind: input, shape index: {}]   ;;  %s1885_s1 = inlined_call_operand.vmem [shape: bf16[2,32,64], index: 1, kind: input, shape index: {}]   ;;  %s1886_s2 = inlined_call_operand.vmem [shape: bf16[64,128], index: 2, kind: input, shape index: {}]   ;;  %s1887_s3 = inlined_call_operand.vmem [shape: bf16[64,128], index: 3, kind: input, shape index: {}]   ;;  %s1888_s4 = inlined_call_operand.vmem [shape: f32[1,128], index: 4, kind: input, shape index: {}]   ;;  %s1889_s5 = inlined_call_operand.vmem [shape: f32[1,128], index: 5, kind: input, shape index: {}]   ;;  %s1890_s6 = inlined_call_operand.vmem [shape: bf16[2,32,128], index: 6, kind: output, shape index: {}]  }
   0x1 LB: > { %s1266_s22 = sadd.s32 4294967295, %s1546_s21   ;;  %p1270_p0 = scmp.ge.s32.totalorder %s1546_s21, 1  ;;  %s1546_s21 = sphi %s1592_s21, %s16_s21  }
   0x2   : > { %p222_p1 = scmp.lt.s32.totalorder %s1546_s21, 3 }
   0x4   : > { %p223_p2 = pnand %p1270_p0, %p222_p1 }
   0x5   : > { %v1530_v0 = vld [vmem:[%s1886_s2] sm:$0xff] (!%p223_p2)   ;;  %p257_p3 = scmp.lt.s32.totalorder (!%p223_p2), %s1266_s22, 1  ;;  %v1531_v1 = vld [vmem:[%s1886_s2 + $0x8] sm:$0xff] (!%p223_p2)   ;;  %v1532_v2 = vld [vmem:[%s1886_s2 + $0x10] sm:$0xff] (!%p223_p2)   ;;  %v1548_v3 = vmov (!%p223_p2), 0   ;;  %vm319_vm0 = vcmask (!%p223_p2), 523264   ;;  %v462_v22 = vlaneseq (!%p223_p2) }
   0x6   : > { %226 = sbr.rel (%p223_p2) target bundleno = 502 (0x1f6), region = 44  ;;  %1409 = vmatprep.subr.bf16.mxu0 (!%p223_p2), %v1530_v0  ;;  %1515 = vset.pattern.permute.xlu1 (!%p223_p2), %v1548_v3  ;;  %v1533_v5 = vld [vmem:[%s1886_s2 + $0x18] sm:$0xff] (!%p223_p2)   ;;  %v1536_v10 = vld [vmem:[%s1887_s3] sm:$0xff] (!%p223_p2)   ;;  %v1537_v12 = vld [vmem:[%s1887_s3 + $0x8] sm:$0xff] (!%p223_p2)   ;;  %v1549_v13 = vmov (!%p223_p2), 1   ;;  %v1550_v16 = vmov (!%p223_p2), 2  }
   0x7   : > { %1410 = vmatpush3.bf16.msra.mxu0 (!%p223_p2), %v1530_v0  ;;  %1514 = vset.pattern.permute.xlu0 (!%p223_p2), %v1548_v3  ;;  %v1538_v14 = vld [vmem:[%s1887_s3 + $0x10] sm:$0xff] (!%p223_p2)   ;;  %v1539_v15 = vld [vmem:[%s1887_s3 + $0x18] sm:$0xff] (!%p223_p2)   ;;  %v1551_v17 = vmov (!%p223_p2), 3   ;;  %v1552_v18 = vmov (!%p223_p2), 4   ;;  %v1553_v19 = vmov (!%p223_p2), 5   ;;  %v1554_v20 = vmov (!%p223_p2), 6  }
   0x8   : > { %1411 = vmatprep.subr.bf16.mxu0 (!%p223_p2), %v1531_v1  ;;  %1421 = vmatprep.subr.bf16.mxu1 (!%p223_p2), %v1536_v10  ;;  %v1555_v21 = vmov (!%p223_p2), 7   ;;  %v1680_v23 = vand.u32 (!%p223_p2), 127, %v462_v22  ;;  %v1556_v26 = vmov (!%p223_p2), 0.0   ;;  %vm490_vm5 = vcmask (!%p223_p2), 261120  }
   0x9   : > { %1422 = vmatpush3.bf16.msra.mxu1 (!%p223_p2), %v1536_v10 }
   0xa   : > { %1423 = vmatprep.subr.bf16.mxu1 (!%p223_p2), %v1537_v12 }
   0xb   : > { %1412 = vmatpush3.bf16.msra.mxu0 (!%p223_p2), %v1531_v1 }
   0xc   : > { %1413 = vmatprep.subr.bf16.mxu0 (!%p223_p2), %v1532_v2 }
   0xd   : > { %s1892_s22 = smov (!%p257_p3, %s1266_s22), 1  ;;  %1424 = vmatpush3.bf16.msra.mxu1 %v1537_v12 }
   0xe   : > { %s1347_s29 = sshll.u32 %s1892_s22, 5  ;;  %s1348_s30 = sshll.u32 %s1892_s22, 4  ;;  %1425 = vmatprep.subr.bf16.mxu1 %v1538_v14 }
   0xf   : > { %s261_s9 = scalar_lea.vmem %s1884_s0, %s1347_s29  ;;  %s266_s12 = scalar_lea.vmem %s1885_s1, %s1348_s30  ;;  %1414 = vmatpush3.bf16.msra.mxu0 %v1532_v2 }
  0x10   : > { %v1534_v4 = vld [vmem:[%s266_s12] sm:$0xff]   ;;  %v1625_v6 = vld [vmem:[%s261_s9 + $0x10] sm:$0xff]  ;;  %v1627_v7 = vld [vmem:[%s261_s9 + $0x18] sm:$0xff]  ;;  %1415 = vmatprep.subr.bf16.mxu0 %v1533_v5  ;;  %s271_s8 = scalar_lea.vmem %s1890_s6, %s1348_s30 }
  0x11   : > { %1417 = vmatprep.mubr.msk.bf16.mxu0 %vm319_vm0, %v1534_v4  ;;  %v1629_v8 = vld [vmem:[%s261_s9] sm:$0xff]  ;;  %471 = vperm.xlu1 %1515, %v1625_v6   ;;  %v1633_v9 = vld [vmem:[%s261_s9 + $0x8] sm:$0xff] }
  0x12   : > { %465 = vperm.xlu0 %1514, %v1629_v8   ;;  %1429 = vmatprep.mubr.msk.bf16.mxu1 %vm319_vm0, %v1534_v4  ;;  %v1535_v11 = vld [vmem:[%s266_s12 + $0x8] sm:$0xff]  }
  0x13   : > { %1416 = vmatpush3.bf16.msra.mxu0 %v1533_v5  ;;  %1426 = vmatpush3.bf16.msra.mxu1 %v1538_v14 }
  0x14   : > { %1427 = vmatprep.subr.bf16.mxu1 %v1539_v15 }
  0x15   : > { %474 = vperm.xlu1 %1515, %v1627_v7  }
  0x16   : > { %468 = vperm.xlu0 %1514, %v1633_v9   ;;  %1418 = vmatmul.mubr.msk.bf16.vlgmr.msra.gmra.mrb[0].mxu0 %vm319_vm0, %v1535_v11 }
  0x17   : > { %1428 = vmatpush3.bf16.msra.mxu1 %v1539_v15 }
  0x19   : > { %1517 = vset.pattern.permute.xlu1 %v1549_v13 }
  0x1a   : > { %1516 = vset.pattern.permute.xlu0 %v1549_v13  ;;  %550 = vperm.xlu1 %1517, %v1633_v9  }
  0x1b   : > { %547 = vperm.xlu0 %1516, %v1629_v8   ;;  %1430 = vmatmul.mubr.msk.bf16.vlgmr.msra.gmra.mrb[0].mxu1 %vm319_vm0, %v1535_v11 }
  0x1e   : > { %553 = vperm.xlu1 %1517, %v1625_v6  }
  0x1f   : > { %556 = vperm.xlu0 %1516, %v1627_v7  }
  0x22   : > { %1518 = vset.pattern.permute.xlu1 %v1550_v16 }
  0x23   : > { %632 = vperm.xlu1 %1518, %v1629_v8   ;;  %1519 = vset.pattern.permute.xlu0 %v1550_v16 }
  0x24   : > { %635 = vperm.xlu0 %1519, %v1633_v9  }
  0x27   : > { %638 = vperm.xlu1 %1518, %v1625_v6  }
  0x28   : > { %1520 = vset.pattern.permute.xlu0 %v1551_v17 }
  0x29   : > { %717 = vperm.xlu0 %1520, %v1629_v8  }
  0x2b   : > { %641 = vperm.xlu1 %1518, %v1627_v7  }
  0x2d   : > { %726 = vperm.xlu0 %1520, %v1627_v7  }
  0x2f   : > { %1521 = vset.pattern.permute.xlu1 %v1551_v17 }
  0x30   : > { %720 = vperm.xlu1 %1521, %v1633_v9  }
  0x31   : > { %1523 = vset.pattern.permute.xlu0 %v1552_v18 }
  0x32   : > { %805 = vperm.xlu0 %1523, %v1633_v9  }
  0x34   : > { %723 = vperm.xlu1 %1521, %v1625_v6  }
  0x36   : > { %1524 = vset.pattern.permute.xlu0 %v1553_v19 }
  0x37   : > { %887 = vperm.xlu0 %1524, %v1629_v8  }
  0x38   : > { %1522 = vset.pattern.permute.xlu1 %v1552_v18 }
  0x39   : > { %802 = vperm.xlu1 %1522, %v1629_v8  }
  0x3b   : > { %896 = vperm.xlu0 %1524, %v1627_v7  }
  0x3d   : > { %808 = vperm.xlu1 %1522, %v1625_v6  }
  0x3f   : > { %1527 = vset.pattern.permute.xlu0 %v1554_v20 }
  0x40   : > { %975 = vperm.xlu0 %1527, %v1633_v9  }
  0x41   : > { %811 = vperm.xlu1 %1522, %v1627_v7  }
  0x44   : > { %1528 = vset.pattern.permute.xlu0 %v1555_v21 }
  0x45   : > { %1525 = vset.pattern.permute.xlu1 %v1553_v19  ;;  %1057 = vperm.xlu0 %1528, %v1629_v8  }
  0x46   : > { %890 = vperm.xlu1 %1525, %v1633_v9  }
  0x49   : > { %1066 = vperm.xlu0 %1528, %v1627_v7  }
  0x4a   : > { %893 = vperm.xlu1 %1525, %v1625_v6  }
  0x4e   : > { %1526 = vset.pattern.permute.xlu1 %v1554_v20 }
  0x4f   : > { %972 = vperm.xlu1 %1526, %v1629_v8  }
  0x53   : > { %978 = vperm.xlu1 %1526, %v1625_v6  }
  0x57   : > { %981 = vperm.xlu1 %1526, %v1627_v7  }
  0x5b   : > { %1529 = vset.pattern.permute.xlu1 %v1555_v21 }
  0x5c   : > { %1060 = vperm.xlu1 %1529, %v1633_v9  }
  0x60   : > { %1063 = vperm.xlu1 %1529, %v1625_v6  }
  0x90   : > { %v472_v24 = vpop.permute.xlu1 %471 }
  0x91   : > { %v466_v25 = vpop.permute.xlu0 %465  ;;  %vm478_vm1 = vcmp.eq.s32.totalorder %v472_v24, %v1680_v23 }
  0x92   : > { %vm476_vm2 = vcmp.eq.s32.totalorder %v466_v25, %v1680_v23  ;;  %v1685_v27 = vsel %vm478_vm1, 1.0, %v1556_v26 }
  0x93   : > { %v1291_v28 = vsel %vm476_vm2, 1.0, %v1556_v26 }
  0x94   : > { %v475_v29 = vpop.permute.xlu1 %474 }
  0x95   : > { %v469_v30 = vpop.permute.xlu0 %468  ;;  %vm479_vm3 = vcmp.eq.s32.totalorder %v475_v29, %v1680_v23 }
  0x96   : > { %vm477_vm4 = vcmp.eq.s32.totalorder %v469_v30, %v1680_v23  ;;  %v1691_v31 = vsel %vm479_vm3, 1.0, %v1556_v26 }
  0x97   : > { %v1292_v32 = vsel %vm477_vm4, 1.0, %v1556_v26  ;;  %v489_v33 = vpack.c.bf16 %v1691_v31, %v1685_v27 }
  0x98   : > { %v488_v34 = vpack.c.bf16 %v1292_v32, %v1291_v28 }
  0x99   : > { %v551_v35 = vpop.permute.xlu1 %550 }
  0x9a   : > { %1437 = vmatprep.mubr.msk.bf16.mxu0 %vm490_vm5, %v488_v34  ;;  %vm559_vm6 = vcmp.eq.s32.totalorder %v551_v35, %v1680_v23  ;;  %v548_v36 = vpop.permute.xlu0 %547 }
  0x9b   : > { %v1298_v37 = vsel %vm559_vm6, 1.0, %v1556_v26  ;;  %vm558_vm7 = vcmp.eq.s32.totalorder %v548_v36, %v1680_v23 }
  0x9c   : > { %v1297_v38 = vsel %vm558_vm7, 1.0, %v1556_v26 }
  0x9d   : > { %v570_v39 = vpack.c.bf16 %v1298_v37, %v1297_v38  ;;  %v554_v40 = vpop.permute.xlu1 %553 }
  0x9e   : > { %v557_v48 = vpop.permute.xlu0 %556  ;;  %vm560_vm8 = vcmp.eq.s32.totalorder %v554_v40, %v1680_v23 }
  0x9f   : > { %1445 = vmatprep.mubr.msk.bf16.mxu1 %vm490_vm5, %v570_v39  ;;  %vm561_vm9 = vcmp.eq.s32.totalorder %v557_v48, %v1680_v23  ;;  %v1299_v0 = vsel %vm560_vm8, 1.0, %v1556_v26 }
  0xa0   : > { %v1300_v1 = vsel %vm561_vm9, 1.0, %v1556_v26 }
  0xa1   : > { %v571_v6 = vpack.c.bf16 %v1300_v1, %v1299_v0 }
  0xa2   : > { %v633_v41 = vpop.permute.xlu1 %632 }
  0xa3   : > { %v636_v49 = vpop.permute.xlu0 %635  ;;  %vm643_vm10 = vcmp.eq.s32.totalorder %v633_v41, %v1680_v23 }
  0xa4   : > { %vm644_vm11 = vcmp.eq.s32.totalorder %v636_v49, %v1680_v23  ;;  %v1303_v2 = vsel %vm643_vm10, 1.0, %v1556_v26 }
  0xa5   : > { %v1304_v3 = vsel %vm644_vm11, 1.0, %v1556_v26 }
  0xa6   : > { %v1702_v42 = vpop.permute.xlu1 %638  ;;  %v655_v8 = vpack.c.bf16 %v1304_v3, %v1303_v2 }
  0xa7   : > { %vm645_vm14 = vcmp.eq.s32.totalorder %v1702_v42, %v1680_v23 }
  0xa8   : > { %v718_v51 = vpop.permute.xlu0 %717  ;;  %v1305_v15 = vsel %vm645_vm14, 1.0, %v1556_v26 }
  0xa9   : > { %vm728_vm13 = vcmp.eq.s32.totalorder %v718_v51, %v1680_v23 }
  0xaa   : > { %v1704_v43 = vpop.permute.xlu1 %641  ;;  %v1309_v5 = vsel %vm728_vm13, 1.0, %v1556_v26 }
  0xab   : > { %vm646_vm15 = vcmp.eq.s32.totalorder %v1704_v43, %v1680_v23 }
  0xac   : > { %v727_v53 = vpop.permute.xlu0 %726  ;;  %v1306_v16 = vsel %vm646_vm15, 1.0, %v1556_v26 }
  0xad   : > { %vm731_vm1 = vcmp.eq.s32.totalorder %v727_v53, %v1680_v23  ;;  %v656_v24 = vpack.c.bf16 %v1306_v16, %v1305_v15 }
  0xae   : > { %v1312_v18 = vsel %vm731_vm1, 1.0, %v1556_v26 }
  0xaf   : > { %v721_v44 = vpop.permute.xlu1 %720 }
  0xb0   : > { %vm729_vm12 = vcmp.eq.s32.totalorder %v721_v44, %v1680_v23 }
  0xb1   : > { %v806_v60 = vpop.permute.xlu0 %805  ;;  %v1310_v4 = vsel %vm729_vm12, 1.0, %v1556_v26 }
  0xb2   : > { %v740_v10 = vpack.c.bf16 %v1310_v4, %v1309_v5  ;;  %vm814_vm3 = vcmp.eq.s32.totalorder %v806_v60, %v1680_v23 }
  0xb3   : > { %v1706_v45 = vpop.permute.xlu1 %723  ;;  %v1316_v22 = vsel %vm814_vm3, 1.0, %v1556_v26 }
  0xb4   : > { %vm730_vm0 = vcmp.eq.s32.totalorder %v1706_v45, %v1680_v23 }
  0xb5   : > { %v1311_v17 = vsel %vm730_vm0, 1.0, %v1556_v26 }
  0xb6   : > { %v888_v63 = vpop.permute.xlu0 %887  ;;  %v741_v28 = vpack.c.bf16 %v1312_v18, %v1311_v17 }
  0xb7   : > { %vm898_vm6 = vcmp.eq.s32.totalorder %v888_v63, %v1680_v23 }
  0xb8   : > { %v1708_v46 = vpop.permute.xlu1 %802  ;;  %v1321_v27 = vsel %vm898_vm6, 1.0, %v1556_v26 }
  0xb9   : > { %vm813_vm2 = vcmp.eq.s32.totalorder %v1708_v46, %v1680_v23 }
  0xba   : > { %v897_v11 = vpop.permute.xlu0 %896  ;;  %v1315_v21 = vsel %vm813_vm2, 1.0, %v1556_v26 }
  0xbb   : > { %v825_v29 = vpack.c.bf16 %v1316_v22, %v1315_v21  ;;  %vm901_vm9 = vcmp.eq.s32.totalorder %v897_v11, %v1680_v23 }
  0xbc   : > { %v1710_v47 = vpop.permute.xlu1 %808  ;;  %v1324_v36 = vsel %vm901_vm9, 1.0, %v1556_v26 }
  0xbd   : > { %vm815_vm7 = vcmp.eq.s32.totalorder %v1710_v47, %v1680_v23 }
  0xbf   : > { %v976_v20 = vpop.permute.xlu0 %975 }
  0xc0   : > { %v1712_v50 = vpop.permute.xlu1 %811  ;;  %vm984_vm11 = vcmp.eq.s32.totalorder %v976_v20, %v1680_v23 }
  0xc1   : > { %vm816_vm8 = vcmp.eq.s32.totalorder %v1712_v50, %v1680_v23  ;;  %v1328_v38 = vsel %vm984_vm11, 1.0, %v1556_v26 }
  0xc2   : > { %v1318_v34 = vsel %vm816_vm8, 1.0, %v1556_v26 }
  0xc4   : > { %v1058_v31 = vpop.permute.xlu0 %1057 }
  0xc5   : > { %v1714_v52 = vpop.permute.xlu1 %890  ;;  %vm1068_vm14 = vcmp.eq.s32.totalorder %v1058_v31, %v1680_v23 }
  0xc6   : > { %vm899_vm4 = vcmp.eq.s32.totalorder %v1714_v52, %v1680_v23  ;;  %v1333_v40 = vsel %vm1068_vm14, 1.0, %v1556_v26 }
  0xc7   : > { %v1322_v25 = vsel %vm899_vm4, 1.0, %v1556_v26 }
  0xc8   : > { %v910_v32 = vpack.c.bf16 %v1322_v25, %v1321_v27  ;;  %v1067_v43 = vpop.permute.xlu0 %1066 }
  0xc9   : > { %v1716_v55 = vpop.permute.xlu1 %893  ;;  %vm1071_vm2 = vcmp.eq.s32.totalorder %v1067_v43, %v1680_v23 }
  0xca   : > { %vm900_vm10 = vcmp.eq.s32.totalorder %v1716_v55, %v1680_v23  ;;  %v1336_v50 = vsel %vm1071_vm2, 1.0, %v1556_v26 }
  0xcb   : > { %v1323_v35 = vsel %vm900_vm10, 1.0, %v1556_v26 }
  0xcc   : > { %v911_v44 = vpack.c.bf16 %v1324_v36, %v1323_v35 }
  0xce   : > { %v1726_v62 = vpop.permute.xlu1 %972 }
  0xcf   : > { %vm983_vm12 = vcmp.eq.s32.totalorder %v1726_v62, %v1680_v23 }
  0xd0   : > { %v1327_v37 = vsel %vm983_vm12, 1.0, %v1556_v26 }
  0xd1   : > { %v995_v45 = vpack.c.bf16 %v1328_v38, %v1327_v37 }
  0xd2   : > { %v1746_v7 = vpop.permute.xlu1 %978 }
  0xd3   : > { %vm985_vm15 = vcmp.eq.s32.totalorder %v1746_v7, %v1680_v23 }
  0xd4   : > { %v1329_v47 = vsel %vm985_vm15, 1.0, %v1556_v26 }
  0xd6   : > { %v982_v19 = vpop.permute.xlu1 %981 }
  0xd7   : > { %vm986_vm0 = vcmp.eq.s32.totalorder %v982_v19, %v1680_v23 }
  0xd8   : > { %v1330_v48 = vsel %vm986_vm0, 1.0, %v1556_v26 }
  0xdb   : > { %v1061_v30 = vpop.permute.xlu1 %1060 }
  0xdc   : > { %vm1069_vm13 = vcmp.eq.s32.totalorder %v1061_v30, %v1680_v23 }
  0xdd   : > { %v1334_v39 = vsel %vm1069_vm13, 1.0, %v1556_v26 }
  0xde   : > { %v1080_v46 = vpack.c.bf16 %v1334_v39, %v1333_v40 }
  0xdf   : > { %v1064_v42 = vpop.permute.xlu1 %1063 }
  0xe0   : > { %vm1070_vm1 = vcmp.eq.s32.totalorder %v1064_v42, %v1680_v23  ;;  %v996_v23 = vpack.c.bf16 %v1330_v48, %v1329_v47  ;;  %v1339_v48 = vld [vmem:[%s1888_s4] ss:$0 sm:$0xff] }
  0xe1   : > { %v1335_v49 = vsel %vm1070_vm1, 1.0, %v1556_v26 }
  0xe2   : > { %v1081_v51 = vpack.c.bf16 %v1336_v50, %v1335_v49 }
  0xe9   : > { %v1419_v54 = vpop.f32.mrb[0].mxu0 }
  0xea   : > { %v360_v56 = vpop.f32.mrb[1].mxu0 }
  0xeb   : > { %v1420_v57 = vpop.f32.mrb[2].mxu0 }
  0xec   : > { %v1718_v58 = vpack.c.bf16 %v1420_v57, %v1419_v54  ;;  %v363_v59 = vpop.f32.mrb[3].mxu0 }
  0xed   : > { %v1720_v61 = vpack.c.bf16 %v363_v59, %v360_v56 }
  0xee   : > { %v1748_v9 = vpop.f32.mrb[0].mxu1 }
  0xef   : > { %1433 = vmatprep.subr.bf16.mxu0 %v1720_v61  ;;  %1441 = vmatprep.subr.bf16.mxu1 %v1720_v61  ;;  %v1759_v12 = vpop.f32.mrb[1].mxu1 }
  0xf0   : > { %1434 = vmatpush3.bf16.msra.mxu0 %v1720_v61  ;;  %1442 = vmatpush3.bf16.msra.mxu1 %v1720_v61  ;;  %v1766_v13 = vpop.f32.mrb[2].mxu1 }
  0xf1   : > { %1435 = vmatprep.subr.bf16.mxu0 %v1718_v58  ;;  %1443 = vmatprep.subr.bf16.mxu1 %v1718_v58  ;;  %v1773_v14 = vpop.f32.mrb[3].mxu1 }
  0xf4   : > { %1436 = vmatpush3.bf16.msra.mxu0 %v1718_v58  ;;  %1444 = vmatpush3.bf16.msra.mxu1 %v1718_v58 }
  0xf5   : > { %1449 = vmatprep.subr.bf16.mxu0 %v1720_v61  ;;  %1457 = vmatprep.subr.bf16.mxu1 %v1720_v61 }
  0xf7   : > { %1438 = vmatmul.mubr.msk.bf16.vlgmr.msra.gmra.mrb[4].mxu0 %vm490_vm5, %v489_v33  ;;  %1446 = vmatmul.mubr.msk.bf16.vlgmr.msra.gmra.mrb[4].mxu1 %vm490_vm5, %v571_v6  ;;  %v1317_v33 = vsel %vm815_vm7, 1.0, %v1556_v26 }
  0xf8   : > { %1450 = vmatpush3.bf16.msra.mxu0 %v1720_v61  ;;  %1453 = vmatprep.mubr.msk.bf16.mxu0 %vm490_vm5, %v655_v8  ;;  %v826_v41 = vpack.c.bf16 %v1318_v34, %v1317_v33 }
  0xf9   : > { %1458 = vmatpush3.bf16.msra.mxu1 %v1720_v61  ;;  %1461 = vmatprep.mubr.msk.bf16.mxu1 %vm490_vm5, %v740_v10 }
  0xfa   : > { %1451 = vmatprep.subr.bf16.mxu0 %v1718_v58  ;;  %1459 = vmatprep.subr.bf16.mxu1 %v1718_v58 }
  0xfc   : > { %1452 = vmatpush3.bf16.msra.mxu0 %v1718_v58 }
  0xfd   : > { %1460 = vmatpush3.bf16.msra.mxu1 %v1718_v58  ;;  %1465 = vmatprep.subr.bf16.mxu0 %v1720_v61 }
  0xfe   : > { %1473 = vmatprep.subr.bf16.mxu1 %v1720_v61 }
  0xff   : > { %1454 = vmatmul.mubr.msk.bf16.vlgmr.msra.gmra.mrb[8].mxu0 %vm490_vm5, %v656_v24 }
 0x100   : > { %1462 = vmatmul.mubr.msk.bf16.vlgmr.msra.gmra.mrb[8].mxu1 %vm490_vm5, %v741_v28  ;;  %1466 = vmatpush3.bf16.msra.mxu0 %v1720_v61 }
 0x101   : > { %1469 = vmatprep.mubr.msk.bf16.mxu0 %vm490_vm5, %v825_v29  ;;  %1474 = vmatpush3.bf16.msra.mxu1 %v1720_v61 }
 0x102   : > { %1477 = vmatprep.mubr.msk.bf16.mxu1 %vm490_vm5, %v910_v32  ;;  %1467 = vmatprep.subr.bf16.mxu0 %v1718_v58 }
 0x103   : > { %1475 = vmatprep.subr.bf16.mxu1 %v1718_v58 }
 0x104   : > { %1468 = vmatpush3.bf16.msra.mxu0 %v1718_v58 }
 0x105   : > { %1476 = vmatpush3.bf16.msra.mxu1 %v1718_v58  ;;  %1481 = vmatprep.subr.bf16.mxu0 %v1720_v61 }
 0x106   : > { %1489 = vmatprep.subr.bf16.mxu1 %v1720_v61 }
 0x107   : > { %1470 = vmatmul.mubr.msk.bf16.vlgmr.msra.gmra.mrb[12].mxu0 %vm490_vm5, %v826_v41 }
 0x108   : > { %1478 = vmatmul.mubr.msk.bf16.vlgmr.msra.gmra.mrb[12].mxu1 %vm490_vm5, %v911_v44  ;;  %1482 = vmatpush3.bf16.msra.mxu0 %v1720_v61 }
 0x109   : > { %1485 = vmatprep.mubr.msk.bf16.mxu0 %vm490_vm5, %v995_v45  ;;  %1490 = vmatpush3.bf16.msra.mxu1 %v1720_v61 }
 0x10a   : > { %1483 = vmatprep.subr.bf16.mxu0 %v1718_v58  ;;  %1491 = vmatprep.subr.bf16.mxu1 %v1718_v58 }
 0x10b   : > { %1493 = vmatprep.mubr.msk.bf16.mxu1 %vm490_vm5, %v1080_v46 }
 0x10c   : > { %1484 = vmatpush3.bf16.msra.mxu0 %v1718_v58 }
 0x10d   : > { %1492 = vmatpush3.bf16.msra.mxu1 %v1718_v58 }
 0x10f   : > { %1486 = vmatmul.mubr.msk.bf16.vlgmr.msra.gmra.mrb[16].mxu0 %vm490_vm5, %v996_v23 }
 0x110   : > { %1494 = vmatmul.mubr.msk.bf16.vlgmr.msra.gmra.mrb[16].mxu1 %vm490_vm5, %v1081_v51 }
 0x1ca   : > { %v1439_v52 = vpop.f32.mrb[4].mxu0  ;;  %v1447_v53 = vpop.f32.mrb[4].mxu1 }
 0x1cb   : > { %v629_v54 = vmax.f32 %v1439_v52, %v1447_v53  ;;  %v531_v55 = vpop.f32.mrb[5].mxu0  ;;  %v612_v56 = vpop.f32.mrb[5].mxu1  ;;  %v1340_v53 = vld [vmem:[%s1889_s5] ss:$0 sm:$0xff] }
 0x1cc   : > { %v627_v57 = vmax.f32 %v531_v55, %v612_v56  ;;  %v1440_v59 = vpop.f32.mrb[6].mxu0  ;;  %v1448_v26 = vpop.f32.mrb[6].mxu1 }
 0x1cd   : > { %v630_v60 = vmax.f32 %v1440_v59, %v1448_v26  ;;  %v534_v61 = vpop.f32.mrb[7].mxu0  ;;  %v615_v62 = vpop.f32.mrb[7].mxu1 }
 0x1ce   : > { %v628_v63 = vmax.f32 %v534_v61, %v615_v62 }
 0x1d2   : > { %v1455_v0 = vpop.f32.mrb[8].mxu0 }
 0x1d3   : > { %v714_v1 = vmax.f32 %v629_v54, %v1455_v0  ;;  %v1463_v58 = vpop.f32.mrb[8].mxu1  ;;  %v697_v2 = vpop.f32.mrb[9].mxu0 }
 0x1d4   : > { %v712_v3 = vmax.f32 %v627_v57, %v697_v2  ;;  %v782_v4 = vpop.f32.mrb[9].mxu1  ;;  %v1456_v5 = vpop.f32.mrb[10].mxu0 }
 0x1d5   : > { %v799_v6 = vmax.f32 %v714_v1, %v1463_v58  ;;  %v715_v7 = vmax.f32 %v630_v60, %v1456_v5  ;;  %v1464_v8 = vpop.f32.mrb[10].mxu1  ;;  %v700_v10 = vpop.f32.mrb[11].mxu0 }
 0x1d6   : > { %v797_v11 = vmax.f32 %v712_v3, %v782_v4  ;;  %v713_v15 = vmax.f32 %v628_v63, %v700_v10  ;;  %v785_v16 = vpop.f32.mrb[11].mxu1 }
 0x1d7   : > { %v800_v17 = vmax.f32 %v715_v7, %v1464_v8 }
 0x1d8   : > { %v798_v18 = vmax.f32 %v713_v15, %v785_v16 }
 0x1da   : > { %v1471_v19 = vpop.f32.mrb[12].mxu0 }
 0x1db   : > { %v884_v20 = vmax.f32 %v799_v6, %v1471_v19  ;;  %v1479_v21 = vpop.f32.mrb[12].mxu1  ;;  %v867_v22 = vpop.f32.mrb[13].mxu0 }
 0x1dc   : > { %v882_v24 = vmax.f32 %v797_v11, %v867_v22  ;;  %v952_v25 = vpop.f32.mrb[13].mxu1  ;;  %v1472_v27 = vpop.f32.mrb[14].mxu0 }
 0x1dd   : > { %v969_v28 = vmax.f32 %v884_v20, %v1479_v21  ;;  %v885_v29 = vmax.f32 %v800_v17, %v1472_v27  ;;  %v1480_v30 = vpop.f32.mrb[14].mxu1  ;;  %v870_v31 = vpop.f32.mrb[15].mxu0 }
 0x1de   : > { %v967_v32 = vmax.f32 %v882_v24, %v952_v25  ;;  %v883_v33 = vmax.f32 %v798_v18, %v870_v31  ;;  %v955_v34 = vpop.f32.mrb[15].mxu1 }
 0x1df   : > { %v970_v35 = vmax.f32 %v885_v29, %v1480_v30 }
 0x1e0   : > { %v968_v36 = vmax.f32 %v883_v33, %v955_v34 }
 0x1e2   : > { %v1487_v37 = vpop.f32.mrb[16].mxu0 }
 0x1e3   : > { %v1054_v38 = vmax.f32 %v969_v28, %v1487_v37  ;;  %v1495_v39 = vpop.f32.mrb[16].mxu1  ;;  %v1037_v40 = vpop.f32.mrb[17].mxu0 }
 0x1e4   : > { %v1052_v41 = vmax.f32 %v967_v32, %v1037_v40  ;;  %v1122_v42 = vpop.f32.mrb[17].mxu1  ;;  %v1488_v43 = vpop.f32.mrb[18].mxu0 }
 0x1e5   : > { %v1139_v44 = vmax.f32 %v1054_v38, %v1495_v39  ;;  %v1055_v45 = vmax.f32 %v970_v35, %v1488_v43  ;;  %v1496_v46 = vpop.f32.mrb[18].mxu1  ;;  %v1040_v47 = vpop.f32.mrb[19].mxu0 }
 0x1e6   : > { %v1137_v49 = vmax.f32 %v1052_v41, %v1122_v42  ;;  %v1053_v50 = vmax.f32 %v968_v36, %v1040_v47  ;;  %v1125_v23 = vpop.f32.mrb[19].mxu1 }
 0x1e7   : > { %v1143_v51 = vadd.f32 %v1748_v9, %v1139_v44  ;;  %v1140_v52 = vmax.f32 %v1055_v45, %v1496_v46 }
 0x1e8   : > { %v1141_v54 = vadd.f32 %v1137_v49, %v1759_v12  ;;  %v1138_v55 = vmax.f32 %v1053_v50, %v1125_v23 }
 0x1e9   : > { %v1154_v56 = vmul.f32 %v1339_v48, %v1143_v51  ;;  %v1144_v57 = vadd.f32 %v1766_v13, %v1140_v52 }
 0x1ea   : > { %v1152_v59 = vmul.f32 %v1339_v48, %v1141_v54  ;;  %v1142_v26 = vadd.f32 %v1138_v55, %v1773_v14 }
 0x1eb   : > { %v1165_v60 = vadd.f32 %v1340_v53, %v1154_v56  ;;  %v1155_v61 = vmul.f32 %v1339_v48, %v1144_v57 }
 0x1ec   : > { %v1163_v62 = vadd.f32 %v1340_v53, %v1152_v59  ;;  %v1153_v63 = vmul.f32 %v1339_v48, %v1142_v26 }
 0x1ed   : > { %v1173_v9 = vmul.f32 0.2, %v1165_v60  ;;  %v1166_v0 = vadd.f32 %v1340_v53, %v1155_v61  ;;  %vm1169_vm5 = vcmp.gt.f32.partialorder %v1165_v60, 0.0 }
 0x1ee   : > { %v1171_v1 = vmul.f32 0.2, %v1163_v62  ;;  %v1164_v58 = vadd.f32 %v1340_v53, %v1153_v63  ;;  %vm1167_vm3 = vcmp.gt.f32.partialorder %v1163_v62, 0.0 }
 0x1ef   : > { %vm1170_vm4 = vcmp.gt.f32.partialorder %v1166_v0, 0.0  ;;  %v1174_v12 = vmul.f32 0.2, %v1166_v0  ;;  %v1177_v13 = vsel %vm1169_vm5, %v1165_v60, %v1173_v9 }
 0x1f0   : > { %vm1168_vm6 = vcmp.gt.f32.partialorder %v1164_v58, 0.0  ;;  %v1172_v2 = vmul.f32 0.2, %v1164_v58  ;;  %v1175_v3 = vsel %vm1167_vm3, %v1163_v62, %v1171_v1 }
 0x1f1   : > { %v1178_v14 = vsel %vm1170_vm4, %v1166_v0, %v1174_v12 }
 0x1f2   : > { %v1362_v4 = vpack.c.bf16 %v1178_v14, %v1177_v13  ;;  %v1176_v5 = vsel %vm1168_vm6, %v1164_v58, %v1172_v2 }
 0x1f3   : > { %v1357_v6 = vpack.c.bf16 %v1176_v5, %v1175_v3 }
 0x1f4   : > { %1364 = vst [vmem:[%s271_s8 + $0x8] sm:$0xff] %v1362_v4  }
 0x1f5   : > { %1358 = vst [vmem:[%s271_s8] sm:$0xff] %v1357_v6  }
 0x1f6 PF: > { %s16_s21 = sadd.s32 1, %s1546_s21  }
 0x1f7   : > { %p13_p4 = scmp.ge.s32.totalorder %s16_s21, 4  }
 0x1f9   :  { %15 = sbr.rel (!%p13_p4) target bundleno = 1 (0x1), region = 77 }

// kernel: dgcnn_forward.15
= control target key start
LH: loop header
LB: loop body
LE: loop exit
PB: predicated region body
PF: predicated region fallthrough
CT: control target
= control target key end

     0   :  { %s361_s6 = smov 0   ;;  %s382_s0 = inlined_call_operand.vmem [shape: bf16[2,32,128], index: 0, kind: input, shape index: {}]   ;;  %s383_s1 = inlined_call_operand.vmem [shape: f32[2,32,32], index: 1, kind: output, shape index: {}]  }
   0x1 LB: > { %s303_s7 = sadd.s32 4294967295, %s349_s6   ;;  %p307_p0 = scmp.ge.s32.totalorder %s349_s6, 1  ;;  %s349_s6 = sphi %s361_s6, %s11_s6  }
   0x2   : > { %p87_p1 = scmp.lt.s32.totalorder %s349_s6, 3 }
   0x4   : > { %p88_p2 = pnand %p307_p0, %p87_p1 }
   0x5   : > { %p107_p3 = scmp.lt.s32.totalorder (!%p88_p2), %s303_s7, 1  ;;  %v235_v18 = vlaneseq (!%p88_p2)  ;;  %vm243_vm0 = vcmask (!%p88_p2), 261120  }
   0x6   : > { %91 = sbr.rel (%p88_p2) target bundleno = 298 (0x12a), region = 24 }
   0x7   : > { %v236_v19 = vshrl.u32 (!%p88_p2), %v235_v18, 7 }
   0x9   : > { %v237_v20 = vsub.s32 (!%p88_p2), 0, %v236_v19 }
   0xd   : > { %s385_s7 = smov (!%p107_p3, %s303_s7), 1 }
   0xe   : > { %s316_s8 = sshll.u32 %s385_s7, 4  ;;  %s317_s12 = sshll.u32 %s385_s7, 5 }
   0xf   : > { %s111_s11 = scalar_lea.vmem %s382_s0, %s316_s8  ;;  %s116_s15 = scalar_lea.vmem %s383_s1, %s317_s12 }
  0x10   : > { %v118_v0 = vld [vmem:[%s111_s11] sm:$0xff]   ;;  %v120_v1 = vld [vmem:[%s111_s11 + $0x8] sm:$0xff]  }
  0x11   : > { %v183_v2 = vunpack.c.l.bf16 %v118_v0  ;;  %v184_v3 = vunpack.c.h.bf16 %v118_v0  ;;  %v185_v4 = vunpack.c.l.bf16 %v120_v1  ;;  %v186_v5 = vunpack.c.h.bf16 %v120_v1  ;;  %322 = vmatprep.subr.bf16.mxu0 %v118_v0  ;;  %326 = vmatprep.mubr.bf16.mxu0 %v118_v0 }
  0x12   : > { %323 = vmatpush3.bf16.xpose.msra.mxu0 %v118_v0 }
  0x13   : > { %v187_v6 = vmul.f32 %v183_v2, %v183_v2  ;;  %v189_v7 = vmul.f32 %v185_v4, %v185_v4  ;;  %v188_v8 = vmul.f32 %v184_v3, %v184_v3  ;;  %v190_v9 = vmul.f32 %v186_v5, %v186_v5  ;;  %324 = vmatprep.subr.bf16.mxu0 %v120_v1 }
  0x15   : > { %191 = vadd.xlane.f32.xlu0 %v187_v6  ;;  %195 = vadd.xlane.f32.xlu1 %v189_v7 }
  0x19   : > { %193 = vadd.xlane.f32.xlu0 %v188_v8  ;;  %197 = vadd.xlane.f32.xlu1 %v190_v9 }
  0x1a   : > { %325 = vmatpush3.bf16.xpose.msra.mxu0 %v120_v1 }
  0x21   : > { %327 = vmatmul.mubr.bf16.vlgmr.msra.gmra.mrb[0].mxu0 %v120_v1 }
  0xa2   : > { %v192_v10 = vpop.xlane.xlu0 %191  ;;  %v196_v12 = vpop.xlane.xlu1 %195 }
  0xa3   : > { %203 = vxpose.xlu0.b32.start [1/4] (short) (narrow) %v192_v10, 8 }
  0xa6   : > { %v194_v11 = vpop.xlane.xlu0 %193  ;;  %v198_v13 = vpop.xlane.xlu1 %197 }
  0xa7   : > { %204 = vxpose.xlu0.b32.cont [2/4] (short) (narrow) %v194_v11, 8 }
  0xab   : > { %205 = vxpose.xlu0.b32.cont [3/4] (short) (narrow) %v196_v12, 8 }
  0xaf   : > { %206 = vxpose.xlu0.b32.end [4/4] (short) (narrow) %v198_v13, 8 }
  0xf4   : > { %v328_v14 = vpop.f32.mrb[0].mxu0 }
  0xf5   : > { %v168_v15 = vpop.f32.mrb[1].mxu0  ;;  %v201_v21 = vmul.f32 2.0, %v328_v14 }
  0xf6   : > { %v329_v16 = vpop.f32.mrb[2].mxu0  ;;  %v199_v23 = vmul.f32 2.0, %v168_v15 }
  0xf7   : > { %v171_v17 = vpop.f32.mrb[3].mxu0  ;;  %v202_v24 = vmul.f32 2.0, %v329_v16 }
  0xf8   : > { %v200_v25 = vmul.f32 2.0, %v171_v17 }
 0x123   : > { %v219_v22 = vpop.trf.xlu0 }
 0x124   : > { %v238_v26 = vrot.slane %v219_v22, %v237_v20 }
 0x126   : > { %v239_v27 = vsub.f32 %v199_v23, %v238_v26  ;;  %v240_v28 = vsub.f32 %v200_v25, %v238_v26  ;;  %v241_v29 = vsub.f32 %v201_v21, %v238_v26  ;;  %v242_v30 = vsub.f32 %v202_v24, %v238_v26 }
 0x128   : > { %244 = vst.msk [vmem:[%s116_s15] sm:$0xff] %vm243_vm0, %v239_v27  ;;  %245 = vst.msk [vmem:[%s116_s15 + $0x8] sm:$0xff] %vm243_vm0, %v240_v28 }
 0x129   : > { %246 = vst.msk [vmem:[%s116_s15 + $0x10] sm:$0xff] %vm243_vm0, %v241_v29  ;;  %247 = vst.msk [vmem:[%s116_s15 + $0x18] sm:$0xff] %vm243_vm0, %v242_v30 }
 0x12a PF: > { %s11_s6 = sadd.s32 1, %s349_s6  }
 0x12b   : > { %p8_p4 = scmp.ge.s32.totalorder %s11_s6, 4  }
 0x12d   :  { %10 = sbr.rel (!%p8_p4) target bundleno = 1 (0x1), region = 54 }

// kernel: dgcnn_forward.12
= control target key start
LH: loop header
LB: loop body
LE: loop exit
PB: predicated region body
PF: predicated region fallthrough
CT: control target
= control target key end

     0   :  { %s1582_s21 = smov 0   ;;  %s1874_s0 = inlined_call_operand.vmem [shape: s32[2,32,8], index: 0, kind: input, shape index: {}]   ;;  %s1875_s1 = inlined_call_operand.vmem [shape: bf16[2,32,64], index: 1, kind: input, shape index: {}]   ;;  %s1876_s2 = inlined_call_operand.vmem [shape: bf16[64,64], index: 2, kind: input, shape index: {}]   ;;  %s1877_s3 = inlined_call_operand.vmem [shape: bf16[64,64], index: 3, kind: input, shape index: {}]   ;;  %s1878_s4 = inlined_call_operand.vmem [shape: f32[1,64], index: 4, kind: input, shape index: {}]   ;;  %s1879_s5 = inlined_call_operand.vmem [shape: f32[1,64], index: 5, kind: input, shape index: {}]   ;;  %s1880_s6 = inlined_call_operand.vmem [shape: bf16[2,32,64], index: 6, kind: output, shape index: {}]  }
   0x1 LB: > { %s1267_s22 = sadd.s32 4294967295, %s1536_s21   ;;  %p1271_p0 = scmp.ge.s32.totalorder %s1536_s21, 1  ;;  %s1536_s21 = sphi %s1582_s21, %s16_s21  }
   0x2   : > { %p222_p1 = scmp.lt.s32.totalorder %s1536_s21, 3 }
   0x4   : > { %p223_p2 = pnand %p1271_p0, %p222_p1 }
   0x5   : > { %v1520_v0 = vld [vmem:[%s1876_s2] sm:$0xff] (!%p223_p2)   ;;  %p257_p3 = scmp.lt.s32.totalorder (!%p223_p2), %s1267_s22, 1  ;;  %v1521_v1 = vld [vmem:[%s1876_s2 + $0x8] sm:$0xff] (!%p223_p2)   ;;  %v1522_v2 = vld [vmem:[%s1876_s2 + $0x10] sm:$0xff] (!%p223_p2)   ;;  %v1538_v3 = vmov (!%p223_p2), 0   ;;  %vm319_vm0 = vcmask (!%p223_p2), 523264   ;;  %v462_v22 = vlaneseq (!%p223_p2) }
   0x6   : > { %226 = sbr.rel (%p223_p2) target bundleno = 502 (0x1f6), region = 44  ;;  %1399 = vmatprep.subr.bf16.mxu0 (!%p223_p2), %v1520_v0  ;;  %1505 = vset.pattern.permute.xlu1 (!%p223_p2), %v1538_v3  ;;  %v1523_v5 = vld [vmem:[%s1876_s2 + $0x18] sm:$0xff] (!%p223_p2)   ;;  %v1526_v10 = vld [vmem:[%s1877_s3] sm:$0xff] (!%p223_p2)   ;;  %v1527_v12 = vld [vmem:[%s1877_s3 + $0x8] sm:$0xff] (!%p223_p2)   ;;  %v1539_v13 = vmov (!%p223_p2), 1   ;;  %v1540_v16 = vmov (!%p223_p2), 2  }
   0x7   : > { %1400 = vmatpush3.bf16.msra.mxu0 (!%p223_p2), %v1520_v0  ;;  %1504 = vset.pattern.permute.xlu0 (!%p223_p2), %v1538_v3  ;;  %v1528_v14 = vld [vmem:[%s1877_s3 + $0x10] sm:$0xff] (!%p223_p2)   ;;  %v1529_v15 = vld [vmem:[%s1877_s3 + $0x18] sm:$0xff] (!%p223_p2)   ;;  %v1541_v17 = vmov (!%p223_p2), 3   ;;  %v1542_v18 = vmov (!%p223_p2), 4   ;;  %v1543_v19 = vmov (!%p223_p2), 5   ;;  %v1544_v20 = vmov (!%p223_p2), 6  }
   0x8   : > { %1401 = vmatprep.subr.bf16.mxu0 (!%p223_p2), %v1521_v1  ;;  %1411 = vmatprep.subr.bf16.mxu1 (!%p223_p2), %v1526_v10  ;;  %v1545_v21 = vmov (!%p223_p2), 7   ;;  %v1670_v23 = vand.u32 (!%p223_p2), 127, %v462_v22  ;;  %v1546_v26 = vmov (!%p223_p2), 0.0   ;;  %vm490_vm5 = vcmask (!%p223_p2), 261120  }
   0x9   : > { %1412 = vmatpush3.bf16.msra.mxu1 (!%p223_p2), %v1526_v10 }
   0xa   : > { %1413 = vmatprep.subr.bf16.mxu1 (!%p223_p2), %v1527_v12 }
   0xb   : > { %1402 = vmatpush3.bf16.msra.mxu0 (!%p223_p2), %v1521_v1 }
   0xc   : > { %1403 = vmatprep.subr.bf16.mxu0 (!%p223_p2), %v1522_v2 }
   0xd   : > { %s1882_s22 = smov (!%p257_p3, %s1267_s22), 1  ;;  %1414 = vmatpush3.bf16.msra.mxu1 %v1527_v12 }
   0xe   : > { %s1348_s29 = sshll.u32 %s1882_s22, 5  ;;  %s1349_s30 = sshll.u32 %s1882_s22, 4  ;;  %1415 = vmatprep.subr.bf16.mxu1 %v1528_v14 }
   0xf   : > { %s261_s9 = scalar_lea.vmem %s1874_s0, %s1348_s29  ;;  %s266_s12 = scalar_lea.vmem %s1875_s1, %s1349_s30  ;;  %1404 = vmatpush3.bf16.msra.mxu0 %v1522_v2 }
  0x10   : > { %v1524_v4 = vld [vmem:[%s266_s12] sm:$0xff]   ;;  %v1615_v6 = vld [vmem:[%s261_s9 + $0x10] sm:$0xff]  ;;  %v1617_v7 = vld [vmem:[%s261_s9 + $0x18] sm:$0xff]  ;;  %1405 = vmatprep.subr.bf16.mxu0 %v1523_v5  ;;  %s271_s8 = scalar_lea.vmem %s1880_s6, %s1349_s30 }
  0x11   : > { %1407 = vmatprep.mubr.msk.bf16.mxu0 %vm319_vm0, %v1524_v4  ;;  %v1619_v8 = vld [vmem:[%s261_s9] sm:$0xff]  ;;  %471 = vperm.xlu1 %1505, %v1615_v6   ;;  %v1623_v9 = vld [vmem:[%s261_s9 + $0x8] sm:$0xff] }
  0x12   : > { %465 = vperm.xlu0 %1504, %v1619_v8   ;;  %1419 = vmatprep.mubr.msk.bf16.mxu1 %vm319_vm0, %v1524_v4  ;;  %v1525_v11 = vld [vmem:[%s266_s12 + $0x8] sm:$0xff]  }
  0x13   : > { %1406 = vmatpush3.bf16.msra.mxu0 %v1523_v5  ;;  %1416 = vmatpush3.bf16.msra.mxu1 %v1528_v14 }
  0x14   : > { %1417 = vmatprep.subr.bf16.mxu1 %v1529_v15 }
  0x15   : > { %474 = vperm.xlu1 %1505, %v1617_v7  }
  0x16   : > { %468 = vperm.xlu0 %1504, %v1623_v9   ;;  %1408 = vmatmul.mubr.msk.bf16.vlgmr.msra.gmra.mrb[0].mxu0 %vm319_vm0, %v1525_v11 }
  0x17   : > { %1418 = vmatpush3.bf16.msra.mxu1 %v1529_v15 }
  0x19   : > { %1507 = vset.pattern.permute.xlu1 %v1539_v13 }
  0x1a   : > { %1506 = vset.pattern.permute.xlu0 %v1539_v13  ;;  %550 = vperm.xlu1 %1507, %v1623_v9  }
  0x1b   : > { %547 = vperm.xlu0 %1506, %v1619_v8   ;;  %1420 = vmatmul.mubr.msk.bf16.vlgmr.msra.gmra.mrb[0].mxu1 %vm319_vm0, %v1525_v11 }
  0x1e   : > { %553 = vperm.xlu1 %1507, %v1615_v6  }
  0x1f   : > { %556 = vperm.xlu0 %1506, %v1617_v7  }
  0x22   : > { %1508 = vset.pattern.permute.xlu1 %v1540_v16 }
  0x23   : > { %632 = vperm.xlu1 %1508, %v1619_v8   ;;  %1509 = vset.pattern.permute.xlu0 %v1540_v16 }
  0x24   : > { %635 = vperm.xlu0 %1509, %v1623_v9  }
  0x27   : > { %638 = vperm.xlu1 %1508, %v1615_v6  }
  0x28   : > { %1510 = vset.pattern.permute.xlu0 %v1541_v17 }
  0x29   : > { %717 = vperm.xlu0 %1510, %v1619_v8  }
  0x2b   : > { %641 = vperm.xlu1 %1508, %v1617_v7  }
  0x2d   : > { %726 = vperm.xlu0 %1510, %v1617_v7  }
  0x2f   : > { %1511 = vset.pattern.permute.xlu1 %v1541_v17 }
  0x30   : > { %720 = vperm.xlu1 %1511, %v1623_v9  }
  0x31   : > { %1513 = vset.pattern.permute.xlu0 %v1542_v18 }
  0x32   : > { %805 = vperm.xlu0 %1513, %v1623_v9  }
  0x34   : > { %723 = vperm.xlu1 %1511, %v1615_v6  }
  0x36   : > { %1514 = vset.pattern.permute.xlu0 %v1543_v19 }
  0x37   : > { %887 = vperm.xlu0 %1514, %v1619_v8  }
  0x38   : > { %1512 = vset.pattern.permute.xlu1 %v1542_v18 }
  0x39   : > { %802 = vperm.xlu1 %1512, %v1619_v8  }
  0x3b   : > { %896 = vperm.xlu0 %1514, %v1617_v7  }
  0x3d   : > { %808 = vperm.xlu1 %1512, %v1615_v6  }
  0x3f   : > { %1517 = vset.pattern.permute.xlu0 %v1544_v20 }
  0x40   : > { %975 = vperm.xlu0 %1517, %v1623_v9  }
  0x41   : > { %811 = vperm.xlu1 %1512, %v1617_v7  }
  0x44   : > { %1518 = vset.pattern.permute.xlu0 %v1545_v21 }
  0x45   : > { %1515 = vset.pattern.permute.xlu1 %v1543_v19  ;;  %1057 = vperm.xlu0 %1518, %v1619_v8  }
  0x46   : > { %890 = vperm.xlu1 %1515, %v1623_v9  }
  0x49   : > { %1066 = vperm.xlu0 %1518, %v1617_v7  }
  0x4a   : > { %893 = vperm.xlu1 %1515, %v1615_v6  }
  0x4e   : > { %1516 = vset.pattern.permute.xlu1 %v1544_v20 }
  0x4f   : > { %972 = vperm.xlu1 %1516, %v1619_v8  }
  0x53   : > { %978 = vperm.xlu1 %1516, %v1615_v6  }
  0x57   : > { %981 = vperm.xlu1 %1516, %v1617_v7  }
  0x5b   : > { %1519 = vset.pattern.permute.xlu1 %v1545_v21 }
  0x5c   : > { %1060 = vperm.xlu1 %1519, %v1623_v9  }
  0x60   : > { %1063 = vperm.xlu1 %1519, %v1615_v6  }
  0x90   : > { %v472_v24 = vpop.permute.xlu1 %471 }
  0x91   : > { %v466_v25 = vpop.permute.xlu0 %465  ;;  %vm478_vm1 = vcmp.eq.s32.totalorder %v472_v24, %v1670_v23 }
  0x92   : > { %vm476_vm2 = vcmp.eq.s32.totalorder %v466_v25, %v1670_v23  ;;  %v1675_v27 = vsel %vm478_vm1, 1.0, %v1546_v26 }
  0x93   : > { %v1292_v28 = vsel %vm476_vm2, 1.0, %v1546_v26 }
  0x94   : > { %v475_v29 = vpop.permute.xlu1 %474 }
  0x95   : > { %v469_v30 = vpop.permute.xlu0 %468  ;;  %vm479_vm3 = vcmp.eq.s32.totalorder %v475_v29, %v1670_v23 }
  0x96   : > { %vm477_vm4 = vcmp.eq.s32.totalorder %v469_v30, %v1670_v23  ;;  %v1681_v31 = vsel %vm479_vm3, 1.0, %v1546_v26 }
  0x97   : > { %v1293_v32 = vsel %vm477_vm4, 1.0, %v1546_v26  ;;  %v489_v33 = vpack.c.bf16 %v1681_v31, %v1675_v27 }
  0x98   : > { %v488_v34 = vpack.c.bf16 %v1293_v32, %v1292_v28 }
  0x99   : > { %v551_v35 = vpop.permute.xlu1 %550 }
  0x9a   : > { %1427 = vmatprep.mubr.msk.bf16.mxu0 %vm490_vm5, %v488_v34  ;;  %vm559_vm6 = vcmp.eq.s32.totalorder %v551_v35, %v1670_v23  ;;  %v548_v36 = vpop.permute.xlu0 %547 }
  0x9b   : > { %v1299_v37 = vsel %vm559_vm6, 1.0, %v1546_v26  ;;  %vm558_vm7 = vcmp.eq.s32.totalorder %v548_v36, %v1670_v23 }
  0x9c   : > { %v1298_v38 = vsel %vm558_vm7, 1.0, %v1546_v26 }
  0x9d   : > { %v570_v39 = vpack.c.bf16 %v1299_v37, %v1298_v38  ;;  %v554_v40 = vpop.permute.xlu1 %553 }
  0x9e   : > { %v557_v48 = vpop.permute.xlu0 %556  ;;  %vm560_vm8 = vcmp.eq.s32.totalorder %v554_v40, %v1670_v23 }
  0x9f   : > { %1435 = vmatprep.mubr.msk.bf16.mxu1 %vm490_vm5, %v570_v39  ;;  %vm561_vm9 = vcmp.eq.s32.totalorder %v557_v48, %v1670_v23  ;;  %v1300_v0 = vsel %vm560_vm8, 1.0, %v1546_v26 }
  0xa0   : > { %v1301_v1 = vsel %vm561_vm9, 1.0, %v1546_v26 }
  0xa1   : > { %v571_v6 = vpack.c.bf16 %v1301_v1, %v1300_v0 }
  0xa2   : > { %v633_v41 = vpop.permute.xlu1 %632 }
  0xa3   : > { %v636_v49 = vpop.permute.xlu0 %635  ;;  %vm643_vm10 = vcmp.eq.s32.totalorder %v633_v41, %v1670_v23 }
  0xa4   : > { %vm644_vm11 = vcmp.eq.s32.totalorder %v636_v49, %v1670_v23  ;;  %v1304_v2 = vsel %vm643_vm10, 1.0, %v1546_v26 }
  0xa5   : > { %v1305_v3 = vsel %vm644_vm11, 1.0, %v1546_v26 }
  0xa6   : > { %v1692_v42 = vpop.permute.xlu1 %638  ;;  %v655_v8 = vpack.c.bf16 %v1305_v3, %v1304_v2 }
  0xa7   : > { %vm645_vm14 = vcmp.eq.s32.totalorder %v1692_v42, %v1670_v23 }
  0xa8   : > { %v718_v51 = vpop.permute.xlu0 %717  ;;  %v1306_v15 = vsel %vm645_vm14, 1.0, %v1546_v26 }
  0xa9   : > { %vm728_vm13 = vcmp.eq.s32.totalorder %v718_v51, %v1670_v23 }
  0xaa   : > { %v1694_v43 = vpop.permute.xlu1 %641  ;;  %v1310_v5 = vsel %vm728_vm13, 1.0, %v1546_v26 }
  0xab   : > { %vm646_vm15 = vcmp.eq.s32.totalorder %v1694_v43, %v1670_v23 }
  0xac   : > { %v727_v53 = vpop.permute.xlu0 %726  ;;  %v1307_v16 = vsel %vm646_vm15, 1.0, %v1546_v26 }
  0xad   : > { %vm731_vm1 = vcmp.eq.s32.totalorder %v727_v53, %v1670_v23  ;;  %v656_v24 = vpack.c.bf16 %v1307_v16, %v1306_v15 }
  0xae   : > { %v1313_v18 = vsel %vm731_vm1, 1.0, %v1546_v26 }
  0xaf   : > { %v721_v44 = vpop.permute.xlu1 %720 }
  0xb0   : > { %vm729_vm12 = vcmp.eq.s32.totalorder %v721_v44, %v1670_v23 }
  0xb1   : > { %v806_v60 = vpop.permute.xlu0 %805  ;;  %v1311_v4 = vsel %vm729_vm12, 1.0, %v1546_v26 }
  0xb2   : > { %v740_v10 = vpack.c.bf16 %v1311_v4, %v1310_v5  ;;  %vm814_vm3 = vcmp.eq.s32.totalorder %v806_v60, %v1670_v23 }
  0xb3   : > { %v1696_v45 = vpop.permute.xlu1 %723  ;;  %v1317_v22 = vsel %vm814_vm3, 1.0, %v1546_v26 }
  0xb4   : > { %vm730_vm0 = vcmp.eq.s32.totalorder %v1696_v45, %v1670_v23 }
  0xb5   : > { %v1312_v17 = vsel %vm730_vm0, 1.0, %v1546_v26 }
  0xb6   : > { %v888_v63 = vpop.permute.xlu0 %887  ;;  %v741_v28 = vpack.c.bf16 %v1313_v18, %v1312_v17 }
  0xb7   : > { %vm898_vm6 = vcmp.eq.s32.totalorder %v888_v63, %v1670_v23 }
  0xb8   : > { %v1698_v46 = vpop.permute.xlu1 %802  ;;  %v1322_v27 = vsel %vm898_vm6, 1.0, %v1546_v26 }
  0xb9   : > { %vm813_vm2 = vcmp.eq.s32.totalorder %v1698_v46, %v1670_v23 }
  0xba   : > { %v897_v11 = vpop.permute.xlu0 %896  ;;  %v1316_v21 = vsel %vm813_vm2, 1.0, %v1546_v26 }
  0xbb   : > { %v825_v29 = vpack.c.bf16 %v1317_v22, %v1316_v21  ;;  %vm901_vm9 = vcmp.eq.s32.totalorder %v897_v11, %v1670_v23 }
  0xbc   : > { %v1700_v47 = vpop.permute.xlu1 %808  ;;  %v1325_v36 = vsel %vm901_vm9, 1.0, %v1546_v26 }
  0xbd   : > { %vm815_vm7 = vcmp.eq.s32.totalorder %v1700_v47, %v1670_v23 }
  0xbf   : > { %v976_v20 = vpop.permute.xlu0 %975 }
  0xc0   : > { %v1702_v50 = vpop.permute.xlu1 %811  ;;  %vm984_vm11 = vcmp.eq.s32.totalorder %v976_v20, %v1670_v23 }
  0xc1   : > { %vm816_vm8 = vcmp.eq.s32.totalorder %v1702_v50, %v1670_v23  ;;  %v1329_v38 = vsel %vm984_vm11, 1.0, %v1546_v26 }
  0xc2   : > { %v1319_v34 = vsel %vm816_vm8, 1.0, %v1546_v26 }
  0xc4   : > { %v1058_v31 = vpop.permute.xlu0 %1057 }
  0xc5   : > { %v1704_v52 = vpop.permute.xlu1 %890  ;;  %vm1068_vm14 = vcmp.eq.s32.totalorder %v1058_v31, %v1670_v23 }
  0xc6   : > { %vm899_vm4 = vcmp.eq.s32.totalorder %v1704_v52, %v1670_v23  ;;  %v1334_v40 = vsel %vm1068_vm14, 1.0, %v1546_v26 }
  0xc7   : > { %v1323_v25 = vsel %vm899_vm4, 1.0, %v1546_v26  ;;  %vm1195_vm4 = vcmask 519168  }
  0xc8   : > { %v910_v32 = vpack.c.bf16 %v1323_v25, %v1322_v27  ;;  %v1067_v43 = vpop.permute.xlu0 %1066 }
  0xc9   : > { %v1706_v55 = vpop.permute.xlu1 %893  ;;  %vm1071_vm2 = vcmp.eq.s32.totalorder %v1067_v43, %v1670_v23 }
  0xca   : > { %vm900_vm10 = vcmp.eq.s32.totalorder %v1706_v55, %v1670_v23  ;;  %v1337_v50 = vsel %vm1071_vm2, 1.0, %v1546_v26 }
  0xcb   : > { %v1324_v35 = vsel %vm900_vm10, 1.0, %v1546_v26 }
  0xcc   : > { %v911_v44 = vpack.c.bf16 %v1325_v36, %v1324_v35 }
  0xce   : > { %v1716_v62 = vpop.permute.xlu1 %972 }
  0xcf   : > { %vm983_vm12 = vcmp.eq.s32.totalorder %v1716_v62, %v1670_v23 }
  0xd0   : > { %v1328_v37 = vsel %vm983_vm12, 1.0, %v1546_v26 }
  0xd1   : > { %v995_v45 = vpack.c.bf16 %v1329_v38, %v1328_v37 }
  0xd2   : > { %v1736_v7 = vpop.permute.xlu1 %978 }
  0xd3   : > { %vm985_vm15 = vcmp.eq.s32.totalorder %v1736_v7, %v1670_v23 }
  0xd4   : > { %v1330_v47 = vsel %vm985_vm15, 1.0, %v1546_v26 }
  0xd6   : > { %v982_v19 = vpop.permute.xlu1 %981 }
  0xd7   : > { %vm986_vm0 = vcmp.eq.s32.totalorder %v982_v19, %v1670_v23 }
  0xd8   : > { %v1331_v48 = vsel %vm986_vm0, 1.0, %v1546_v26 }
  0xdb   : > { %v1061_v30 = vpop.permute.xlu1 %1060 }
  0xdc   : > { %vm1069_vm13 = vcmp.eq.s32.totalorder %v1061_v30, %v1670_v23 }
  0xdd   : > { %v1335_v39 = vsel %vm1069_vm13, 1.0, %v1546_v26 }
  0xde   : > { %v1080_v46 = vpack.c.bf16 %v1335_v39, %v1334_v40 }
  0xdf   : > { %v1064_v42 = vpop.permute.xlu1 %1063 }
  0xe0   : > { %vm1070_vm1 = vcmp.eq.s32.totalorder %v1064_v42, %v1670_v23  ;;  %v996_v23 = vpack.c.bf16 %v1331_v48, %v1330_v47  ;;  %v1340_v48 = vld [vmem:[%s1878_s4] ss:$0 sm:$0xff] }
  0xe1   : > { %v1336_v49 = vsel %vm1070_vm1, 1.0, %v1546_v26 }
  0xe2   : > { %v1081_v51 = vpack.c.bf16 %v1337_v50, %v1336_v49 }
  0xe9   : > { %v1409_v54 = vpop.f32.mrb[0].mxu0 }
  0xea   : > { %v360_v56 = vpop.f32.mrb[1].mxu0 }
  0xeb   : > { %v1410_v57 = vpop.f32.mrb[2].mxu0 }
  0xec   : > { %v1708_v58 = vpack.c.bf16 %v1410_v57, %v1409_v54  ;;  %v363_v59 = vpop.f32.mrb[3].mxu0 }
  0xed   : > { %v1710_v61 = vpack.c.bf16 %v363_v59, %v360_v56 }
  0xee   : > { %v1738_v9 = vpop.f32.mrb[0].mxu1 }
  0xef   : > { %1423 = vmatprep.subr.bf16.mxu0 %v1710_v61  ;;  %1431 = vmatprep.subr.bf16.mxu1 %v1710_v61  ;;  %v1749_v12 = vpop.f32.mrb[1].mxu1 }
  0xf0   : > { %1424 = vmatpush3.bf16.msra.mxu0 %v1710_v61  ;;  %1432 = vmatpush3.bf16.msra.mxu1 %v1710_v61  ;;  %v1756_v13 = vpop.f32.mrb[2].mxu1 }
  0xf1   : > { %1425 = vmatprep.subr.bf16.mxu0 %v1708_v58  ;;  %1433 = vmatprep.subr.bf16.mxu1 %v1708_v58  ;;  %v1763_v14 = vpop.f32.mrb[3].mxu1 }
  0xf4   : > { %1426 = vmatpush3.bf16.msra.mxu0 %v1708_v58  ;;  %1434 = vmatpush3.bf16.msra.mxu1 %v1708_v58 }
  0xf5   : > { %1439 = vmatprep.subr.bf16.mxu0 %v1710_v61  ;;  %1447 = vmatprep.subr.bf16.mxu1 %v1710_v61 }
  0xf7   : > { %1428 = vmatmul.mubr.msk.bf16.vlgmr.msra.gmra.mrb[4].mxu0 %vm490_vm5, %v489_v33  ;;  %1436 = vmatmul.mubr.msk.bf16.vlgmr.msra.gmra.mrb[4].mxu1 %vm490_vm5, %v571_v6  ;;  %v1318_v33 = vsel %vm815_vm7, 1.0, %v1546_v26 }
  0xf8   : > { %1440 = vmatpush3.bf16.msra.mxu0 %v1710_v61  ;;  %1443 = vmatprep.mubr.msk.bf16.mxu0 %vm490_vm5, %v655_v8  ;;  %v826_v41 = vpack.c.bf16 %v1319_v34, %v1318_v33 }
  0xf9   : > { %1448 = vmatpush3.bf16.msra.mxu1 %v1710_v61  ;;  %1451 = vmatprep.mubr.msk.bf16.mxu1 %vm490_vm5, %v740_v10 }
  0xfa   : > { %1441 = vmatprep.subr.bf16.mxu0 %v1708_v58  ;;  %1449 = vmatprep.subr.bf16.mxu1 %v1708_v58 }
  0xfc   : > { %1442 = vmatpush3.bf16.msra.mxu0 %v1708_v58 }
  0xfd   : > { %1450 = vmatpush3.bf16.msra.mxu1 %v1708_v58  ;;  %1455 = vmatprep.subr.bf16.mxu0 %v1710_v61 }
  0xfe   : > { %1463 = vmatprep.subr.bf16.mxu1 %v1710_v61 }
  0xff   : > { %1444 = vmatmul.mubr.msk.bf16.vlgmr.msra.gmra.mrb[8].mxu0 %vm490_vm5, %v656_v24 }
 0x100   : > { %1452 = vmatmul.mubr.msk.bf16.vlgmr.msra.gmra.mrb[8].mxu1 %vm490_vm5, %v741_v28  ;;  %1456 = vmatpush3.bf16.msra.mxu0 %v1710_v61 }
 0x101   : > { %1459 = vmatprep.mubr.msk.bf16.mxu0 %vm490_vm5, %v825_v29  ;;  %1464 = vmatpush3.bf16.msra.mxu1 %v1710_v61 }
 0x102   : > { %1467 = vmatprep.mubr.msk.bf16.mxu1 %vm490_vm5, %v910_v32  ;;  %1457 = vmatprep.subr.bf16.mxu0 %v1708_v58 }
 0x103   : > { %1465 = vmatprep.subr.bf16.mxu1 %v1708_v58 }
 0x104   : > { %1458 = vmatpush3.bf16.msra.mxu0 %v1708_v58 }
 0x105   : > { %1466 = vmatpush3.bf16.msra.mxu1 %v1708_v58  ;;  %1471 = vmatprep.subr.bf16.mxu0 %v1710_v61 }
 0x106   : > { %1479 = vmatprep.subr.bf16.mxu1 %v1710_v61 }
 0x107   : > { %1460 = vmatmul.mubr.msk.bf16.vlgmr.msra.gmra.mrb[12].mxu0 %vm490_vm5, %v826_v41 }
 0x108   : > { %1468 = vmatmul.mubr.msk.bf16.vlgmr.msra.gmra.mrb[12].mxu1 %vm490_vm5, %v911_v44  ;;  %1472 = vmatpush3.bf16.msra.mxu0 %v1710_v61 }
 0x109   : > { %1475 = vmatprep.mubr.msk.bf16.mxu0 %vm490_vm5, %v995_v45  ;;  %1480 = vmatpush3.bf16.msra.mxu1 %v1710_v61 }
 0x10a   : > { %1473 = vmatprep.subr.bf16.mxu0 %v1708_v58  ;;  %1481 = vmatprep.subr.bf16.mxu1 %v1708_v58 }
 0x10b   : > { %1483 = vmatprep.mubr.msk.bf16.mxu1 %vm490_vm5, %v1080_v46 }
 0x10c   : > { %1474 = vmatpush3.bf16.msra.mxu0 %v1708_v58 }
 0x10d   : > { %1482 = vmatpush3.bf16.msra.mxu1 %v1708_v58 }
 0x10f   : > { %1476 = vmatmul.mubr.msk.bf16.vlgmr.msra.gmra.mrb[16].mxu0 %vm490_vm5, %v996_v23 }
 0x110   : > { %1484 = vmatmul.mubr.msk.bf16.vlgmr.msra.gmra.mrb[16].mxu1 %vm490_vm5, %v1081_v51 }
 0x1ca   : > { %v1429_v52 = vpop.f32.mrb[4].mxu0  ;;  %v1437_v53 = vpop.f32.mrb[4].mxu1 }
 0x1cb   : > { %v629_v54 = vmax.f32 %v1429_v52, %v1437_v53  ;;  %v531_v55 = vpop.f32.mrb[5].mxu0  ;;  %v612_v56 = vpop.f32.mrb[5].mxu1  ;;  %v1341_v53 = vld [vmem:[%s1879_s5] ss:$0 sm:$0xff] }
 0x1cc   : > { %v627_v57 = vmax.f32 %v531_v55, %v612_v56  ;;  %v1430_v59 = vpop.f32.mrb[6].mxu0  ;;  %v1438_v26 = vpop.f32.mrb[6].mxu1 }
 0x1cd   : > { %v630_v60 = vmax.f32 %v1430_v59, %v1438_v26  ;;  %v534_v61 = vpop.f32.mrb[7].mxu0  ;;  %v615_v62 = vpop.f32.mrb[7].mxu1 }
 0x1ce   : > { %v628_v63 = vmax.f32 %v534_v61, %v615_v62 }
 0x1d2   : > { %v1445_v0 = vpop.f32.mrb[8].mxu0 }
 0x1d3   : > { %v714_v1 = vmax.f32 %v629_v54, %v1445_v0  ;;  %v1453_v58 = vpop.f32.mrb[8].mxu1  ;;  %v697_v2 = vpop.f32.mrb[9].mxu0 }
 0x1d4   : > { %v712_v3 = vmax.f32 %v627_v57, %v697_v2  ;;  %v782_v4 = vpop.f32.mrb[9].mxu1  ;;  %v1446_v5 = vpop.f32.mrb[10].mxu0 }
 0x1d5   : > { %v799_v6 = vmax.f32 %v714_v1, %v1453_v58  ;;  %v715_v7 = vmax.f32 %v630_v60, %v1446_v5  ;;  %v1454_v8 = vpop.f32.mrb[10].mxu1  ;;  %v700_v10 = vpop.f32.mrb[11].mxu0 }
 0x1d6   : > { %v797_v11 = vmax.f32 %v712_v3, %v782_v4  ;;  %v713_v15 = vmax.f32 %v628_v63, %v700_v10  ;;  %v785_v16 = vpop.f32.mrb[11].mxu1 }
 0x1d7   : > { %v800_v17 = vmax.f32 %v715_v7, %v1454_v8 }
 0x1d8   : > { %v798_v18 = vmax.f32 %v713_v15, %v785_v16 }
 0x1da   : > { %v1461_v19 = vpop.f32.mrb[12].mxu0 }
 0x1db   : > { %v884_v20 = vmax.f32 %v799_v6, %v1461_v19  ;;  %v1469_v21 = vpop.f32.mrb[12].mxu1  ;;  %v867_v22 = vpop.f32.mrb[13].mxu0 }
 0x1dc   : > { %v882_v24 = vmax.f32 %v797_v11, %v867_v22  ;;  %v952_v25 = vpop.f32.mrb[13].mxu1  ;;  %v1462_v27 = vpop.f32.mrb[14].mxu0 }
 0x1dd   : > { %v969_v28 = vmax.f32 %v884_v20, %v1469_v21  ;;  %v885_v29 = vmax.f32 %v800_v17, %v1462_v27  ;;  %v1470_v30 = vpop.f32.mrb[14].mxu1  ;;  %v870_v31 = vpop.f32.mrb[15].mxu0 }
 0x1de   : > { %v967_v32 = vmax.f32 %v882_v24, %v952_v25  ;;  %v883_v33 = vmax.f32 %v798_v18, %v870_v31  ;;  %v955_v34 = vpop.f32.mrb[15].mxu1 }
 0x1df   : > { %v970_v35 = vmax.f32 %v885_v29, %v1470_v30 }
 0x1e0   : > { %v968_v36 = vmax.f32 %v883_v33, %v955_v34 }
 0x1e2   : > { %v1477_v37 = vpop.f32.mrb[16].mxu0 }
 0x1e3   : > { %v1054_v38 = vmax.f32 %v969_v28, %v1477_v37  ;;  %v1485_v39 = vpop.f32.mrb[16].mxu1  ;;  %v1037_v40 = vpop.f32.mrb[17].mxu0 }
 0x1e4   : > { %v1052_v41 = vmax.f32 %v967_v32, %v1037_v40  ;;  %v1122_v42 = vpop.f32.mrb[17].mxu1  ;;  %v1478_v43 = vpop.f32.mrb[18].mxu0 }
 0x1e5   : > { %v1139_v44 = vmax.f32 %v1054_v38, %v1485_v39  ;;  %v1055_v45 = vmax.f32 %v970_v35, %v1478_v43  ;;  %v1486_v46 = vpop.f32.mrb[18].mxu1  ;;  %v1040_v47 = vpop.f32.mrb[19].mxu0 }
 0x1e6   : > { %v1137_v49 = vmax.f32 %v1052_v41, %v1122_v42  ;;  %v1053_v50 = vmax.f32 %v968_v36, %v1040_v47  ;;  %v1125_v23 = vpop.f32.mrb[19].mxu1 }
 0x1e7   : > { %v1143_v51 = vadd.f32 %v1738_v9, %v1139_v44  ;;  %v1140_v52 = vmax.f32 %v1055_v45, %v1486_v46 }
 0x1e8   : > { %v1141_v54 = vadd.f32 %v1137_v49, %v1749_v12  ;;  %v1138_v55 = vmax.f32 %v1053_v50, %v1125_v23 }
 0x1e9   : > { %v1154_v56 = vmul.f32 %v1340_v48, %v1143_v51  ;;  %v1144_v57 = vadd.f32 %v1756_v13, %v1140_v52 }
 0x1ea   : > { %v1152_v59 = vmul.f32 %v1340_v48, %v1141_v54  ;;  %v1142_v26 = vadd.f32 %v1138_v55, %v1763_v14 }
 0x1eb   : > { %v1165_v60 = vadd.f32 %v1341_v53, %v1154_v56  ;;  %v1155_v61 = vmul.f32 %v1340_v48, %v1144_v57 }
 0x1ec   : > { %v1163_v62 = vadd.f32 %v1341_v53, %v1152_v59  ;;  %v1153_v63 = vmul.f32 %v1340_v48, %v1142_v26 }
 0x1ed   : > { %vm1169_vm5 = vcmp.gt.f32.partialorder %v1165_v60, 0.0  ;;  %v1173_v9 = vmul.f32 0.2, %v1165_v60  ;;  %v1166_v0 = vadd.f32 %v1341_v53, %v1155_v61 }
 0x1ee   : > { %vm1167_vm3 = vcmp.gt.f32.partialorder %v1163_v62, 0.0  ;;  %v1171_v1 = vmul.f32 0.2, %v1163_v62  ;;  %v1164_v58 = vadd.f32 %v1341_v53, %v1153_v63 }
 0x1ef   : > { %v1177_v12 = vsel %vm1169_vm5, %v1165_v60, %v1173_v9  ;;  %vm1170_vm6 = vcmp.gt.f32.partialorder %v1166_v0, 0.0  ;;  %v1174_v13 = vmul.f32 0.2, %v1166_v0 }
 0x1f0   : > { %v1353_v14 = vpack.c.bf16 %v1177_v12, %v1177_v12  ;;  %v1175_v2 = vsel %vm1167_vm3, %v1163_v62, %v1171_v1  ;;  %vm1168_vm7 = vcmp.gt.f32.partialorder %v1164_v58, 0.0  ;;  %v1172_v3 = vmul.f32 0.2, %v1164_v58 }
 0x1f1   : > { %v1351_v4 = vpack.c.bf16 %v1175_v2, %v1175_v2  ;;  %v1178_v5 = vsel %vm1170_vm6, %v1166_v0, %v1174_v13 }
 0x1f2   : > { %1198 = vst.msk [vmem:[%s271_s8 + $0x8] sm:$0xf] %vm1195_vm4, %v1353_v14  ;;  %v1354_v6 = vpack.c.bf16 %v1178_v5, %v1178_v5  ;;  %v1176_v7 = vsel %vm1168_vm7, %v1164_v58, %v1172_v3 }
 0x1f3   : > { %1196 = vst.msk [vmem:[%s271_s8] sm:$0xf] %vm1195_vm4, %v1351_v4  ;;  %v1352_v8 = vpack.c.bf16 %v1176_v7, %v1176_v7 }
 0x1f4   : > { %1199 = vst.msk [vmem:[%s271_s8 + $0xc] sm:$0xf] %vm1195_vm4, %v1354_v6 }
 0x1f5   : > { %1197 = vst.msk [vmem:[%s271_s8 + $0x4] sm:$0xf] %vm1195_vm4, %v1352_v8 }
 0x1f6 PF: > { %s16_s21 = sadd.s32 1, %s1536_s21  }
 0x1f7   : > { %p13_p4 = scmp.ge.s32.totalorder %s16_s21, 4  }
 0x1f9   :  { %15 = sbr.rel (!%p13_p4) target bundleno = 1 (0x1), region = 77 }

// kernel: dgcnn_forward.16
= control target key start
LH: loop header
LB: loop body
LE: loop exit
PB: predicated region body
PF: predicated region fallthrough
CT: control target
= control target key end

     0   :  { %s1749_s21 = smov 0   ;;  %s2132_s0 = inlined_call_operand.vmem [shape: s32[2,32,8], index: 0, kind: input, shape index: {}]   ;;  %s2133_s1 = inlined_call_operand.vmem [shape: bf16[2,32,128], index: 1, kind: input, shape index: {}]   ;;  %s2134_s2 = inlined_call_operand.vmem [shape: bf16[128,256], index: 2, kind: input, shape index: {}]   ;;  %s2135_s3 = inlined_call_operand.vmem [shape: bf16[128,256], index: 3, kind: input, shape index: {}]   ;;  %s2136_s4 = inlined_call_operand.vmem [shape: f32[1,256], index: 4, kind: input, shape index: {}]   ;;  %s2137_s5 = inlined_call_operand.vmem [shape: f32[1,256], index: 5, kind: input, shape index: {}]   ;;  %s2138_s6 = inlined_call_operand.vmem [shape: bf16[2,32,256], index: 6, kind: output, shape index: {}]  }
   0x1 LB: > { %s1501_s22 = sadd.s32 4294967295, %s1703_s21   ;;  %p1505_p0 = scmp.ge.s32.totalorder %s1703_s21, 1  ;;  %s1703_s21 = sphi %s1749_s21, %s16_s21  }
   0x2   : > { %p222_p1 = scmp.lt.s32.totalorder %s1703_s21, 3 }
   0x4   : > { %p223_p2 = pnand %p1505_p0, %p222_p1 }
   0x5   : > { %v1647_v0 = vld [vmem:[%s2134_s2 + $0x4] ss:$8 sps:$4 sm:$0xff] (!%p223_p2)   ;;  %p257_p3 = scmp.lt.s32.totalorder (!%p223_p2), %s1501_s22, 1  ;;  %v1649_v1 = vld [vmem:[%s2134_s2] ss:$8 sps:$4 sm:$0xff] (!%p223_p2)   ;;  %v1705_v2 = vmov (!%p223_p2), 0   ;;  %v595_v57 = vlaneseq (!%p223_p2) }
   0x6   : > { %226 = sbr.rel (%p223_p2) target bundleno = 557 (0x22d), region = 44  ;;  %417 = vmatprep.mubr.bf16.mxu0 (!%p223_p2), %v1705_v2  ;;  %1624 = vset.pattern.permute.xlu0 (!%p223_p2), %v1705_v2  ;;  %v1650_v3 = vld [vmem:[%s2134_s2 + $0x14] ss:$8 sps:$4 sm:$0xff] (!%p223_p2)   ;;  %v1706_v4 = vmov (!%p223_p2), 1   ;;  %v1652_v5 = vld [vmem:[%s2134_s2 + $0x10] ss:$8 sps:$4 sm:$0xff] (!%p223_p2)  }
   0x7   : > { %385 = vmatprep.subr.bf16.mxu0 (!%p223_p2), %v1647_v0  ;;  %1625 = vset.pattern.permute.xlu1 (!%p223_p2), %v1706_v4  ;;  %v1653_v6 = vld [vmem:[%s2134_s2 + $0x24] ss:$8 sps:$4 sm:$0xff] (!%p223_p2)   ;;  %v1655_v7 = vld [vmem:[%s2134_s2 + $0x20] ss:$8 sps:$4 sm:$0xff] (!%p223_p2)   ;;  %v1656_v8 = vld [vmem:[%s2134_s2 + $0x34] ss:$8 sps:$4 sm:$0xff] (!%p223_p2)  }
   0x8   : > { %386 = vmatpush1.bf16.msra.mxu0 (!%p223_p2), %v1649_v1  ;;  %566 = vmatprep.mubr.bf16.mxu1 (!%p223_p2), %v1705_v2  ;;  %v1658_v9 = vld [vmem:[%s2134_s2 + $0x30] ss:$8 sps:$4 sm:$0xff] (!%p223_p2)   ;;  %v1659_v10 = vld [vmem:[%s2134_s2 + $0x44] ss:$8 sps:$4 sm:$0xff] (!%p223_p2)   ;;  %v1661_v12 = vld [vmem:[%s2134_s2 + $0x40] ss:$8 sps:$4 sm:$0xff] (!%p223_p2)  }
   0x9   : > { %387 = vmatprep.subr.bf16.mxu0 (!%p223_p2), %v1650_v3  ;;  %v1673_v14 = vld [vmem:[%s2135_s3 + $0x4] ss:$8 sps:$4 sm:$0xff] (!%p223_p2)   ;;  %v1675_v15 = vld [vmem:[%s2135_s3] ss:$8 sps:$4 sm:$0xff] (!%p223_p2)   ;;  %v1662_v16 = vld [vmem:[%s2134_s2 + $0x54] ss:$8 sps:$4 sm:$0xff] (!%p223_p2)  }
   0xa   : > { %534 = vmatprep.subr.bf16.mxu1 (!%p223_p2), %v1673_v14  ;;  %v1676_v17 = vld [vmem:[%s2135_s3 + $0x14] ss:$8 sps:$4 sm:$0xff] (!%p223_p2)   ;;  %v1664_v18 = vld [vmem:[%s2134_s2 + $0x50] ss:$8 sps:$4 sm:$0xff] (!%p223_p2)   ;;  %v1679_v22 = vld [vmem:[%s2135_s3 + $0x24] ss:$8 sps:$4 sm:$0xff] (!%p223_p2)  }
   0xb   : > { %535 = vmatpush1.bf16.msra.mxu1 (!%p223_p2), %v1675_v15  ;;  %v1678_v21 = vld [vmem:[%s2135_s3 + $0x10] ss:$8 sps:$4 sm:$0xff] (!%p223_p2)   ;;  %v1665_v23 = vld [vmem:[%s2134_s2 + $0x64] ss:$8 sps:$4 sm:$0xff] (!%p223_p2)   ;;  %v1667_v24 = vld [vmem:[%s2134_s2 + $0x60] ss:$8 sps:$4 sm:$0xff] (!%p223_p2)  }
   0xc   : > { %388 = vmatpush1.bf16.msra.mxu0 (!%p223_p2), %v1652_v5  ;;  %536 = vmatprep.subr.bf16.mxu1 (!%p223_p2), %v1676_v17  ;;  %v1668_v25 = vld [vmem:[%s2134_s2 + $0x74] ss:$8 sps:$4 sm:$0xff] (!%p223_p2)   ;;  %v1681_v26 = vld [vmem:[%s2135_s3 + $0x20] ss:$8 sps:$4 sm:$0xff] (!%p223_p2)   ;;  %v1670_v28 = vld [vmem:[%s2134_s2 + $0x70] ss:$8 sps:$4 sm:$0xff] (!%p223_p2)  }
   0xd   : > { %s2140_s22 = smov (!%p257_p3, %s1501_s22), 1  ;;  %389 = vmatprep.subr.bf16.mxu0 %v1653_v6  ;;  %v1682_v27 = vld [vmem:[%s2135_s3 + $0x34] ss:$8 sps:$4 sm:$0xff]   ;;  %v1684_v29 = vld [vmem:[%s2135_s3 + $0x30] ss:$8 sps:$4 sm:$0xff]   ;;  %v1707_v31 = vmov 2  }
   0xe   : > { %s1600_s9 = sshll.u32 %s2140_s22, 5  ;;  %s1601_s10 = sshll.u32 %s2140_s22, 4  ;;  %v1685_v32 = vld [vmem:[%s2135_s3 + $0x44] ss:$8 sps:$4 sm:$0xff]   ;;  %v1687_v33 = vld [vmem:[%s2135_s3 + $0x40] ss:$8 sps:$4 sm:$0xff]  }
   0xf   : > { %s261_s17 = scalar_lea.vmem %s2132_s0, %s1600_s9  ;;  %s1793_s20 = scalar_lea.vmem %s2133_s1, %s1601_s10  ;;  %537 = vmatpush1.bf16.msra.mxu1 %v1678_v21  ;;  %v1688_v34 = vld [vmem:[%s2135_s3 + $0x54] ss:$8 sps:$4 sm:$0xff]   ;;  %v1708_v35 = vmov 3   ;;  %v1690_v37 = vld [vmem:[%s2135_s3 + $0x50] ss:$8 sps:$4 sm:$0xff]   ;;  %v1709_v41 = vmov 4  }
  0x10   : > { %390 = vmatpush1.bf16.msra.mxu0 %v1655_v7  ;;  %v1801_v11 = vld [vmem:[%s261_s17] sm:$0xff]  ;;  %v1807_v13 = vld [vmem:[%s261_s17 + $0x8] sm:$0xff]  ;;  %v1826_v19 = vld [vmem:[%s261_s17 + $0x18] sm:$0xff]  ;;  %538 = vmatprep.subr.bf16.mxu1 %v1679_v22  ;;  %v1710_v43 = vmov 5   ;;  %v1711_v44 = vmov 6   ;;  %v1712_v45 = vmov 7   ;;  %s2117_s15 = scalar_lea.vmem %s2138_s6, %s1600_s9 }
  0x11   : > { %391 = vmatprep.subr.bf16.mxu0 %v1656_v8  ;;  %684 = vperm.xlu1 %1625, %v1801_v11   ;;  %v1829_v20 = vld [vmem:[%s261_s17 + $0x10] sm:$0xff]  ;;  %v1671_v30 = vld [vmem:[%s1793_s20] sm:$0xff]   ;;  %v1672_v36 = vld [vmem:[%s1793_s20 + $0x8] sm:$0xff]   ;;  %v1932_v0 = vand.u32 127, %v595_v57  ;;  %vm623_vm4 = vcmask 261120  }
  0x12   : > { %598 = vperm.xlu0 %1624, %v1801_v11   ;;  %v1691_v38 = vld [vmem:[%s2135_s3 + $0x64] ss:$8 sps:$4 sm:$0xff]   ;;  %v1693_v39 = vld [vmem:[%s2135_s3 + $0x60] ss:$8 sps:$4 sm:$0xff]   ;;  %v1694_v40 = vld [vmem:[%s2135_s3 + $0x74] ss:$8 sps:$4 sm:$0xff]  }
  0x13   : > { %539 = vmatpush1.bf16.msra.mxu1 %v1681_v26  ;;  %v1696_v42 = vld [vmem:[%s2135_s3 + $0x70] ss:$8 sps:$4 sm:$0xff]  }
  0x14   : > { %392 = vmatpush1.bf16.msra.mxu0 %v1658_v9  ;;  %540 = vmatprep.subr.bf16.mxu1 %v1682_v27 }
  0x15   : > { %393 = vmatprep.subr.bf16.mxu0 %v1659_v10  ;;  %687 = vperm.xlu1 %1625, %v1807_v13   ;;  %v1713_v10 = vmov 0.0  }
  0x16   : > { %601 = vperm.xlu0 %1624, %v1807_v13  }
  0x17   : > { %541 = vmatpush1.bf16.msra.mxu1 %v1684_v29 }
  0x18   : > { %394 = vmatpush1.bf16.msra.mxu0 %v1661_v12  ;;  %542 = vmatprep.subr.bf16.mxu1 %v1685_v32 }
  0x19   : > { %395 = vmatprep.subr.bf16.mxu0 %v1662_v16  ;;  %1626 = vset.pattern.permute.xlu1 %v1705_v2 }
  0x1a   : > { %604 = vperm.xlu0 %1624, %v1829_v20   ;;  %607 = vperm.xlu1 %1626, %v1826_v19  }
  0x1b   : > { %543 = vmatpush1.bf16.msra.mxu1 %v1687_v33 }
  0x1c   : > { %396 = vmatpush1.bf16.msra.mxu0 %v1664_v18  ;;  %544 = vmatprep.subr.bf16.mxu1 %v1688_v34 }
  0x1d   : > { %397 = vmatprep.subr.bf16.mxu0 %v1665_v23 }
  0x1e   : > { %1627 = vset.pattern.permute.xlu0 %v1706_v4  ;;  %1628 = vset.pattern.permute.xlu1 %v1706_v4 }
  0x1f   : > { %690 = vperm.xlu0 %1627, %v1829_v20   ;;  %693 = vperm.xlu1 %1628, %v1826_v19  }
  0x20   : > { %398 = vmatpush1.bf16.msra.mxu0 %v1667_v24  ;;  %545 = vmatpush1.bf16.msra.mxu1 %v1690_v37 }
  0x21   : > { %399 = vmatprep.subr.bf16.mxu0 %v1668_v25  ;;  %546 = vmatprep.subr.bf16.mxu1 %v1691_v38 }
  0x23   : > { %1630 = vset.pattern.permute.xlu0 %v1707_v31  ;;  %1629 = vset.pattern.permute.xlu1 %v1707_v31 }
  0x24   : > { %400 = vmatpush1.bf16.msra.mxu0 %v1670_v28  ;;  %777 = vperm.xlu1 %1629, %v1801_v11  }
  0x25   : > { %780 = vperm.xlu0 %1630, %v1807_v13   ;;  %547 = vmatpush1.bf16.msra.mxu1 %v1693_v39 }
  0x26   : > { %548 = vmatprep.subr.bf16.mxu1 %v1694_v40 }
  0x27   : > { %418 = vmatmul.mubr.bf16.vlgmr.msra.gmra.mrb[0].mxu0 %v1671_v30 }
  0x28   : > { %427 = vmatprep.mubr.bf16.mxu0 %v1705_v2  ;;  %1631 = vset.pattern.permute.xlu1 %v1708_v35 }
  0x29   : > { %783 = vperm.xlu0 %1630, %v1829_v20   ;;  %870 = vperm.xlu1 %1631, %v1801_v11  }
  0x2a   : > { %549 = vmatpush1.bf16.msra.mxu1 %v1696_v42 }
  0x2d   : > { %1633 = vset.pattern.permute.xlu0 %v1708_v35  ;;  %873 = vperm.xlu1 %1631, %v1807_v13  }
  0x2e   : > { %876 = vperm.xlu0 %1633, %v1829_v20   ;;  %567 = vmatmul.mubr.bf16.vlgmr.msra.gmra.mrb[0].mxu1 %v1671_v30 }
  0x2f   : > { %428 = vmatmul.mubr.bf16.gmra.mrb[4].mxu0 %v1672_v36  ;;  %576 = vmatprep.mubr.bf16.mxu1 %v1705_v2 }
  0x30   : > { %662 = vmatprep.mubr.bf16.mxu0 %v1705_v2 }
  0x31   : > { %1632 = vset.pattern.permute.xlu1 %v1707_v31 }
  0x32   : > { %1636 = vset.pattern.permute.xlu0 %v1709_v41  ;;  %786 = vperm.xlu1 %1632, %v1826_v19  }
  0x33   : > { %966 = vperm.xlu0 %1636, %v1807_v13  }
  0x36   : > { %1634 = vset.pattern.permute.xlu1 %v1708_v35  ;;  %577 = vmatmul.mubr.bf16.gmra.mrb[4].mxu1 %v1672_v36 }
  0x37   : > { %969 = vperm.xlu0 %1636, %v1829_v20   ;;  %879 = vperm.xlu1 %1634, %v1826_v19  }
  0x38   : > { %747 = vmatprep.mubr.bf16.mxu1 %v1705_v2 }
  0x3b   : > { %1639 = vset.pattern.permute.xlu0 %v1710_v43  ;;  %1635 = vset.pattern.permute.xlu1 %v1709_v41 }
  0x3c   : > { %1062 = vperm.xlu0 %1639, %v1829_v20   ;;  %963 = vperm.xlu1 %1635, %v1801_v11  }
  0x40   : > { %1642 = vset.pattern.permute.xlu0 %v1711_v44  ;;  %1637 = vset.pattern.permute.xlu1 %v1710_v43 }
  0x41   : > { %1152 = vperm.xlu0 %1642, %v1807_v13   ;;  %1056 = vperm.xlu1 %1637, %v1801_v11  }
  0x45   : > { %1155 = vperm.xlu0 %1642, %v1829_v20   ;;  %1059 = vperm.xlu1 %1637, %v1807_v13  }
  0x49   : > { %1645 = vset.pattern.permute.xlu0 %v1712_v45  ;;  %1638 = vset.pattern.permute.xlu1 %v1709_v41 }
  0x4a   : > { %1248 = vperm.xlu0 %1645, %v1829_v20   ;;  %972 = vperm.xlu1 %1638, %v1826_v19  }
  0x4e   : > { %1640 = vset.pattern.permute.xlu1 %v1710_v43 }
  0x4f   : > { %1065 = vperm.xlu1 %1640, %v1826_v19  }
  0x53   : > { %1641 = vset.pattern.permute.xlu1 %v1711_v44 }
  0x54   : > { %1149 = vperm.xlu1 %1641, %v1801_v11  }
  0x58   : > { %1643 = vset.pattern.permute.xlu1 %v1712_v45 }
  0x59   : > { %1242 = vperm.xlu1 %1643, %v1801_v11  }
  0x5d   : > { %1245 = vperm.xlu1 %1643, %v1807_v13  }
  0x61   : > { %1644 = vset.pattern.permute.xlu1 %v1711_v44 }
  0x62   : > { %1158 = vperm.xlu1 %1644, %v1826_v19  }
  0x66   : > { %1646 = vset.pattern.permute.xlu1 %v1712_v45 }
  0x67   : > { %1251 = vperm.xlu1 %1646, %v1826_v19  }
  0x90   : > { %v685_v46 = vpop.permute.xlu1 %684 }
  0x91   : > { %v599_v53 = vpop.permute.xlu0 %598  ;;  %vm695_vm0 = vcmp.eq.s32.totalorder %v685_v46, %v1932_v0 }
  0x92   : > { %vm609_vm2 = vcmp.eq.s32.totalorder %v599_v53, %v1932_v0  ;;  %v1552_v11 = vsel %vm695_vm0, 1.0, %v1713_v10 }
  0x93   : > { %v1546_v13 = vsel %vm609_vm2, 1.0, %v1713_v10 }
  0x94   : > { %v688_v47 = vpop.permute.xlu1 %687 }
  0x95   : > { %v602_v59 = vpop.permute.xlu0 %601  ;;  %vm696_vm1 = vcmp.eq.s32.totalorder %v688_v47, %v1932_v0 }
  0x96   : > { %vm610_vm3 = vcmp.eq.s32.totalorder %v602_v59, %v1932_v0  ;;  %v1553_v12 = vsel %vm696_vm1, 1.0, %v1713_v10 }
  0x97   : > { %v1547_v14 = vsel %vm610_vm3, 1.0, %v1713_v10  ;;  %v707_v16 = vpack.c.bf16 %v1553_v12, %v1552_v11 }
  0x98   : > { %v621_v17 = vpack.c.bf16 %v1547_v14, %v1546_v13 }
  0x99   : > { %v608_v48 = vpop.permute.xlu1 %607  ;;  %v605_v3 = vpop.permute.xlu0 %604 }
  0x9a   : > { %vm611_vm5 = vcmp.eq.s32.totalorder %v605_v3, %v1932_v0  ;;  %vm612_vm6 = vcmp.eq.s32.totalorder %v608_v48, %v1932_v0 }
  0x9b   : > { %v1549_v20 = vsel %vm612_vm6, 1.0, %v1713_v10  ;;  %v1548_v21 = vsel %vm611_vm5, 1.0, %v1713_v10 }
  0x9c   : > { %v622_v29 = vpack.c.bf16 %v1549_v20, %v1548_v21 }
  0x9e   : > { %v694_v49 = vpop.permute.xlu1 %693  ;;  %v691_v15 = vpop.permute.xlu0 %690 }
  0x9f   : > { %vm698_vm7 = vcmp.eq.s32.totalorder %v694_v49, %v1932_v0  ;;  %vm697_vm8 = vcmp.eq.s32.totalorder %v691_v15, %v1932_v0 }
  0xa0   : > { %v1555_v22 = vsel %vm698_vm7, 1.0, %v1713_v10  ;;  %v1554_v23 = vsel %vm697_vm8, 1.0, %v1713_v10 }
  0xa1   : > { %v708_v30 = vpack.c.bf16 %v1555_v22, %v1554_v23 }
  0xa3   : > { %v1917_v50 = vpop.permute.xlu1 %777 }
  0xa4   : > { %v781_v24 = vpop.permute.xlu0 %780  ;;  %vm788_vm9 = vcmp.eq.s32.totalorder %v1917_v50, %v1932_v0 }
  0xa5   : > { %vm789_vm10 = vcmp.eq.s32.totalorder %v781_v24, %v1932_v0  ;;  %v1558_v34 = vsel %vm788_vm9, 1.0, %v1713_v10 }
  0xa6   : > { %v1559_v35 = vsel %vm789_vm10, 1.0, %v1713_v10 }
  0xa7   : > { %v800_v42 = vpack.c.bf16 %v1559_v35, %v1558_v34 }
  0xa8   : > { %v1919_v51 = vpop.permute.xlu1 %870  ;;  %v784_v31 = vpop.permute.xlu0 %783 }
  0xa9   : > { %vm881_vm11 = vcmp.eq.s32.totalorder %v1919_v51, %v1932_v0  ;;  %vm790_vm13 = vcmp.eq.s32.totalorder %v784_v31, %v1932_v0 }
  0xaa   : > { %v1564_v36 = vsel %vm881_vm11, 1.0, %v1713_v10  ;;  %v1560_v46 = vsel %vm790_vm13, 1.0, %v1713_v10 }
  0xac   : > { %v1921_v52 = vpop.permute.xlu1 %873 }
  0xad   : > { %vm882_vm12 = vcmp.eq.s32.totalorder %v1921_v52, %v1932_v0  ;;  %v877_v40 = vpop.permute.xlu0 %876 }
  0xae   : > { %v1565_v37 = vsel %vm882_vm12, 1.0, %v1713_v10  ;;  %vm883_vm0 = vcmp.eq.s32.totalorder %v877_v40, %v1932_v0 }
  0xaf   : > { %v893_v43 = vpack.c.bf16 %v1565_v37, %v1564_v36  ;;  %v1566_v48 = vsel %vm883_vm0, 1.0, %v1713_v10 }
  0xb1   : > { %v1923_v54 = vpop.permute.xlu1 %786 }
  0xb2   : > { %vm791_vm14 = vcmp.eq.s32.totalorder %v1923_v54, %v1932_v0  ;;  %v967_v49 = vpop.permute.xlu0 %966 }
  0xb3   : > { %v1561_v45 = vsel %vm791_vm14, 1.0, %v1713_v10  ;;  %vm975_vm1 = vcmp.eq.s32.totalorder %v967_v49, %v1932_v0 }
  0xb4   : > { %v801_v51 = vpack.c.bf16 %v1561_v45, %v1560_v46 }
  0xb6   : > { %v1929_v63 = vpop.permute.xlu1 %879  ;;  %v970_v53 = vpop.permute.xlu0 %969 }
  0xb7   : > { %vm884_vm15 = vcmp.eq.s32.totalorder %v1929_v63, %v1932_v0  ;;  %vm976_vm6 = vcmp.eq.s32.totalorder %v970_v53, %v1932_v0 }
  0xb8   : > { %v1567_v47 = vsel %vm884_vm15, 1.0, %v1713_v10 }
  0xb9   : > { %v894_v52 = vpack.c.bf16 %v1567_v47, %v1566_v48 }
  0xbb   : > { %v1944_v8 = vpop.permute.xlu1 %963 }
  0xbc   : > { %vm974_vm2 = vcmp.eq.s32.totalorder %v1944_v8, %v1932_v0 }
  0xbd   : > { %v1570_v54 = vsel %vm974_vm2, 1.0, %v1713_v10 }
  0xc0   : > { %v1959_v18 = vpop.permute.xlu1 %1056 }
  0xc1   : > { %vm1067_vm3 = vcmp.eq.s32.totalorder %v1959_v18, %v1932_v0 }
  0xc4   : > { %v1984_v27 = vpop.permute.xlu1 %1059 }
  0xc5   : > { %vm1068_vm5 = vcmp.eq.s32.totalorder %v1984_v27, %v1932_v0 }
  0xc9   : > { %v2001_v32 = vpop.permute.xlu1 %972 }
  0xca   : > { %vm977_vm7 = vcmp.eq.s32.totalorder %v2001_v32, %v1932_v0 }
  0xcb   : > { %v1573_v3 = vsel %vm977_vm7, 1.0, %v1713_v10 }
  0xce   : > { %v1066_v44 = vpop.permute.xlu1 %1065 }
  0xcf   : > { %vm1070_vm8 = vcmp.eq.s32.totalorder %v1066_v44, %v1932_v0 }
  0xd3   : > { %v1150_v50 = vpop.permute.xlu1 %1149 }
  0xd4   : > { %vm1160_vm11 = vcmp.eq.s32.totalorder %v1150_v50, %v1932_v0 }
  0xd8   : > { %v1243_v59 = vpop.permute.xlu1 %1242 }
  0xd9   : > { %vm1253_vm12 = vcmp.eq.s32.totalorder %v1243_v59, %v1932_v0 }
  0xda   : > { %v1588_v13 = vsel %vm1253_vm12, 1.0, %v1713_v10 }
  0xfa   : > { %v419_v55 = vpop.f32.mrb[0].mxu0 }
  0xfb   : > { %v421_v56 = vpop.f32.mrb[1].mxu0 }
  0xfc   : > { %v423_v58 = vpop.f32.mrb[2].mxu0 }
  0xfd   : > { %v1925_v60 = vpack.c.bf16 %v423_v58, %v419_v55  ;;  %v425_v61 = vpop.f32.mrb[3].mxu0  ;;  %v1571_v55 = vsel %vm975_vm1, 1.0, %v1713_v10  ;;  %v1577_v58 = vsel %vm1068_vm5, 1.0, %v1713_v10 }
  0xfe   : > { %v1927_v62 = vpack.c.bf16 %v425_v61, %v421_v56  ;;  %v1576_v56 = vsel %vm1067_vm3, 1.0, %v1713_v10  ;;  %v1063_v61 = vpop.permute.xlu0 %1062 }
  0xff   : > { %v1079_v63 = vpack.c.bf16 %v1577_v58, %v1576_v56  ;;  %vm1069_vm9 = vcmp.eq.s32.totalorder %v1063_v61, %v1932_v0 }
 0x100   : > { %630 = vmatprep.subr.bf16.mxu0 %v1927_v62  ;;  %715 = vmatprep.subr.bf16.mxu1 %v1927_v62 }
 0x101   : > { %631 = vmatpush1.bf16.msra.mxu0 %v1925_v60  ;;  %716 = vmatpush1.bf16.msra.mxu1 %v1925_v60  ;;  %v1970_v19 = vpop.f32.mrb[0].mxu1 }
 0x102   : > { %v429_v1 = vpop.f32.mrb[4].mxu0  ;;  %v1978_v25 = vpop.f32.mrb[1].mxu1 }
 0x103   : > { %v431_v4 = vpop.f32.mrb[5].mxu0  ;;  %v1980_v26 = vpop.f32.mrb[2].mxu1 }
 0x104   : > { %v433_v5 = vpop.f32.mrb[6].mxu0  ;;  %v1986_v28 = vpop.f32.mrb[3].mxu1 }
 0x105   : > { %v1942_v6 = vpack.c.bf16 %v433_v5, %v429_v1  ;;  %v435_v7 = vpop.f32.mrb[7].mxu0  ;;  %v1246_v1 = vpop.permute.xlu1 %1245  ;;  %v1579_v5 = vsel %vm1070_vm8, 1.0, %v1713_v10 }
 0x106   : > { %v1946_v9 = vpack.c.bf16 %v435_v7, %v431_v4  ;;  %v1572_v4 = vsel %vm976_vm6, 1.0, %v1713_v10  ;;  %v1578_v7 = vsel %vm1069_vm9, 1.0, %v1713_v10  ;;  %v1153_v8 = vpop.permute.xlu0 %1152  ;;  %vm1254_vm13 = vcmp.eq.s32.totalorder %v1246_v1, %v1932_v0 }
 0x107   : > { %v1080_v11 = vpack.c.bf16 %v1579_v5, %v1578_v7  ;;  %vm1161_vm10 = vcmp.eq.s32.totalorder %v1153_v8, %v1932_v0  ;;  %v1589_v15 = vsel %vm1254_vm13, 1.0, %v1713_v10 }
 0x108   : > { %632 = vmatprep.subr.bf16.mxu0 %v1946_v9  ;;  %717 = vmatprep.subr.bf16.mxu1 %v1946_v9  ;;  %v1583_v14 = vsel %vm1161_vm10, 1.0, %v1713_v10  ;;  %v1265_v20 = vpack.c.bf16 %v1589_v15, %v1588_v13 }
 0x109   : > { %633 = vmatpush1.bf16.msra.mxu0 %v1942_v6  ;;  %718 = vmatpush1.bf16.msra.mxu1 %v1942_v6  ;;  %v2003_v33 = vpop.f32.mrb[4].mxu1 }
 0x10a   : > { %808 = vmatprep.subr.bf16.mxu0 %v1927_v62  ;;  %901 = vmatprep.subr.bf16.mxu1 %v1927_v62  ;;  %v2009_v38 = vpop.f32.mrb[5].mxu1  ;;  %v1156_v12 = vpop.permute.xlu0 %1155 }
 0x10b   : > { %v2011_v39 = vpop.f32.mrb[6].mxu1  ;;  %vm1162_vm1 = vcmp.eq.s32.totalorder %v1156_v12, %v1932_v0 }
 0x10c   : > { %1550 = vmatmul.mubr.msk.bf16.vlgmr.msra.gmra.mrb[8].mxu0 %vm623_vm4, %v621_v17  ;;  %1556 = vmatmul.mubr.msk.bf16.vlgmr.msra.gmra.mrb[8].mxu1 %vm623_vm4, %v707_v16  ;;  %v2013_v41 = vpop.f32.mrb[7].mxu1  ;;  %v1584_v24 = vsel %vm1162_vm1, 1.0, %v1713_v10 }
 0x10d   : > { %809 = vmatpush1.bf16.msra.mxu0 %v1925_v60  ;;  %902 = vmatpush1.bf16.msra.mxu1 %v1925_v60 }
 0x10e   : > { %810 = vmatprep.subr.bf16.mxu0 %v1946_v9  ;;  %903 = vmatprep.subr.bf16.mxu1 %v1946_v9  ;;  %v1249_v17 = vpop.permute.xlu0 %1248 }
 0x10f   : > { %672 = vmatprep.mubr.bf16.mxu0 %v1705_v2  ;;  %757 = vmatprep.mubr.bf16.mxu1 %v1705_v2  ;;  %vm1255_vm15 = vcmp.eq.s32.totalorder %v1249_v17, %v1932_v0 }
 0x110   : > { %v1590_v22 = vsel %vm1255_vm15, 1.0, %v1713_v10 }
 0x111   : > { %811 = vmatpush1.bf16.msra.mxu0 %v1942_v6  ;;  %904 = vmatpush1.bf16.msra.mxu1 %v1942_v6 }
 0x112   : > { %994 = vmatprep.subr.bf16.mxu0 %v1927_v62  ;;  %1087 = vmatprep.subr.bf16.mxu1 %v1927_v62 }
 0x114   : > { %1551 = vmatmul.mubr.msk.bf16.gmra.mrb[12].mxu0 %vm623_vm4, %v622_v29  ;;  %1557 = vmatmul.mubr.msk.bf16.gmra.mrb[12].mxu1 %vm623_vm4, %v708_v30 }
 0x115   : > { %840 = vmatprep.mubr.bf16.mxu0 %v1705_v2  ;;  %933 = vmatprep.mubr.bf16.mxu1 %v1705_v2 }
 0x11c   : > { %1562 = vmatmul.mubr.msk.bf16.vlgmr.msra.gmra.mrb[16].mxu0 %vm623_vm4, %v800_v42  ;;  %1568 = vmatmul.mubr.msk.bf16.vlgmr.msra.gmra.mrb[16].mxu1 %vm623_vm4, %v893_v43 }
 0x11d   : > { %995 = vmatpush1.bf16.msra.mxu0 %v1925_v60  ;;  %1088 = vmatpush1.bf16.msra.mxu1 %v1925_v60 }
 0x11e   : > { %996 = vmatprep.subr.bf16.mxu0 %v1946_v9  ;;  %1089 = vmatprep.subr.bf16.mxu1 %v1946_v9 }
 0x11f   : > { %850 = vmatprep.mubr.bf16.mxu0 %v1705_v2  ;;  %943 = vmatprep.mubr.bf16.mxu1 %v1705_v2 }
 0x121   : > { %997 = vmatpush1.bf16.msra.mxu0 %v1942_v6  ;;  %1090 = vmatpush1.bf16.msra.mxu1 %v1942_v6 }
 0x122   : > { %1180 = vmatprep.subr.bf16.mxu0 %v1927_v62  ;;  %1273 = vmatprep.subr.bf16.mxu1 %v1927_v62  ;;  %v986_v62 = vpack.c.bf16 %v1571_v55, %v1570_v54 }
 0x124   : > { %1563 = vmatmul.mubr.msk.bf16.gmra.mrb[20].mxu0 %vm623_vm4, %v801_v51  ;;  %1569 = vmatmul.mubr.msk.bf16.gmra.mrb[20].mxu1 %vm623_vm4, %v894_v52 }
 0x125   : > { %1026 = vmatprep.mubr.bf16.mxu0 %v1705_v2  ;;  %1119 = vmatprep.mubr.bf16.mxu1 %v1705_v2 }
 0x12c   : > { %1574 = vmatmul.mubr.msk.bf16.vlgmr.msra.gmra.mrb[24].mxu0 %vm623_vm4, %v986_v62  ;;  %1580 = vmatmul.mubr.msk.bf16.vlgmr.msra.gmra.mrb[24].mxu1 %vm623_vm4, %v1079_v63 }
 0x12d   : > { %1181 = vmatpush1.bf16.msra.mxu0 %v1925_v60  ;;  %1274 = vmatpush1.bf16.msra.mxu1 %v1925_v60  ;;  %v987_v60 = vpack.c.bf16 %v1573_v3, %v1572_v4 }
 0x12e   : > { %1182 = vmatprep.subr.bf16.mxu0 %v1946_v9  ;;  %1275 = vmatprep.subr.bf16.mxu1 %v1946_v9  ;;  %v1159_v9 = vpop.permute.xlu1 %1158 }
 0x12f   : > { %1036 = vmatprep.mubr.bf16.mxu0 %v1705_v2  ;;  %1129 = vmatprep.mubr.bf16.mxu1 %v1705_v2  ;;  %vm1163_vm0 = vcmp.eq.s32.totalorder %v1159_v9, %v1932_v0 }
 0x130   : > { %v1585_v23 = vsel %vm1163_vm0, 1.0, %v1713_v10 }
 0x131   : > { %1183 = vmatpush1.bf16.msra.mxu0 %v1942_v6  ;;  %1276 = vmatpush1.bf16.msra.mxu1 %v1942_v6  ;;  %v1582_v6 = vsel %vm1160_vm11, 1.0, %v1713_v10  ;;  %v1173_v29 = vpack.c.bf16 %v1585_v23, %v1584_v24 }
 0x132   : > { %v1252_v16 = vpop.permute.xlu1 %1251  ;;  %v1172_v18 = vpack.c.bf16 %v1583_v14, %v1582_v6 }
 0x133   : > { %vm1256_vm14 = vcmp.eq.s32.totalorder %v1252_v16, %v1932_v0 }
 0x134   : > { %1575 = vmatmul.mubr.msk.bf16.gmra.mrb[28].mxu0 %vm623_vm4, %v987_v60  ;;  %1581 = vmatmul.mubr.msk.bf16.gmra.mrb[28].mxu1 %vm623_vm4, %v1080_v11  ;;  %v1591_v21 = vsel %vm1256_vm14, 1.0, %v1713_v10 }
 0x135   : > { %1212 = vmatprep.mubr.bf16.mxu0 %v1705_v2  ;;  %1305 = vmatprep.mubr.bf16.mxu1 %v1705_v2  ;;  %v1266_v27 = vpack.c.bf16 %v1591_v21, %v1590_v22 }
 0x13c   : > { %1586 = vmatmul.mubr.msk.bf16.vlgmr.msra.gmra.mrb[32].mxu0 %vm623_vm4, %v1172_v18  ;;  %1592 = vmatmul.mubr.msk.bf16.vlgmr.msra.gmra.mrb[32].mxu1 %vm623_vm4, %v1265_v20 }
 0x13d   : > { %1222 = vmatprep.mubr.bf16.mxu0 %v1705_v2  ;;  %1315 = vmatprep.mubr.bf16.mxu1 %v1705_v2 }
 0x144   : > { %1587 = vmatmul.mubr.msk.bf16.gmra.mrb[36].mxu0 %vm623_vm4, %v1173_v29  ;;  %1593 = vmatmul.mubr.msk.bf16.gmra.mrb[36].mxu1 %vm623_vm4, %v1266_v27 }
 0x1df   : > { %v664_v30 = vpop.f32.mrb[8].mxu0  ;;  %v749_v0 = vpop.f32.mrb[8].mxu1 }
 0x1e0   : > { %v768_v31 = vmax.f32 %v664_v30, %v749_v0  ;;  %v666_v32 = vpop.f32.mrb[9].mxu0  ;;  %v751_v34 = vpop.f32.mrb[9].mxu1 }
 0x1e1   : > { %v769_v35 = vmax.f32 %v666_v32, %v751_v34  ;;  %v668_v36 = vpop.f32.mrb[10].mxu0  ;;  %v753_v37 = vpop.f32.mrb[10].mxu1 }
 0x1e2   : > { %v770_v40 = vmax.f32 %v668_v36, %v753_v37  ;;  %v670_v2 = vpop.f32.mrb[11].mxu0  ;;  %v755_v42 = vpop.f32.mrb[11].mxu1 }
 0x1e3   : > { %v771_v43 = vmax.f32 %v670_v2, %v755_v42 }
 0x1e7   : > { %v674_v44 = vpop.f32.mrb[12].mxu0  ;;  %v759_v10 = vpop.f32.mrb[12].mxu1 }
 0x1e8   : > { %v772_v45 = vmax.f32 %v674_v44, %v759_v10  ;;  %v676_v46 = vpop.f32.mrb[13].mxu0  ;;  %v761_v47 = vpop.f32.mrb[13].mxu1 }
 0x1e9   : > { %v773_v48 = vmax.f32 %v676_v46, %v761_v47  ;;  %v678_v49 = vpop.f32.mrb[14].mxu0  ;;  %v763_v50 = vpop.f32.mrb[14].mxu1 }
 0x1ea   : > { %v774_v51 = vmax.f32 %v678_v49, %v763_v50  ;;  %v680_v52 = vpop.f32.mrb[15].mxu0  ;;  %v765_v53 = vpop.f32.mrb[15].mxu1 }
 0x1eb   : > { %v775_v54 = vmax.f32 %v680_v52, %v765_v53 }
 0x1ef   : > { %v842_v55 = vpop.f32.mrb[16].mxu0  ;;  %v935_v56 = vpop.f32.mrb[16].mxu1 }
 0x1f0   : > { %v861_v58 = vmax.f32 %v768_v31, %v842_v55  ;;  %v844_v59 = vpop.f32.mrb[17].mxu0  ;;  %v937_v61 = vpop.f32.mrb[17].mxu1 }
 0x1f1   : > { %v862_v62 = vmax.f32 %v769_v35, %v844_v59  ;;  %v846_v63 = vpop.f32.mrb[18].mxu0  ;;  %v939_v1 = vpop.f32.mrb[18].mxu1 }
 0x1f2   : > { %v954_v3 = vmax.f32 %v861_v58, %v935_v56  ;;  %v863_v4 = vmax.f32 %v770_v40, %v846_v63  ;;  %v848_v5 = vpop.f32.mrb[19].mxu0  ;;  %v941_v7 = vpop.f32.mrb[19].mxu1 }
 0x1f3   : > { %v955_v8 = vmax.f32 %v862_v62, %v937_v61  ;;  %v864_v60 = vmax.f32 %v771_v43, %v848_v5  ;;  %v1345_v62 = vshrl.u32 %v595_v57, 7 }
 0x1f4   : > { %v956_v11 = vmax.f32 %v863_v4, %v939_v1 }
 0x1f5   : > { %v957_v9 = vmax.f32 %v864_v60, %v941_v7  ;;  %v1346_v5 = vsub.s32 0, %v1345_v62  ;;  %v1342_v60 = vld [vmem:[%s2136_s4] sm:$0x3] }
 0x1f7   : > { %v852_v12 = vpop.f32.mrb[20].mxu0  ;;  %v945_v6 = vpop.f32.mrb[20].mxu1 }
 0x1f8   : > { %v865_v13 = vmax.f32 %v772_v45, %v852_v12  ;;  %v854_v14 = vpop.f32.mrb[21].mxu0  ;;  %v947_v15 = vpop.f32.mrb[21].mxu1 }
 0x1f9   : > { %v866_v16 = vmax.f32 %v773_v48, %v854_v14  ;;  %v856_v17 = vpop.f32.mrb[22].mxu0  ;;  %v949_v18 = vpop.f32.mrb[22].mxu1 }
 0x1fa   : > { %v958_v20 = vmax.f32 %v865_v13, %v945_v6  ;;  %v867_v21 = vmax.f32 %v774_v51, %v856_v17  ;;  %v858_v22 = vpop.f32.mrb[23].mxu0  ;;  %v951_v23 = vpop.f32.mrb[23].mxu1  ;;  %v1362_v13 = vld [vmem:[%s2137_s5] sm:$0x3]  ;;  %v2104_v17 = vrot.slane %v1342_v60, %v1346_v5 }
 0x1fb   : > { %v959_v24 = vmax.f32 %v866_v16, %v947_v15  ;;  %v868_v27 = vmax.f32 %v775_v54, %v858_v22 }
 0x1fc   : > { %v960_v29 = vmax.f32 %v867_v21, %v949_v18 }
 0x1fd   : > { %v961_v30 = vmax.f32 %v868_v27, %v951_v23 }
 0x1ff   : > { %v1028_v0 = vpop.f32.mrb[24].mxu0  ;;  %v1121_v31 = vpop.f32.mrb[24].mxu1 }
 0x200   : > { %v1047_v32 = vmax.f32 %v954_v3, %v1028_v0  ;;  %v1030_v34 = vpop.f32.mrb[25].mxu0  ;;  %v1123_v35 = vpop.f32.mrb[25].mxu1 }
 0x201   : > { %v1048_v36 = vmax.f32 %v955_v8, %v1030_v34  ;;  %v1032_v37 = vpop.f32.mrb[26].mxu0  ;;  %v1125_v40 = vpop.f32.mrb[26].mxu1 }
 0x202   : > { %v1140_v2 = vmax.f32 %v1047_v32, %v1121_v31  ;;  %v1049_v42 = vmax.f32 %v956_v11, %v1032_v37  ;;  %v1034_v43 = vpop.f32.mrb[27].mxu0  ;;  %v1127_v44 = vpop.f32.mrb[27].mxu1  ;;  %v1350_v11 = vsub.s32 1, %v1345_v62 }
 0x203   : > { %v1141_v10 = vmax.f32 %v1048_v36, %v1123_v35  ;;  %v1050_v45 = vmax.f32 %v957_v9, %v1034_v43 }
 0x204   : > { %v1142_v46 = vmax.f32 %v1049_v42, %v1125_v40  ;;  %v1351_v23 = vrot.slane %v1342_v60, %v1350_v11  ;;  %v1371_v31 = vrot.slane %v1362_v13, %v1350_v11 }
 0x205   : > { %v1143_v47 = vmax.f32 %v1050_v45, %v1127_v44 }
 0x207   : > { %v1038_v48 = vpop.f32.mrb[28].mxu0  ;;  %v1131_v49 = vpop.f32.mrb[28].mxu1 }
 0x208   : > { %v1051_v50 = vmax.f32 %v958_v20, %v1038_v48  ;;  %v1040_v51 = vpop.f32.mrb[29].mxu0  ;;  %v1133_v52 = vpop.f32.mrb[29].mxu1 }
 0x209   : > { %v1052_v53 = vmax.f32 %v959_v24, %v1040_v51  ;;  %v1042_v54 = vpop.f32.mrb[30].mxu0  ;;  %v1135_v55 = vpop.f32.mrb[30].mxu1 }
 0x20a   : > { %v1144_v56 = vmax.f32 %v1051_v50, %v1131_v49  ;;  %v1053_v58 = vmax.f32 %v960_v29, %v1042_v54  ;;  %v1044_v59 = vpop.f32.mrb[31].mxu0  ;;  %v1137_v61 = vpop.f32.mrb[31].mxu1  ;;  %v1367_v29 = vrot.slane %v1362_v13, %v1346_v5 }
 0x20b   : > { %v1145_v63 = vmax.f32 %v1052_v53, %v1133_v52  ;;  %v1054_v1 = vmax.f32 %v961_v30, %v1044_v59 }
 0x20c   : > { %v1146_v3 = vmax.f32 %v1053_v58, %v1135_v55 }
 0x20d   : > { %v1147_v4 = vmax.f32 %v1054_v1, %v1137_v61 }
 0x20f   : > { %v1214_v7 = vpop.f32.mrb[32].mxu0  ;;  %v1307_v8 = vpop.f32.mrb[32].mxu1 }
 0x210   : > { %v1233_v9 = vmax.f32 %v1140_v2, %v1214_v7  ;;  %v1216_v12 = vpop.f32.mrb[33].mxu0  ;;  %v1309_v6 = vpop.f32.mrb[33].mxu1 }
 0x211   : > { %v1234_v57 = vmax.f32 %v1141_v10, %v1216_v12  ;;  %v1218_v14 = vpop.f32.mrb[34].mxu0  ;;  %v1311_v15 = vpop.f32.mrb[34].mxu1 }
 0x212   : > { %v1326_v16 = vmax.f32 %v1233_v9, %v1307_v8  ;;  %v1235_v18 = vmax.f32 %v1142_v46, %v1218_v14  ;;  %v1220_v20 = vpop.f32.mrb[35].mxu0  ;;  %v1313_v21 = vpop.f32.mrb[35].mxu1 }
 0x213   : > { %v1327_v22 = vmax.f32 %v1234_v57, %v1309_v6  ;;  %v1236_v24 = vmax.f32 %v1143_v47, %v1220_v20 }
 0x214   : > { %v1334_v27 = vadd.f32 %v1326_v16, %v1970_v19  ;;  %v1328_v30 = vmax.f32 %v1235_v18, %v1311_v15 }
 0x215   : > { %v1335_v0 = vadd.f32 %v1327_v22, %v1978_v25  ;;  %v1329_v32 = vmax.f32 %v1236_v24, %v1313_v21 }
 0x216   : > { %v1354_v34 = vmul.f32 %v2104_v17, %v1334_v27  ;;  %v1336_v35 = vadd.f32 %v1328_v30, %v1980_v26 }
 0x217   : > { %v1355_v36 = vmul.f32 %v1351_v23, %v1335_v0  ;;  %v1337_v37 = vadd.f32 %v1329_v32, %v1986_v28  ;;  %v1224_v40 = vpop.f32.mrb[36].mxu0  ;;  %v1317_v2 = vpop.f32.mrb[36].mxu1 }
 0x218   : > { %v1374_v42 = vadd.f32 %v1367_v29, %v1354_v34  ;;  %v1356_v43 = vmul.f32 %v2104_v17, %v1336_v35  ;;  %v1237_v44 = vmax.f32 %v1144_v56, %v1224_v40  ;;  %v1226_v19 = vpop.f32.mrb[37].mxu0  ;;  %v1319_v10 = vpop.f32.mrb[37].mxu1 }
 0x219   : > { %v1375_v45 = vadd.f32 %v1371_v31, %v1355_v36  ;;  %v1357_v46 = vmul.f32 %v1351_v23, %v1337_v37  ;;  %v1238_v25 = vmax.f32 %v1145_v63, %v1226_v19  ;;  %v1228_v47 = vpop.f32.mrb[38].mxu0  ;;  %v1321_v48 = vpop.f32.mrb[38].mxu1 }
 0x21a   : > { %vm1382_vm4 = vcmp.gt.f32.partialorder %v1374_v42, 0.0  ;;  %v1390_v49 = vmul.f32 0.2, %v1374_v42  ;;  %v1376_v26 = vadd.f32 %v1367_v29, %v1356_v43  ;;  %v1239_v50 = vmax.f32 %v1146_v3, %v1228_v47  ;;  %v1230_v51 = vpop.f32.mrb[39].mxu0  ;;  %v1323_v28 = vpop.f32.mrb[39].mxu1 }
 0x21b   : > { %vm1383_vm2 = vcmp.gt.f32.partialorder %v1375_v45, 0.0  ;;  %v1391_v52 = vmul.f32 0.2, %v1375_v45  ;;  %v1377_v53 = vadd.f32 %v1371_v31, %v1357_v46  ;;  %v1330_v54 = vmax.f32 %v1237_v44, %v1317_v2 }
 0x21c   : > { %v1398_v55 = vsel %vm1382_vm4, %v1374_v42, %v1390_v49  ;;  %vm1384_vm3 = vcmp.gt.f32.partialorder %v1376_v26, 0.0  ;;  %v1392_v56 = vmul.f32 0.2, %v1376_v26  ;;  %v1240_v58 = vmax.f32 %v1147_v4, %v1230_v51 }
 0x21d   : > { %v1399_v59 = vsel %vm1383_vm2, %v1375_v45, %v1391_v52  ;;  %vm1385_vm5 = vcmp.gt.f32.partialorder %v1377_v53, 0.0  ;;  %v1393_v61 = vmul.f32 0.2, %v1377_v53  ;;  %v1338_v62 = vadd.f32 %v1330_v54, %v2003_v33 }
 0x21e   : > { %v1603_v63 = vpack.c.bf16 %v1399_v59, %v1398_v55  ;;  %v1400_v1 = vsel %vm1384_vm3, %v1376_v26, %v1392_v56  ;;  %v1331_v3 = vmax.f32 %v1238_v25, %v1319_v10  ;;  %v1332_v5 = vmax.f32 %v1239_v50, %v1321_v48 }
 0x21f   : > { %v1401_v7 = vsel %vm1385_vm5, %v1377_v53, %v1393_v61  ;;  %v1358_v4 = vmul.f32 %v2104_v17, %v1338_v62  ;;  %v1333_v8 = vmax.f32 %v1240_v58, %v1323_v28 }
 0x220   : > { %1430 = vst [vmem:[%s2117_s15] sm:$0xff] %v1603_v63  ;;  %v1604_v60 = vpack.c.bf16 %v1401_v7, %v1400_v1  ;;  %v1339_v11 = vadd.f32 %v1331_v3, %v2009_v38  ;;  %v1340_v9 = vadd.f32 %v1332_v5, %v2011_v39 }
 0x221   : > { %v1378_v12 = vadd.f32 %v1367_v29, %v1358_v4  ;;  %v1341_v6 = vadd.f32 %v1333_v8, %v2013_v41 }
 0x222   : > { %1431 = vst [vmem:[%s2117_s15 + $0x8] sm:$0xff] %v1604_v60  ;;  %v1359_v13 = vmul.f32 %v1351_v23, %v1339_v11  ;;  %v1360_v33 = vmul.f32 %v2104_v17, %v1340_v9 }
 0x223   : > { %vm1386_vm6 = vcmp.gt.f32.partialorder %v1378_v12, 0.0  ;;  %v1394_v57 = vmul.f32 0.2, %v1378_v12  ;;  %v1361_v14 = vmul.f32 %v1351_v23, %v1341_v6 }
 0x224   : > { %v1379_v15 = vadd.f32 %v1371_v31, %v1359_v13  ;;  %v1380_v16 = vadd.f32 %v1367_v29, %v1360_v33 }
 0x225   : > { %v1402_v18 = vsel %vm1386_vm6, %v1378_v12, %v1394_v57  ;;  %v1381_v20 = vadd.f32 %v1371_v31, %v1361_v14 }
 0x226   : > { %vm1387_vm7 = vcmp.gt.f32.partialorder %v1379_v15, 0.0  ;;  %v1395_v38 = vmul.f32 0.2, %v1379_v15  ;;  %vm1388_vm8 = vcmp.gt.f32.partialorder %v1380_v16, 0.0  ;;  %v1396_v39 = vmul.f32 0.2, %v1380_v16 }
 0x227   : > { %vm1389_vm9 = vcmp.gt.f32.partialorder %v1381_v20, 0.0  ;;  %v1397_v21 = vmul.f32 0.2, %v1381_v20 }
 0x228   : > { %v1403_v41 = vsel %vm1387_vm7, %v1379_v15, %v1395_v38  ;;  %v1404_v22 = vsel %vm1388_vm8, %v1380_v16, %v1396_v39 }
 0x229   : > { %v1605_v24 = vpack.c.bf16 %v1403_v41, %v1402_v18  ;;  %v1405_v27 = vsel %vm1389_vm9, %v1381_v20, %v1397_v21 }
 0x22a   : > { %v1606_v17 = vpack.c.bf16 %v1405_v27, %v1404_v22 }
 0x22b   : > { %1432 = vst [vmem:[%s2117_s15 + $0x10] sm:$0xff] %v1605_v24 }
 0x22c   : > { %1433 = vst [vmem:[%s2117_s15 + $0x18] sm:$0xff] %v1606_v17 }
 0x22d PF: > { %s16_s21 = sadd.s32 1, %s1703_s21  }
 0x22e   : > { %p13_p4 = scmp.ge.s32.totalorder %s16_s21, 4  }
 0x230   :  { %15 = sbr.rel (!%p13_p4) target bundleno = 1 (0x1), region = 77 }

// kernel: dgcnn_forward.17
= control target key start
LH: loop header
LB: loop body
LE: loop exit
PB: predicated region body
PF: predicated region fallthrough
CT: control target
= control target key end

     0   :  { %s4051_s0 = inlined_call_operand.vmem [shape: bf16[2,32,64], index: 0, kind: input, shape index: {}]   ;;  %s4052_s1 = inlined_call_operand.vmem [shape: bf16[2,32,64], index: 1, kind: input, shape index: {}]   ;;  %s4053_s2 = inlined_call_operand.vmem [shape: bf16[2,32,128], index: 2, kind: input, shape index: {}]   ;;  %s4054_s3 = inlined_call_operand.vmem [shape: bf16[2,32,256], index: 3, kind: input, shape index: {}]   ;;  %s4055_s4 = inlined_call_operand.vmem [shape: bf16[64,64], index: 4, kind: input, shape index: {}]   ;;  %s4056_s5 = inlined_call_operand.vmem [shape: bf16[64,64], index: 5, kind: input, shape index: {}]   ;;  %s4057_s6 = inlined_call_operand.vmem [shape: bf16[128,64], index: 6, kind: input, shape index: {}]   ;;  %s4058_s7 = inlined_call_operand.vmem [shape: bf16[256,64], index: 7, kind: input, shape index: {}]   ;;  %s4059_s8 = inlined_call_operand.vmem [shape: f32[1,64], index: 8, kind: input, shape index: {}]   ;;  %s4060_s9 = inlined_call_operand.vmem [shape: f32[1,64], index: 9, kind: input, shape index: {}]   ;;  %s4061_s10 = inlined_call_operand.vmem [shape: bf16[64,512], index: 10, kind: input, shape index: {}]   ;;  %s4062_s11 = inlined_call_operand.vmem [shape: bf16[64,512], index: 11, kind: input, shape index: {}]   ;;  %s4063_s12 = inlined_call_operand.vmem [shape: f32[1,512], index: 12, kind: input, shape index: {}]   ;;  %s4064_s13 = inlined_call_operand.vmem [shape: f32[1,512], index: 13, kind: input, shape index: {}]   ;;  %s4065_s14 = inlined_call_operand.vmem [shape: bf16[512,256], index: 14, kind: input, shape index: {}]   ;;  %s4066_s15 = inlined_call_operand.vmem [shape: f32[1,256], index: 15, kind: input, shape index: {}]   ;;  %s4067_s16 = inlined_call_operand.vmem [shape: f32[1,256], index: 16, kind: input, shape index: {}]   ;;  %s4068_s17 = inlined_call_operand.vmem [shape: f32[1,256], index: 17, kind: input, shape index: {}]   ;;  %s4069_s18 = inlined_call_operand.vmem [shape: bf16[256,40], index: 18, kind: input, shape index: {}]   ;;  %s4070_s19 = inlined_call_operand.vmem [shape: f32[1,40], index: 19, kind: input, shape index: {}]   ;;  %s4071_s20 = inlined_call_operand.hbm [shape: f32[2,1,40], index: 20, kind: output, shape index: {}]  }
   0x1   :  { %4084 = sst [smem:[#allocation16_spill]] %s4051_s0 }
   0x2   :  { %4085 = sst [smem:[#allocation17_spill]] %s4052_s1 }
   0x3   :  { %4086 = sst [smem:[#allocation18_spill]] %s4053_s2 }
   0x4   :  { %4087 = sst [smem:[#allocation19_spill]] %s4054_s3 }
   0x5   :  { %4088 = sst [smem:[#allocation20_spill]] %s4055_s4 }
   0x6   :  { %4089 = sst [smem:[#allocation21_spill]] %s4056_s5 }
   0x7   :  { %4090 = sst [smem:[#allocation22_spill]] %s4070_s19 }
   0x8   :  { %4091 = sst [smem:[#allocation23_spill]] %s4071_s20 }
   0x9   :  { %25 = vsyncpa [#allocation5], 0 }
   0xa   :  { %27 = vsyncpa [#allocation5 + $0x1], 0  ;;  %s3417_s1 = smov 0   ;;  %s3419_s22 = smov 0  }
   0xb   :  { %s3421_s23 = smov 0   ;;  %s3423_s24 = smov 0  }
   0xc   :  { %s3425_s2 = smov 0   ;;  %s3427_s25 = smov 0  }
   0xd LB: > { %4092 = sst [smem:[#allocation7_spill]] %s3286_s1  ;;  %s2644_s3 = sadd.s32 4294967295, %s3306_s25   ;;  %s3306_s25 = sphi %s3427_s25, %s33_s25   ;;  %s3302_s2 = sphi %s3425_s2, %s4119_s2   ;;  %s3298_s24 = sphi %s3423_s24, %s4118_s24   ;;  %s3294_s23 = sphi %s3421_s23, %s4117_s23   ;;  %s3290_s22 = sphi %s3419_s22, %s4121_s22   ;;  %s3286_s1 = sphi %s3417_s1, %s4120_s1  }
   0xe   : > { %4093 = sst [smem:[#allocation8_spill]] %s3294_s23  ;;  %s2645_s26 = sadd.s32 4294967294, %s3306_s25  }
   0xf   : > { %4094 = sst [smem:[#allocation9_spill]] %s3298_s24  ;;  %s45_s27 = sadd.s32 1, %s3302_s2 }
  0x10   : > { %4095 = sst [smem:[#allocation10_spill]] %s3302_s2  ;;  %s500_s28 = sadd.s32 1, %s3294_s23 }
  0x11   : > { %4096 = sst [smem:[#allocation11_spill]] %s3306_s25  ;;  %p47_p0 = scmp.ge.s32.totalorder %s45_s27, 2 }
  0x12   : > { %p510_p1 = scmp.ne.s32.totalorder %s3294_s23, %s3290_s22  ;;  %p511_p2 = scmp.eq.s32.totalorder %s2644_s3, 1 }
  0x13   : > { %p516_p3 = scmp.ne.s32.totalorder %s3290_s22, %s3286_s1  ;;  %s4123_s27 = smov (%p47_p0, %s45_s27), 0 }
  0x14   : > { %4097 = sst [smem:[#allocation12_spill]] %s4123_s27  ;;  %p3457_p4 = por %p511_p2, %p510_p1 }
  0x15   : > { %p517_p5 = scmp.eq.s32.totalorder %s2645_s26, 1  ;;  %s497_s29 = ssub.s32 %s3302_s2, %s4123_s27 }
  0x16   : > { %s4098_s4 = scalar_select %p3457_p4, 1, 0 }
  0x17   : > { %p2648_p6 = scmp.ge.s32.totalorder %s3306_s25, 1  ;;  %p498_p7 = scmp.eq.s32.totalorder %s497_s29, 0 }
  0x18   : > { %4099 = sst [smem:[#allocation13_spill]] %s4098_s4  ;;  %p3464_p8 = por %p517_p5, %p516_p3 }
  0x19   : > { %p636_p9 = scmp.lt.s32.totalorder %s3306_s25, 3 }
  0x1a   : > { %s4100_s30 = scalar_select %p3464_p8, 1, 0 }
  0x1b   : > { %s3470_s0 = scalar_select %p498_p7, %s3294_s23, %s500_s28  }
  0x1c   : > { %4101 = sst [smem:[#allocation14_spill]] %s4100_s30  ;;  %p637_p10 = pnand %p2648_p6, %p636_p9 }
  0x1d   : > { %4102 = sst [smem:[#allocation15_spill]] %s3470_s0  ;;  %s4103_s5 = sld [smem:[#allocation21_spill]] (!%p637_p10)  ;;  %v3025_v1 = vld [vmem:[%s4057_s6] sm:$0xff] (!%p637_p10)   ;;  %v3027_v3 = vld [vmem:[%s4057_s6 + $0x8] sm:$0xff] (!%p637_p10)   ;;  %v3029_v5 = vld [vmem:[%s4057_s6 + $0x10] sm:$0xff] (!%p637_p10)   ;;  %vm832_vm0 = vcmask (!%p637_p10), 523264  }
  0x1e   : > { %640 = sbr.rel (%p637_p10) target bundleno = 1133 (0x46d), region = 100  ;;  %p726_p11 = scmp.lt.s32.totalorder (!%p637_p10), %s3298_s24, 1  ;;  %2924 = vmatprep.subr.bf16.mxu1 (!%p637_p10), %v3025_v1  ;;  %v3031_v8 = vld [vmem:[%s4057_s6 + $0x18] sm:$0xff] (!%p637_p10)   ;;  %v3034_v10 = vld [vmem:[%s4057_s6 + $0x20] sm:$0xff] (!%p637_p10)   ;;  %v3037_v13 = vld [vmem:[%s4057_s6 + $0x28] sm:$0xff] (!%p637_p10)   ;;  %vm771_vm1 = vcmask (!%p637_p10), 516096  }
  0x1f   : > { %2925 = vmatpush3.bf16.msra.mxu1 (!%p637_p10), %v3025_v1  ;;  %s4104_s1 = sld [smem:[#allocation17_spill]] (!%p637_p10)  ;;  %s4105_s3 = sld [smem:[#allocation20_spill]] (!%p637_p10)  ;;  %v3039_v17 = vld [vmem:[%s4057_s6 + $0x30] sm:$0xff] (!%p637_p10)   ;;  %v3041_v19 = vld [vmem:[%s4057_s6 + $0x38] sm:$0xff] (!%p637_p10)   ;;  %v3046_v20 = vld [vmem:[%s4058_s7 + $0x40] sm:$0xff] (!%p637_p10)   ;;  %v3308_v42 = vmov (!%p637_p10), -inf  }
  0x20   : > { %2926 = vmatprep.subr.bf16.mxu1 (!%p637_p10), %v3027_v3  ;;  %s4106_s0 = sld [smem:[#allocation16_spill]] (!%p637_p10)  ;;  %s4107_s30 = sld [smem:[#allocation18_spill]] (!%p637_p10)  ;;  %v3047_v23 = vld [vmem:[%s4058_s7] sm:$0xff] (!%p637_p10)   ;;  %v3048_v24 = vld [vmem:[%s4058_s7 + $0x48] sm:$0xff] (!%p637_p10)   ;;  %v3050_v26 = vld [vmem:[%s4058_s7 + $0x50] sm:$0xff] (!%p637_p10)   ;;  %v3309_v43 = vmov (!%p637_p10), 0.0  }
  0x21   : > { %v3049_v25 = vld [vmem:[%s4058_s7 + $0x8] sm:$0xff] (!%p637_p10)   ;;  %v3051_v28 = vld [vmem:[%s4058_s7 + $0x10] sm:$0xff] (!%p637_p10)   ;;  %v3052_v29 = vld [vmem:[%s4058_s7 + $0x58] sm:$0xff] (!%p637_p10)   ;;  %772 = vst.msk [vmem:[#allocation2] sm:$0x1] (!%p637_p10), %vm771_vm1, %v3308_v42  ;;  %v3310_v52 = vmov (!%p637_p10), 0  }
  0x22   : > { %v3053_v30 = vld [vmem:[%s4058_s7 + $0x18] sm:$0xff] (!%p637_p10)   ;;  %v3054_v31 = vld [vmem:[%s4058_s7 + $0x60] sm:$0xff] (!%p637_p10)   ;;  %v3056_v33 = vld [vmem:[%s4058_s7 + $0x68] sm:$0xff] (!%p637_p10)   ;;  %773 = vst.msk [vmem:[#allocation3] sm:$0x1] (!%p637_p10), %vm771_vm1, %v3309_v43  ;;  %s4109_s20 = sld [smem:[#allocation9_spill]] (!%p637_p10) }
  0x23   : > { %v3024_v0 = vld [vmem:[%s4103_s5] sm:$0xff] (!%p637_p10)   ;;  %v3026_v2 = vld [vmem:[%s4103_s5 + $0x8] sm:$0xff] (!%p637_p10)   ;;  %v3028_v4 = vld [vmem:[%s4103_s5 + $0x10] sm:$0xff] (!%p637_p10)   ;;  %2927 = vmatpush3.bf16.msra.mxu1 (!%p637_p10), %v3027_v3  ;;  %s4110_s4 = sld [smem:[#allocation22_spill]] (!%p637_p10)  ;;  %vm2503_vm12 = vcmask (!%p637_p10), 319488  }
  0x24   : > { %2900 = vmatprep.subr.bf16.mxu0 (!%p637_p10), %v3024_v0  ;;  %v3030_v6 = vld [vmem:[%s4103_s5 + $0x18] sm:$0xff] (!%p637_p10)   ;;  %2928 = vmatprep.subr.bf16.mxu1 (!%p637_p10), %v3029_v5  ;;  %v3055_v32 = vld [vmem:[%s4058_s7 + $0x20] sm:$0xff] (!%p637_p10)   ;;  %v3057_v34 = vld [vmem:[%s4058_s7 + $0x28] sm:$0xff] (!%p637_p10)  }
  0x25   : > { %s3483_s28 = scalar_select %p726_p11, %s3298_s24, 1  ;;  %2901 = vmatpush3.bf16.msra.mxu0 %v3024_v0  ;;  %v3033_v9 = vld [vmem:[%s4105_s3] sm:$0xff]   ;;  %v3036_v12 = vld [vmem:[%s4105_s3 + $0x8] sm:$0xff]   ;;  %v3038_v16 = vld [vmem:[%s4105_s3 + $0x10] sm:$0xff]  }
  0x26   : > { %2902 = vmatprep.subr.bf16.mxu0 %v3026_v2  ;;  %v3040_v18 = vld [vmem:[%s4105_s3 + $0x18] sm:$0xff]   ;;  %s4108_s24 = sld [smem:[#allocation19_spill]]  ;;  %v3058_v35 = vld [vmem:[%s4058_s7 + $0x70] sm:$0xff]   ;;  %v3118_v3 = vld [vmem:[%s4065_s14 + $0x4] ss:$8 sps:$4 sm:$0xff]  }
  0x27   : > { %s2824_s27 = sshll.u32 %s3483_s28, 4  ;;  %2929 = vmatpush3.bf16.msra.mxu1 %v3029_v5  ;;  %s2827_s26 = sshll.u32 %s3483_s28, 5  ;;  %v3059_v36 = vld [vmem:[%s4058_s7 + $0x30] sm:$0xff]   ;;  %v3060_v37 = vld [vmem:[%s4058_s7 + $0x78] sm:$0xff]  }
  0x28   : > { %s743_s25 = scalar_lea.vmem %s4104_s1, %s2824_s27  ;;  %2930 = vmatprep.subr.bf16.mxu1 %v3031_v8  ;;  %s733_s23 = scalar_lea.vmem %s4106_s0, %s2824_s27  ;;  %v3061_v38 = vld [vmem:[%s4058_s7 + $0x38] sm:$0xff]   ;;  %v3070_v44 = vld [vmem:[%s4062_s11 + $0x4] ss:$16 sps:$4 sm:$0xff]   ;;  %v3068_v45 = vld [vmem:[%s4062_s11] ss:$16 sps:$4 sm:$0xff]  }
  0x29   : > { %2903 = vmatpush3.bf16.msra.mxu0 %v3026_v2  ;;  %v3032_v7 = vld [vmem:[%s743_s25] sm:$0xff]   ;;  %v3035_v11 = vld [vmem:[%s743_s25 + $0x8] sm:$0xff]   ;;  %s753_s19 = scalar_lea.vmem %s4107_s30, %s2824_s27  ;;  %v3119_v5 = vld [vmem:[%s4065_s14 + $0x10] ss:$8 sps:$4 sm:$0xff]   ;;  %s723_s25 = sand.u32 1, %s3290_s22  }
  0x2a   : > { %2904 = vmatprep.subr.bf16.mxu0 %v3028_v4  ;;  %2908 = vmatprep.mubr.msk.bf16.mxu0 %vm832_vm0, %v3032_v7  ;;  %v3042_v14 = vld [vmem:[%s733_s23] sm:$0xff]   ;;  %v3044_v21 = vld [vmem:[%s733_s23 + $0x8] sm:$0xff]   ;;  %s2821_s23 = sshll.u32 %s4109_s20, 4  ;;  %s4112_s28 = sld [smem:[#allocation23_spill]] }
  0x2b   : > { %2931 = vmatpush3.bf16.msra.mxu1 %v3031_v8  ;;  %v3043_v15 = vld [vmem:[%s753_s19] sm:$0xff]   ;;  %v3045_v22 = vld [vmem:[%s753_s19 + $0x8] sm:$0xff]   ;;  %v3127_v8 = vld [vmem:[%s4065_s14 + $0x34] ss:$8 sps:$4 sm:$0xff]   ;;  %s2506_s21 = scalar_lea.sflag [#allocation5], %s723_s25  ;;  %s3311_s30 = smov [#allocation4]  }
  0x2c   : > { %2932 = vmatprep.subr.bf16.mxu1 %v3034_v10  ;;  %2940 = vmatprep.mubr.bf16.mxu1 %v3043_v15  ;;  %s3554_s27 = scalar_lea.vmem %s4108_s24, %s2827_s26  ;;  %v3073_v46 = vld [vmem:[%s4062_s11 + $0x24] ss:$16 sps:$4 sm:$0xff]   ;;  %v3071_v47 = vld [vmem:[%s4062_s11 + $0x20] ss:$16 sps:$4 sm:$0xff]   ;;  %v3082_v53 = vld [vmem:[%s4062_s11 + $0xc] ss:$16 sps:$4 sm:$0xff]  }
  0x2d   : > { %2905 = vmatpush3.bf16.msra.mxu0 %v3028_v4  ;;  %v3064_v27 = vld [vmem:[%s3554_s27 + $0x4] ss:$8 sps:$4 sm:$0xff]   ;;  %v3062_v39 = vld [vmem:[%s3554_s27] ss:$8 sps:$4 sm:$0xff]   ;;  %v3065_v40 = vld [vmem:[%s3554_s27 + $0x14] ss:$8 sps:$4 sm:$0xff]  }
  0x2e   : > { %2906 = vmatprep.subr.bf16.mxu0 %v3030_v6  ;;  %v3067_v41 = vld [vmem:[%s3554_s27 + $0x10] ss:$8 sps:$4 sm:$0xff]   ;;  %v3076_v48 = vld [vmem:[%s4062_s11 + $0x44] ss:$16 sps:$4 sm:$0xff]   ;;  %v3116_v2 = vld [vmem:[%s4065_s14] ss:$8 sps:$4 sm:$0xff]  }
  0x2f   : > { %2933 = vmatpush3.bf16.msra.mxu1 %v3034_v10  ;;  %v3074_v49 = vld [vmem:[%s4062_s11 + $0x40] ss:$16 sps:$4 sm:$0xff]   ;;  %v3079_v50 = vld [vmem:[%s4062_s11 + $0x64] ss:$16 sps:$4 sm:$0xff]   ;;  %s724_s27 = scalar_lea.vmem [#allocation4], %s723_s25  ;;  %s3232_s20 = sshll.u32 %s3311_s30, 4  ;;  %s3233_s20 = int_to_ptr.vmem [resolvable:$false] %s3232_s20 }
  0x30   : > { %2934 = vmatprep.subr.bf16.mxu1 %v3037_v13  ;;  %v3077_v51 = vld [vmem:[%s4062_s11 + $0x60] ss:$16 sps:$4 sm:$0xff]   ;;  %v3121_v4 = vld [vmem:[%s4065_s14 + $0x14] ss:$8 sps:$4 sm:$0xff]   ;;  %v3130_v10 = vld [vmem:[%s4065_s14 + $0x44] ss:$8 sps:$4 sm:$0xff]   ;;  %s4004_s0 = scalar_lea.hbm %s4112_s28, %s2821_s23 }
  0x31   : > { %2907 = vmatpush3.bf16.msra.mxu0 %v3030_v6  ;;  %v3124_v6 = vld [vmem:[%s4065_s14 + $0x24] ss:$8 sps:$4 sm:$0xff]   ;;  %v3122_v7 = vld [vmem:[%s4065_s14 + $0x20] ss:$8 sps:$4 sm:$0xff]   ;;  %s2518_s24 = sshll.u32 %s724_s27, 4  ;;  %s3234_s26 = scalar_lea.vmem %s3233_s20, 32  ;;  %s4006_s24 = int_to_ptr.vmem [resolvable:$true] %s2518_s24 }
  0x32   : > { %2912 = vmatprep.subr.bf16.mxu0 %v3033_v9  ;;  %v3134_v15 = vld [vmem:[%s4065_s14 + $0x60] ss:$8 sps:$4 sm:$0xff]   ;;  %s3228_s1 = scalar_lea.vmem %s4006_s24, 16  ;;  %p3235_p1 = scmp.lt.s32.totalorder %s4006_s24, %s3233_s20 }
  0x33   : > { %2935 = vmatpush3.bf16.msra.mxu1 %v3037_v13  ;;  %v3131_v13 = vld [vmem:[%s4065_s14 + $0x50] ss:$8 sps:$4 sm:$0xff]   ;;  %p3229_p12 = scmp.ne.s32.totalorder %s4006_s24, %s3228_s1  ;;  %p3236_p2 = scmp.lt.s32.totalorder %s3234_s26, %s3228_s1 }
  0x34   : > { %2909 = vmatmul.mubr.msk.bf16.vlgmr.msra.gmra.mrb[0].mxu0 %vm832_vm0, %v3035_v11  ;;  %2936 = vmatprep.subr.bf16.mxu1 %v3039_v17  ;;  %v3128_v11 = vld [vmem:[%s4065_s14 + $0x40] ss:$8 sps:$4 sm:$0xff]  }
  0x35   : > { %2913 = vmatpush3.bf16.msra.mxu0 %v3033_v9  ;;  %2920 = vmatprep.mubr.msk.bf16.mxu0 %vm832_vm0, %v3042_v14  ;;  %v3125_v9 = vld [vmem:[%s4065_s14 + $0x30] ss:$8 sps:$4 sm:$0xff]   ;;  %v3136_v14 = vld [vmem:[%s4065_s14 + $0x64] ss:$8 sps:$4 sm:$0xff]   ;;  %p3230_p13 = pnand %p3229_p12, %p3457_p4  ;;  %p3237_p3 = por %p3236_p2, %p3235_p1 }
  0x36   : > { %2914 = vmatprep.subr.bf16.mxu0 %v3036_v12 }
  0x37   : > { %2937 = vmatpush3.bf16.msra.mxu1 %v3039_v17  ;;  %p3231_p0 = pneg %p3230_p13 }
  0x38   : > { %2938 = vmatprep.subr.bf16.mxu1 %v3041_v19 }
  0x39   : > { %2915 = vmatpush3.bf16.msra.mxu0 %v3036_v12  ;;  %v3133_v12 = vld [vmem:[%s4065_s14 + $0x54] ss:$8 sps:$4 sm:$0xff]   ;;  %p3238_p5 = pnand %p3237_p3, %p3231_p0 }
  0x3a   : > { %2916 = vmatprep.subr.bf16.mxu0 %v3038_v16 }
  0x3b   : > { %2939 = vmatpush3.bf16.msra.mxu1 %v3041_v19 }
  0x3c   : > { %2850 = vmatprep.subr.bf16.mxu1 %v3046_v20  ;;  %v3142_v20 = vld [vmem:[%s4065_s14 + $0x84] ss:$8 sps:$4 sm:$0xff]  }
  0x3d   : > { %2917 = vmatpush3.bf16.msra.mxu0 %v3038_v16  ;;  %v3139_v16 = vld [vmem:[%s4065_s14 + $0x74] ss:$8 sps:$4 sm:$0xff]  }
  0x3e   : > { %2918 = vmatprep.subr.bf16.mxu0 %v3040_v18  ;;  %2941 = vmatmul.mubr.bf16.vlgmr.msra.gmra.mrb[0].mxu1 %v3045_v22 }
  0x3f   : > { %2851 = vmatpush3.bf16.msra.mxu1 %v3047_v23  ;;  %1294 = vmatprep.mubr.bf16.mxu1 %v3064_v27  ;;  %v2703_v23 = vld [vmem:[%s4059_s8] ss:$0 sm:$0xff] }
  0x40   : > { %2852 = vmatprep.subr.bf16.mxu1 %v3048_v24  ;;  %v3140_v27 = vld [vmem:[%s4065_s14 + $0x80] ss:$8 sps:$4 sm:$0xff]  }
  0x41   : > { %2919 = vmatpush3.bf16.msra.mxu0 %v3040_v18  ;;  %v3137_v18 = vld [vmem:[%s4065_s14 + $0x70] ss:$8 sps:$4 sm:$0xff]  }
  0x42   : > { %2216 = vmatprep.subr.bf16.mxu0 %v3118_v3 }
  0x43   : > { %2853 = vmatpush3.bf16.msra.mxu1 %v3049_v25 }
  0x44   : > { %2921 = vmatmul.mubr.msk.bf16.vlgmr.msra.gmra.mrb[0].mxu0 %vm832_vm0, %v3044_v21  ;;  %2854 = vmatprep.subr.bf16.mxu1 %v3050_v26 }
  0x45   : > { %2217 = vmatpush1.bf16.msra.mxu0 %v3116_v2 }
  0x46   : > { %2218 = vmatprep.subr.bf16.mxu0 %v3121_v4 }
  0x47   : > { %2855 = vmatpush3.bf16.msra.mxu1 %v3051_v28  ;;  %v2704_v28 = vld [vmem:[%s4060_s9] ss:$0 sm:$0xff] }
  0x48   : > { %2856 = vmatprep.subr.bf16.mxu1 %v3052_v29  ;;  %v3145_v29 = vld [vmem:[%s4065_s14 + $0x94] ss:$8 sps:$4 sm:$0xff]  }
  0x49   : > { %2219 = vmatpush1.bf16.msra.mxu0 %v3119_v5  ;;  %v3157_v5 = vld [vmem:[%s4065_s14 + $0xd4] ss:$8 sps:$4 sm:$0xff]  }
  0x4a   : > { %2220 = vmatprep.subr.bf16.mxu0 %v3124_v6 }
  0x4b   : > { %2857 = vmatpush3.bf16.msra.mxu1 %v3053_v30 }
  0x4c   : > { %2858 = vmatprep.subr.bf16.mxu1 %v3054_v31 }
  0x4d   : > { %2221 = vmatpush1.bf16.msra.mxu0 %v3122_v7 }
  0x4e   : > { %2222 = vmatprep.subr.bf16.mxu0 %v3127_v8 }
  0x4f   : > { %2859 = vmatpush3.bf16.msra.mxu1 %v3055_v32 }
  0x50   : > { %2860 = vmatprep.subr.bf16.mxu1 %v3056_v33 }
  0x51   : > { %2223 = vmatpush1.bf16.msra.mxu0 %v3125_v9 }
  0x52   : > { %2224 = vmatprep.subr.bf16.mxu0 %v3130_v10 }
  0x53   : > { %2861 = vmatpush3.bf16.msra.mxu1 %v3057_v34 }
  0x54   : > { %2862 = vmatprep.subr.bf16.mxu1 %v3058_v35  ;;  %v3143_v35 = vld [vmem:[%s4065_s14 + $0x90] ss:$8 sps:$4 sm:$0xff]  }
  0x55   : > { %2225 = vmatpush1.bf16.msra.mxu0 %v3128_v11  ;;  %v3155_v11 = vld [vmem:[%s4065_s14 + $0xd0] ss:$8 sps:$4 sm:$0xff]  }
  0x56   : > { %2226 = vmatprep.subr.bf16.mxu0 %v3133_v12 }
  0x57   : > { %2863 = vmatpush3.bf16.msra.mxu1 %v3059_v36 }
  0x58   : > { %2864 = vmatprep.subr.bf16.mxu1 %v3060_v37  ;;  %v3148_v37 = vld [vmem:[%s4065_s14 + $0xa4] ss:$8 sps:$4 sm:$0xff]  }
  0x59   : > { %2227 = vmatpush1.bf16.msra.mxu0 %v3131_v13 }
  0x5a   : > { %2228 = vmatprep.subr.bf16.mxu0 %v3136_v14 }
  0x5b   : > { %2865 = vmatpush3.bf16.msra.mxu1 %v3061_v38 }
  0x5c   : > { %1505 = vmatprep.subr.bf16.mxu1 %v3070_v44 }
  0x5d   : > { %2229 = vmatpush1.bf16.msra.mxu0 %v3134_v15 }
  0x5e   : > { %1295 = vmatmul.mubr.bf16.vlgmr.msra.gmra.mrb[4].mxu1 %v3062_v39  ;;  %2230 = vmatprep.subr.bf16.mxu0 %v3139_v16 }
  0x5f   : > { %1302 = vmatprep.mubr.bf16.mxu1 %v3065_v40  ;;  %1506 = vmatpush1.bf16.msra.mxu1 %v3068_v45 }
  0x60   : > { %1507 = vmatprep.subr.bf16.mxu1 %v3073_v46  ;;  %v3146_v46 = vld [vmem:[%s4065_s14 + $0xa0] ss:$8 sps:$4 sm:$0xff]  }
  0x61   : > { %2231 = vmatpush1.bf16.msra.mxu0 %v3137_v18 }
  0x62   : > { %2232 = vmatprep.subr.bf16.mxu0 %v3142_v20 }
  0x63   : > { %1508 = vmatpush1.bf16.msra.mxu1 %v3071_v47 }
  0x64   : > { %1509 = vmatprep.subr.bf16.mxu1 %v3076_v48  ;;  %v3151_v48 = vld [vmem:[%s4065_s14 + $0xb4] ss:$8 sps:$4 sm:$0xff]  }
  0x65   : > { %2233 = vmatpush1.bf16.msra.mxu0 %v3140_v27  ;;  %v1349_v27 = vld [vmem:[#allocation2] sm:$0x1] }
  0x66   : > { %1303 = vmatmul.mubr.bf16.gmra.mrb[8].mxu1 %v3067_v41  ;;  %2234 = vmatprep.subr.bf16.mxu0 %v3145_v29 }
  0x67   : > { %1510 = vmatpush1.bf16.msra.mxu1 %v3074_v49  ;;  %1537 = vmatprep.mubr.bf16.mxu1 %v3310_v52 }
  0x68   : > { %1511 = vmatprep.subr.bf16.mxu1 %v3079_v50 }
  0x69   : > { %2235 = vmatpush1.bf16.msra.mxu0 %v3143_v35  ;;  %v3085_v35 = vld [vmem:[%s4062_s11 + $0x2c] ss:$16 sps:$4 sm:$0xff]  }
  0x6a   : > { %2236 = vmatprep.subr.bf16.mxu0 %v3148_v37  ;;  %v3088_v37 = vld [vmem:[%s4062_s11 + $0x4c] ss:$16 sps:$4 sm:$0xff]  }
  0x6b   : > { %1512 = vmatpush1.bf16.msra.mxu1 %v3077_v51 }
  0x6c   : > { %1546 = vmatprep.subr.bf16.mxu1 %v3082_v53 }
  0x6d   : > { %2237 = vmatpush1.bf16.msra.mxu0 %v3146_v46  ;;  %v3098_v46 = vld [vmem:[%s4061_s10 + $0x40] ss:$16 sps:$4 sm:$0xff]  }
  0x6e   : > { %2238 = vmatprep.subr.bf16.mxu0 %v3151_v48  ;;  %v3101_v48 = vld [vmem:[%s4061_s10 + $0x60] ss:$16 sps:$4 sm:$0xff]  }
 0x111   : > { %v2942_v55 = vpop.f32.mrb[0].mxu1 }
 0x112   : > { %v1091_v58 = vpop.f32.mrb[1].mxu1 }
 0x113   : > { %v2943_v61 = vpop.f32.mrb[2].mxu1 }
 0x114   : > { %v1094_v0 = vpop.f32.mrb[3].mxu1 }
 0x117   : > { %v2922_v54 = vpop.f32.mrb[0].mxu0 }
 0x118   : > { %v962_v56 = vpop.f32.mrb[1].mxu0  ;;  %v3626_v57 = vadd.f32 %v2942_v55, %v2922_v54 }
 0x119   : > { %v2923_v59 = vpop.f32.mrb[2].mxu0  ;;  %v2945_v60 = vadd.f32 %v1091_v58, %v962_v56 }
 0x11a   : > { %v965_v62 = vpop.f32.mrb[3].mxu0  ;;  %v3628_v63 = vadd.f32 %v2943_v61, %v2923_v59 }
 0x11b   : > { %v2947_v1 = vadd.f32 %v1094_v0, %v965_v62  ;;  %v3154_v62 = vld [vmem:[%s4065_s14 + $0xc4] ss:$8 sps:$4 sm:$0xff]  }
 0x131   : > { %v2866_v17 = vpop.f32.mrb[4].mxu1 }
 0x132   : > { %v2867_v19 = vpop.f32.mrb[5].mxu1 }
 0x133   : > { %v2868_v21 = vadd.f32 %v2867_v19, %v2866_v17  ;;  %v2869_v22 = vpop.f32.mrb[6].mxu1 }
 0x134   : > { %v2870_v24 = vpop.f32.mrb[7].mxu1 }
 0x135   : > { %v1311_v25 = vadd.f32 %v2945_v60, %v2868_v21  ;;  %v2871_v26 = vadd.f32 %v2870_v24, %v2869_v22  ;;  %v3149_v60 = vld [vmem:[%s4065_s14 + $0xb0] ss:$8 sps:$4 sm:$0xff]   ;;  %v1366_v24 = vld [vmem:[#allocation3] sm:$0x1] }
 0x136   : > { %2239 = vmatpush1.bf16.msra.mxu0 %v3149_v60  ;;  %v3158_v60 = vld [vmem:[%s4065_s14 + $0xe0] ss:$8 sps:$4 sm:$0xff]  }
 0x137   : > { %v1322_v30 = vmul.f32 %v2703_v23, %v1311_v25  ;;  %v1312_v31 = vadd.f32 %v2947_v1, %v2871_v26  ;;  %2240 = vmatprep.subr.bf16.mxu0 %v3154_v62  ;;  %v3161_v62 = vld [vmem:[%s4065_s14 + $0xf0] ss:$8 sps:$4 sm:$0xff]  }
 0x139   : > { %v1333_v32 = vadd.f32 %v2704_v28, %v1322_v30  ;;  %v1323_v33 = vmul.f32 %v2703_v23, %v1312_v31  ;;  %v2872_v34 = vpop.f32.mrb[8].mxu1 }
 0x13a   : > { %v2873_v36 = vpop.f32.mrb[9].mxu1 }
 0x13b   : > { %vm1337_vm2 = vcmp.gt.f32.partialorder %v1333_v32, 0.0  ;;  %v1341_v38 = vmul.f32 0.2, %v1333_v32  ;;  %v1334_v39 = vadd.f32 %v2704_v28, %v1323_v33  ;;  %v2874_v40 = vadd.f32 %v2873_v36, %v2872_v34  ;;  %v2875_v41 = vpop.f32.mrb[10].mxu1  ;;  %v3080_v33 = vld [vmem:[%s4062_s11 + $0x8] ss:$16 sps:$4 sm:$0xff]  }
 0x13c   : > { %v2876_v42 = vpop.f32.mrb[11].mxu1  ;;  %v3083_v36 = vld [vmem:[%s4062_s11 + $0x28] ss:$16 sps:$4 sm:$0xff]  }
 0x13d   : > { %v1345_v43 = vsel %vm1337_vm2, %v1333_v32, %v1341_v38  ;;  %vm1338_vm3 = vcmp.gt.f32.partialorder %v1334_v39, 0.0  ;;  %v1342_v44 = vmul.f32 0.2, %v1334_v39  ;;  %v1313_v45 = vadd.f32 %v3626_v57, %v2874_v40  ;;  %v3086_v38 = vld [vmem:[%s4062_s11 + $0x48] ss:$16 sps:$4 sm:$0xff]  }
 0x13e   : > { %v2877_v47 = vadd.f32 %v2876_v42, %v2875_v41  ;;  %v1350_v49 = vsel %vm832_vm0, %v1345_v43, -inf  ;;  %v1367_v53 = vsel %vm832_vm0, %v1345_v43, 0.0  ;;  %v3089_v40 = vld [vmem:[%s4062_s11 + $0x68] ss:$16 sps:$4 sm:$0xff]   ;;  %v3094_v41 = vld [vmem:[%s4061_s10 + $0x4] ss:$16 sps:$4 sm:$0xff]  }
 0x13f   : > { %v1346_v50 = vsel %vm1338_vm3, %v1334_v39, %v1342_v44  ;;  %v1324_v51 = vmul.f32 %v2703_v23, %v1313_v45  ;;  %v3091_v39 = vld [vmem:[%s4062_s11 + $0x6c] ss:$16 sps:$4 sm:$0xff]   ;;  %v3092_v42 = vld [vmem:[%s4061_s10] ss:$16 sps:$4 sm:$0xff]   ;;  %v3097_v43 = vld [vmem:[%s4061_s10 + $0x24] ss:$16 sps:$4 sm:$0xff]  }
 0x140   : > { %v1351_v54 = vsel %vm832_vm0, %v1346_v50, -inf  ;;  %v1368_v55 = vsel %vm832_vm0, %v1346_v50, 0.0  ;;  %v1314_v56 = vadd.f32 %v3628_v63, %v2877_v47  ;;  %v3152_v63 = vld [vmem:[%s4065_s14 + $0xc0] ss:$8 sps:$4 sm:$0xff]   ;;  %v3100_v45 = vld [vmem:[%s4061_s10 + $0x44] ss:$16 sps:$4 sm:$0xff]  }
 0x141   : > { %v1354_v57 = vmax.f32 %v1350_v49, %v1351_v54  ;;  %v1369_v58 = vadd.f32 %v1368_v55, %v1367_v53  ;;  %v1335_v59 = vadd.f32 %v2704_v28, %v1324_v51  ;;  %2241 = vmatpush1.bf16.msra.mxu0 %v3152_v63  ;;  %v3095_v44 = vld [vmem:[%s4061_s10 + $0x20] ss:$16 sps:$4 sm:$0xff]   ;;  %v3103_v47 = vld [vmem:[%s4061_s10 + $0x64] ss:$16 sps:$4 sm:$0xff]   ;;  %v3106_v49 = vld [vmem:[%s4061_s10 + $0xc] ss:$16 sps:$4 sm:$0xff]  }
 0x142   : > { %v1325_v61 = vmul.f32 %v2703_v23, %v1314_v56  ;;  %2242 = vmatprep.subr.bf16.mxu0 %v3157_v5  ;;  %v3104_v51 = vld [vmem:[%s4061_s10 + $0x8] ss:$16 sps:$4 sm:$0xff]   ;;  %v3109_v54 = vld [vmem:[%s4061_s10 + $0x2c] ss:$16 sps:$4 sm:$0xff]  }
 0x143   : > { %vm1339_vm4 = vcmp.gt.f32.partialorder %v1335_v59, 0.0  ;;  %v1343_v0 = vmul.f32 0.2, %v1335_v59  ;;  %v3107_v55 = vld [vmem:[%s4061_s10 + $0x28] ss:$16 sps:$4 sm:$0xff]  }
 0x144   : > { %v1336_v1 = vadd.f32 %v2704_v28, %v1325_v61  ;;  %v3112_v56 = vld [vmem:[%s4061_s10 + $0x4c] ss:$16 sps:$4 sm:$0xff]  }
 0x145   : > { %v1347_v2 = vsel %vm1339_vm4, %v1335_v59, %v1343_v0  ;;  %2243 = vmatpush1.bf16.msra.mxu0 %v3155_v11  ;;  %v3160_v59 = vld [vmem:[%s4065_s14 + $0xe4] ss:$8 sps:$4 sm:$0xff]   ;;  %v3163_v61 = vld [vmem:[%s4065_s14 + $0xf4] ss:$8 sps:$4 sm:$0xff]   ;;  %v1754_v0 = vlaneseq }
 0x146   : > { %v1370_v3 = vsel %vm832_vm0, %v1347_v2, 0.0  ;;  %vm1340_vm5 = vcmp.gt.f32.partialorder %v1336_v1, 0.0  ;;  %v1344_v4 = vmul.f32 0.2, %v1336_v1  ;;  %v1352_v8 = vsel %vm832_vm0, %v1347_v2, -inf  ;;  %2244 = vmatprep.subr.bf16.mxu0 %v3160_v59  ;;  %v3216_v11 = vld [vmem:[%s4069_s18 + $0x50] sm:$0xff]  }
 0x147   : > { %v1371_v6 = vadd.f32 %v1370_v3, %v1369_v58  ;;  %v3115_v58 = vld [vmem:[%s4061_s10 + $0x6c] ss:$16 sps:$4 sm:$0xff]   ;;  %v1755_v2 = vshrl.u32 %v1754_v0, 7  ;;  %v1752_v3 = vld [vmem:[%s4063_s12] sm:$0xf] }
 0x148   : > { %v1348_v7 = vsel %vm1340_vm5, %v1336_v1, %v1344_v4  ;;  %v3166_v1 = vld [vmem:[%s4065_s14 + $0x104] ss:$8 sps:$4 sm:$0xff]   ;;  %v1778_v4 = vld [vmem:[%s4064_s13] sm:$0xf] }
 0x149   : > { %v1353_v9 = vsel %vm832_vm0, %v1348_v7, -inf  ;;  %v1372_v10 = vsel %vm832_vm0, %v1348_v7, 0.0  ;;  %2245 = vmatpush1.bf16.msra.mxu0 %v3158_v60  ;;  %v1764_v63 = vsub.s32 2, %v1755_v2  ;;  %v3212_v7 = vld [vmem:[%s4069_s18 + $0x40] sm:$0xff]   ;;  %v3181_v60 = vld [vmem:[%s4065_s14 + $0x154] ss:$8 sps:$4 sm:$0xff]  }
 0x14a   : > { %v1355_v12 = vmax.f32 %v1352_v8, %v1353_v9  ;;  %v1373_v13 = vadd.f32 %v1372_v10, %v1371_v6  ;;  %2246 = vmatprep.subr.bf16.mxu0 %v3163_v61  ;;  %v3213_v8 = vld [vmem:[%s4069_s18] sm:$0xff]   ;;  %v3214_v9 = vld [vmem:[%s4069_s18 + $0x48] sm:$0xff]   ;;  %v3179_v61 = vld [vmem:[%s4065_s14 + $0x150] ss:$8 sps:$4 sm:$0xff]  }
 0x14b   : > { %v1765_v5 = vrot.slane %v1752_v3, %v1764_v63  ;;  %v3829_v6 = vrot.slane %v1778_v4, %v1764_v63  ;;  %v3215_v10 = vld [vmem:[%s4069_s18 + $0x8] sm:$0xff]  }
 0x14c   : > { %v1356_v14 = vmax.f32 %v1354_v57, %v1355_v12  ;;  %v1374_v15 = vrot.slane %v1373_v13, 4  ;;  %v3110_v57 = vld [vmem:[%s4061_s10 + $0x48] ss:$16 sps:$4 sm:$0xff]   ;;  %v3217_v12 = vld [vmem:[%s4069_s18 + $0x10] sm:$0xff]   ;;  %v3190_v63 = vld [vmem:[%s4065_s14 + $0x184] ss:$8 sps:$4 sm:$0xff]  }
 0x14d   : > { %2247 = vmatpush1.bf16.msra.mxu0 %v3161_v62  ;;  %v3184_v62 = vld [vmem:[%s4065_s14 + $0x164] ss:$8 sps:$4 sm:$0xff]   ;;  %v3182_v0 = vld [vmem:[%s4065_s14 + $0x160] ss:$8 sps:$4 sm:$0xff]  }
 0x14e   : > { %v1357_v16 = vrot.slane %v1356_v14, 4  ;;  %v1375_v17 = vadd.f32 %v1374_v15, %v1373_v13  ;;  %2257 = vmatprep.subr.bf16.mxu0 %v3166_v1  ;;  %v3218_v13 = vld [vmem:[%s4069_s18 + $0x58] sm:$0xff]   ;;  %v3220_v15 = vld [vmem:[%s4069_s18 + $0x60] sm:$0xff]  }
 0x14f   : > { %v3187_v1 = vld [vmem:[%s4065_s14 + $0x174] ss:$8 sps:$4 sm:$0xff]  }
 0x150   : > { %v1358_v18 = vmax.f32 %v1356_v14, %v1357_v16  ;;  %v1376_v19 = vrot.slane %v1375_v17, 2  ;;  %v3219_v14 = vld [vmem:[%s4069_s18 + $0x18] sm:$0xff]   ;;  %v3221_v16 = vld [vmem:[%s4069_s18 + $0x20] sm:$0xff]  }
 0x152   : > { %v1359_v20 = vrot.slane %v1358_v18, 2  ;;  %v1377_v21 = vadd.f32 %v1376_v19, %v1375_v17  ;;  %v3861_v17 = vsub.s32 0, %v1755_v2 }
 0x154   : > { %v1360_v22 = vmax.f32 %v1358_v18, %v1359_v20  ;;  %v1378_v23 = vrot.slane %v1377_v21, 1  ;;  %v3863_v18 = vsub.s32 1, %v1755_v2  ;;  %v1757_v19 = vrot.slane %v1752_v3, %v3861_v17 }
 0x156   : > { %v1361_v25 = vrot.slane %v1360_v22, 1  ;;  %v1379_v26 = vadd.f32 %v1378_v23, %v1377_v21  ;;  %v1761_v20 = vrot.slane %v1752_v3, %v3863_v18  ;;  %v1783_v21 = vrot.slane %v1778_v4, %v3861_v17 }
 0x157   : > { %v1787_v23 = vrot.slane %v1778_v4, %v3863_v18 }
 0x158   : > { %v1362_v28 = vmax.f32 %v1360_v22, %v1361_v25  ;;  %v1380_v29 = vadd.f32 %v1379_v26, %v1366_v24 }
 0x15a   : > { %v1363_v30 = vmax.f32 %v1349_v27, %v1362_v28  ;;  %1381 = vst.msk [vmem:[#allocation3] sm:$0x1] %vm771_vm1, %v1380_v29 }
 0x15c   : > { %1365 = vst.msk [vmem:[#allocation2] sm:$0x1] %vm771_vm1, %v1363_v30 }
 0x161   : > { %v1386_v31 = vld [vmem:[#allocation3] sm:$0x1] }
 0x162   : > { %v1387_v32 = vmul.f32 0.03125, %v1386_v31 }
 0x163   : > { %v1385_v50 = vld [vmem:[#allocation2] sm:$0x1] }
 0x164   : > { %v1405_v34 = vpack.c.bf16 %v1387_v32, %v1387_v32  ;;  %v1388_v53 = vpack.c.bf16 %v1385_v50, %v1385_v50  ;;  %v3175_v50 = vld [vmem:[%s4065_s14 + $0x134] ss:$8 sps:$4 sm:$0xff]  }
 0x166   : > { %2721 = vmatmul.mubr.msk.bf16.vlgmr.msra.gmra.mrb[12].mxu1 %vm832_vm0, %v1405_v34 }
 0x167   : > { %1547 = vmatpush1.bf16.msra.mxu1 %v3080_v33  ;;  %1578 = vmatprep.mubr.bf16.mxu1 %v3310_v52 }
 0x168   : > { %1548 = vmatprep.subr.bf16.mxu1 %v3085_v35 }
 0x16b   : > { %1549 = vmatpush1.bf16.msra.mxu1 %v3083_v36  ;;  %v3164_v36 = vld [vmem:[%s4065_s14 + $0x100] ss:$8 sps:$4 sm:$0xff]  }
 0x16c   : > { %1550 = vmatprep.subr.bf16.mxu1 %v3088_v37 }
 0x16f   : > { %1551 = vmatpush1.bf16.msra.mxu1 %v3086_v38  ;;  %v3169_v38 = vld [vmem:[%s4065_s14 + $0x114] ss:$8 sps:$4 sm:$0xff]  }
 0x170   : > { %1552 = vmatprep.subr.bf16.mxu1 %v3091_v39  ;;  %v1768_v39 = vsub.s32 3, %v1755_v2  ;;  %v3185_v2 = vld [vmem:[%s4065_s14 + $0x170] ss:$8 sps:$4 sm:$0xff]  }
 0x173   : > { %1553 = vmatpush1.bf16.msra.mxu1 %v3089_v40  ;;  %v3167_v40 = vld [vmem:[%s4065_s14 + $0x110] ss:$8 sps:$4 sm:$0xff]  }
 0x174   : > { %1670 = vmatprep.subr.bf16.mxu1 %v3094_v41  ;;  %v1769_v41 = vrot.slane %v1752_v3, %v1768_v39  ;;  %v3188_v3 = vld [vmem:[%s4065_s14 + $0x180] ss:$8 sps:$4 sm:$0xff]  }
 0x176   : > { %2722 = vmatmul.mubr.msk.bf16.vlgmr.msra.gmra.mrb[16].mxu1 %vm832_vm0, %v1405_v34 }
 0x177   : > { %1671 = vmatpush1.bf16.msra.mxu1 %v3092_v42  ;;  %1702 = vmatprep.mubr.bf16.mxu1 %v3310_v52  ;;  %v3172_v42 = vld [vmem:[%s4065_s14 + $0x124] ss:$8 sps:$4 sm:$0xff]  }
 0x178   : > { %1672 = vmatprep.subr.bf16.mxu1 %v3097_v43 }
 0x17b   : > { %1673 = vmatpush1.bf16.msra.mxu1 %v3095_v44  ;;  %v1795_v44 = vrot.slane %v1778_v4, %v1768_v39  ;;  %v3193_v4 = vld [vmem:[%s4065_s14 + $0x194] ss:$8 sps:$4 sm:$0xff]  }
 0x17c   : > { %1674 = vmatprep.subr.bf16.mxu1 %v3100_v45 }
 0x17f   : > { %1675 = vmatpush1.bf16.msra.mxu1 %v3098_v46 }
 0x180   : > { %1676 = vmatprep.subr.bf16.mxu1 %v3103_v47  ;;  %v3170_v47 = vld [vmem:[%s4065_s14 + $0x120] ss:$8 sps:$4 sm:$0xff]  }
 0x183   : > { %1677 = vmatpush1.bf16.msra.mxu1 %v3101_v48 }
 0x184   : > { %1711 = vmatprep.subr.bf16.mxu1 %v3106_v49 }
 0x186   : > { %2739 = vmatmul.mubr.msk.bf16.vlgmr.msra.gmra.mrb[12].mxu1 %vm832_vm0, %v1388_v53 }
 0x187   : > { %1712 = vmatpush1.bf16.msra.mxu1 %v3104_v51  ;;  %1743 = vmatprep.mubr.bf16.mxu1 %v3310_v52  ;;  %v3113_v52 = vld [vmem:[%s4061_s10 + $0x68] ss:$16 sps:$4 sm:$0xff]  }
 0x188   : > { %1713 = vmatprep.subr.bf16.mxu1 %v3109_v54 }
 0x18b   : > { %1714 = vmatpush1.bf16.msra.mxu1 %v3107_v55  ;;  %v3173_v55 = vld [vmem:[%s4065_s14 + $0x130] ss:$8 sps:$4 sm:$0xff]  }
 0x18c   : > { %1715 = vmatprep.subr.bf16.mxu1 %v3112_v56 }
 0x18f   : > { %1716 = vmatpush1.bf16.msra.mxu1 %v3110_v57  ;;  %v3178_v57 = vld [vmem:[%s4065_s14 + $0x144] ss:$8 sps:$4 sm:$0xff]  }
 0x190   : > { %1717 = vmatprep.subr.bf16.mxu1 %v3115_v58 }
 0x193   : > { %1718 = vmatpush1.bf16.msra.mxu1 %v3113_v52  ;;  %v3176_v52 = vld [vmem:[%s4065_s14 + $0x140] ss:$8 sps:$4 sm:$0xff]  }
 0x194   : > { %2878 = vmatprep.subr.bf16.mxu1 %v3212_v7  ;;  %v3194_v7 = vld [vmem:[%s4065_s14 + $0x1a0] ss:$8 sps:$4 sm:$0xff]  }
 0x196   : > { %2740 = vmatmul.mubr.msk.bf16.vlgmr.msra.gmra.mrb[16].mxu1 %vm832_vm0, %v1388_v53 }
 0x197   : > { %2879 = vmatpush3.bf16.msra.mxu1 %v3213_v8  ;;  %v3199_v8 = vld [vmem:[%s4065_s14 + $0x1b4] ss:$8 sps:$4 sm:$0xff]  }
 0x198   : > { %2880 = vmatprep.subr.bf16.mxu1 %v3214_v9  ;;  %v3197_v9 = vld [vmem:[%s4065_s14 + $0x1b0] ss:$8 sps:$4 sm:$0xff]  }
 0x19b   : > { %2881 = vmatpush3.bf16.msra.mxu1 %v3215_v10  ;;  %v3202_v10 = vld [vmem:[%s4065_s14 + $0x1c4] ss:$8 sps:$4 sm:$0xff]  }
 0x19c   : > { %2882 = vmatprep.subr.bf16.mxu1 %v3216_v11  ;;  %v3200_v11 = vld [vmem:[%s4065_s14 + $0x1c0] ss:$8 sps:$4 sm:$0xff]  }
 0x19f   : > { %2883 = vmatpush3.bf16.msra.mxu1 %v3217_v12  ;;  %v3205_v12 = vld [vmem:[%s4065_s14 + $0x1d4] ss:$8 sps:$4 sm:$0xff]  }
 0x1a0   : > { %2884 = vmatprep.subr.bf16.mxu1 %v3218_v13  ;;  %v3203_v13 = vld [vmem:[%s4065_s14 + $0x1d0] ss:$8 sps:$4 sm:$0xff]  }
 0x1a3   : > { %2885 = vmatpush3.bf16.msra.mxu1 %v3219_v14  ;;  %v3208_v14 = vld [vmem:[%s4065_s14 + $0x1e4] ss:$8 sps:$4 sm:$0xff]  }
 0x1a4   : > { %2886 = vmatprep.subr.bf16.mxu1 %v3220_v15  ;;  %v3206_v15 = vld [vmem:[%s4065_s14 + $0x1e0] ss:$8 sps:$4 sm:$0xff]  }
 0x1a7   : > { %2887 = vmatpush3.bf16.msra.mxu1 %v3221_v16  ;;  %v3211_v16 = vld [vmem:[%s4065_s14 + $0x1f4] ss:$8 sps:$4 sm:$0xff]  }
 0x259   : > { %v1704_v22 = vpop.f32.mrb[12].mxu1 }
 0x25a   : > { %v1774_v24 = vmul.f32 %v1757_v19, %v1704_v22  ;;  %v1706_v25 = vpop.f32.mrb[13].mxu1 }
 0x25b   : > { %v1775_v26 = vmul.f32 %v1761_v20, %v1706_v25  ;;  %v1708_v27 = vpop.f32.mrb[14].mxu1  ;;  %v3209_v20 = vld [vmem:[%s4065_s14 + $0x1f0] ss:$8 sps:$4 sm:$0xff]  }
 0x25c   : > { %v1800_v28 = vadd.f32 %v1783_v21, %v1774_v24  ;;  %v1709_v29 = vpop.f32.mrb[15].mxu1  ;;  %v3223_v24 = vld [vmem:[%s4069_s18 + $0x28] sm:$0xff]   ;;  %v3224_v25 = vld [vmem:[%s4069_s18 + $0x70] sm:$0xff]   ;;  %v3226_v27 = vld [vmem:[%s4069_s18 + $0x78] sm:$0xff]  }
 0x25d   : > { %v1801_v30 = vadd.f32 %v1787_v23, %v1775_v26  ;;  %v3222_v23 = vld [vmem:[%s4069_s18 + $0x68] sm:$0xff]   ;;  %v3225_v26 = vld [vmem:[%s4069_s18 + $0x30] sm:$0xff]   ;;  %v1884_v29 = vld [vmem:[%s4066_s15] sm:$0x3] }
 0x25e   : > { %vm1804_vm6 = vcmp.gt.f32.partialorder %v1800_v28, 0.0  ;;  %v1808_v31 = vmul.f32 0.2, %v1800_v28  ;;  %2888 = vmatprep.subr.bf16.mxu1 %v3222_v23 }
 0x25f   : > { %v1809_v32 = vmul.f32 0.2, %v1801_v30  ;;  %vm1805_vm7 = vcmp.gt.f32.partialorder %v1801_v30, 0.0  ;;  %2889 = vmatpush3.bf16.msra.mxu1 %v3223_v24 }
 0x260   : > { %v1812_v33 = vsel %vm1804_vm6, %v1800_v28, %v1808_v31  ;;  %2890 = vmatprep.subr.bf16.mxu1 %v3224_v25  ;;  %v3227_v28 = vld [vmem:[%s4069_s18 + $0x38] sm:$0xff]   ;;  %v2209_v31 = vrot.slane %v1884_v29, %v3861_v17 }
 0x261   : > { %v1813_v34 = vsel %vm1805_vm7, %v1801_v30, %v1809_v32  ;;  %v1816_v37 = vpack.c.bf16 %v1812_v33, %v1812_v33  ;;  %v2298_v30 = vld [vmem:[%s4067_s16] sm:$0x3]  ;;  %v2213_v33 = vrot.slane %v1884_v29, %v3863_v18 }
 0x262   : > { %v1817_v35 = vpack.c.bf16 %v1813_v34, %v1813_v34  ;;  %v2312_v32 = vld [vmem:[%s4068_s17] sm:$0x3]  ;;  %v2303_v34 = vrot.slane %v2298_v30, %v3861_v17 }
 0x263   : > { %2891 = vmatpush3.bf16.msra.mxu1 %v3225_v26 }
 0x264   : > { %2248 = vmatprep.mubr.bf16.mxu0 %v1817_v35  ;;  %2892 = vmatprep.subr.bf16.mxu1 %v3226_v27 }
 0x265   : > { %2249 = vmatmul.mubr.bf16.vlgmr.msra.gmra.mrb[4].mxu0 %v1816_v37 }
 0x266   : > { %2258 = vmatpush1.bf16.msra.mxu0 %v3164_v36  ;;  %v2307_v36 = vrot.slane %v2298_v30, %v3863_v18 }
 0x267   : > { %2259 = vmatprep.subr.bf16.mxu0 %v3169_v38  ;;  %2893 = vmatpush3.bf16.msra.mxu1 %v3227_v28  ;;  %v2317_v38 = vrot.slane %v2312_v32, %v3861_v17 }
 0x269   : > { %v1745_v43 = vpop.f32.mrb[16].mxu1 }
 0x26a   : > { %v1776_v45 = vmul.f32 %v1765_v5, %v1745_v43  ;;  %2260 = vmatpush1.bf16.msra.mxu0 %v3167_v40  ;;  %v1747_v46 = vpop.f32.mrb[17].mxu1  ;;  %v3191_v5 = vld [vmem:[%s4065_s14 + $0x190] ss:$8 sps:$4 sm:$0xff]  }
 0x26b   : > { %v1777_v48 = vmul.f32 %v1769_v41, %v1747_v46  ;;  %v1749_v49 = vpop.f32.mrb[18].mxu1  ;;  %2261 = vmatprep.subr.bf16.mxu0 %v3172_v42  ;;  %v2321_v41 = vrot.slane %v2312_v32, %v3863_v18 }
 0x26c   : > { %v1802_v51 = vadd.f32 %v3829_v6, %v1776_v45  ;;  %v1750_v53 = vpop.f32.mrb[19].mxu1  ;;  %v3196_v6 = vld [vmem:[%s4065_s14 + $0x1a4] ss:$8 sps:$4 sm:$0xff]  }
 0x26d   : > { %v1803_v54 = vadd.f32 %v1795_v44, %v1777_v48 }
 0x26e   : > { %2262 = vmatpush1.bf16.msra.mxu0 %v3170_v47  ;;  %v1810_v19 = vmul.f32 0.2, %v1802_v51  ;;  %vm1806_vm9 = vcmp.gt.f32.partialorder %v1802_v51, 0.0 }
 0x26f   : > { %v1811_v56 = vmul.f32 0.2, %v1803_v54  ;;  %2263 = vmatprep.subr.bf16.mxu0 %v3175_v50  ;;  %vm1807_vm8 = vcmp.gt.f32.partialorder %v1803_v54, 0.0 }
 0x270   : > { %v1814_v21 = vsel %vm1806_vm9, %v1802_v51, %v1810_v19 }
 0x271   : > { %v1815_v58 = vsel %vm1807_vm8, %v1803_v54, %v1811_v56  ;;  %v1818_v22 = vpack.c.bf16 %v1814_v21, %v1814_v21  ;;  %v2366_v54 = vld [vmem:[%s4110_s4] sm:$0x1] }
 0x272   : > { %2264 = vmatpush1.bf16.msra.mxu0 %v3173_v55  ;;  %v1819_v59 = vpack.c.bf16 %v1815_v58, %v1815_v58 }
 0x273   : > { %2265 = vmatprep.subr.bf16.mxu0 %v3178_v57 }
 0x274   : > { %2289 = vmatprep.mubr.bf16.mxu0 %v1819_v59 }
 0x276   : > { %2266 = vmatpush1.bf16.msra.mxu0 %v3176_v52 }
 0x277   : > { %2267 = vmatprep.subr.bf16.mxu0 %v3181_v60 }
 0x27a   : > { %2268 = vmatpush1.bf16.msra.mxu0 %v3179_v61 }
 0x27b   : > { %2269 = vmatprep.subr.bf16.mxu0 %v3184_v62 }
 0x27e   : > { %2270 = vmatpush1.bf16.msra.mxu0 %v3182_v0 }
 0x27f   : > { %2271 = vmatprep.subr.bf16.mxu0 %v3187_v1 }
 0x282   : > { %2272 = vmatpush1.bf16.msra.mxu0 %v3185_v2 }
 0x283   : > { %2273 = vmatprep.subr.bf16.mxu0 %v3190_v63 }
 0x286   : > { %2274 = vmatpush1.bf16.msra.mxu0 %v3188_v3 }
 0x287   : > { %2275 = vmatprep.subr.bf16.mxu0 %v3193_v4 }
 0x28a   : > { %2276 = vmatpush1.bf16.msra.mxu0 %v3191_v5 }
 0x28b   : > { %2277 = vmatprep.subr.bf16.mxu0 %v3196_v6 }
 0x28e   : > { %2278 = vmatpush1.bf16.msra.mxu0 %v3194_v7 }
 0x28f   : > { %2279 = vmatprep.subr.bf16.mxu0 %v3199_v8 }
 0x292   : > { %2280 = vmatpush1.bf16.msra.mxu0 %v3197_v9 }
 0x293   : > { %2281 = vmatprep.subr.bf16.mxu0 %v3202_v10 }
 0x296   : > { %2282 = vmatpush1.bf16.msra.mxu0 %v3200_v11 }
 0x297   : > { %2283 = vmatprep.subr.bf16.mxu0 %v3205_v12 }
 0x29a   : > { %2284 = vmatpush1.bf16.msra.mxu0 %v3203_v13 }
 0x29b   : > { %2285 = vmatprep.subr.bf16.mxu0 %v3208_v14 }
 0x29e   : > { %2286 = vmatpush1.bf16.msra.mxu0 %v3206_v15 }
 0x29f   : > { %2287 = vmatprep.subr.bf16.mxu0 %v3211_v16 }
 0x2a2   : > { %2288 = vmatpush1.bf16.msra.mxu0 %v3209_v20 }
 0x2a5   : > { %2290 = vmatmul.mubr.bf16.vlgmr.msra.gmra.mrb[4].mxu0 %v1818_v22 }
 0x378   : > { %v2291_v35 = vpop.f32.mrb[4].mxu0 }
 0x379   : > { %v2948_v37 = vadd.f32 %v2291_v35, %v2209_v31  ;;  %v2293_v39 = vpop.f32.mrb[5].mxu0 }
 0x37a   : > { %v2949_v40 = vadd.f32 %v2293_v39, %v2213_v33  ;;  %v2295_v42 = vpop.f32.mrb[6].mxu0 }
 0x37b   : > { %v2310_v43 = vmul.f32 %v2948_v37, %v2303_v34  ;;  %v2296_v44 = vpop.f32.mrb[7].mxu0 }
 0x37c   : > { %v2311_v45 = vmul.f32 %v2949_v40, %v2307_v36 }
 0x37d   : > { %v2324_v46 = vadd.f32 %v2317_v38, %v2310_v43 }
 0x37e   : > { %v2325_v47 = vadd.f32 %v2321_v41, %v2311_v45 }
 0x37f   : > { %vm2326_vm10 = vcmp.gt.f32.partialorder %v2324_v46, 0.0  ;;  %v2328_v48 = vmul.f32 0.2, %v2324_v46 }
 0x380   : > { %vm2327_vm11 = vcmp.gt.f32.partialorder %v2325_v47, 0.0  ;;  %v2329_v49 = vmul.f32 0.2, %v2325_v47 }
 0x381   : > { %v2330_v50 = vsel %vm2326_vm10, %v2324_v46, %v2328_v48 }
 0x382   : > { %v2331_v51 = vsel %vm2327_vm11, %v2325_v47, %v2329_v49  ;;  %v2332_v17 = vpack.c.bf16 %v2330_v50, %v2330_v50 }
 0x383   : > { %v2333_v53 = vpack.c.bf16 %v2331_v51, %v2331_v51 }
 0x385   : > { %2495 = vmatprep.mubr.bf16.mxu1 %v2333_v53 }
 0x386   : > { %2496 = vmatmul.mubr.bf16.vlgmr.msra.gmra.mrb[20].mxu1 %v2332_v17 }
 0x459   : > { %v2894_v18 = vpop.f32.mrb[20].mxu1 }
 0x45a   : > { %v2895_v55 = vpop.f32.mrb[21].mxu1 }
 0x45b   : > { %v2896_v56 = vadd.f32 %v2895_v55, %v2894_v18  ;;  %v2897_v57 = vpop.f32.mrb[22].mxu1 }
 0x45c   : > { %v2898_v58 = vpop.f32.mrb[23].mxu1 }
 0x45d   : > { %v2498_v52 = vadd.f32 %v2896_v56, %v2366_v54 }
 0x45f   : > { %2504 = vst.msk [vmem:[%s724_s27] sm:$0x1] %vm2503_vm12, %v2498_v52 }
 0x460   : > { %3241 = shalt.err (!%p3238_p5)
}
 0x461   : > { %s3242_s25 = scalar_lea.hbm %s4004_s0, 16  ;;  %s3246_s23 = scalar_lea.hbm %s4112_s28, 32 }
 0x462   : > { %p3243_p6 = scmp.ne.s32.totalorder %s4004_s0, %s3242_s25  ;;  %p3247_p10 = scmp.lt.u32.totalorder %s4004_s0, %s4112_s28 }
 0x463   : > { %p3248_p11 = scmp.lt.u32.totalorder %s3246_s23, %s3242_s25  ;;  %p3250_p13 = scmp.lt.u32.totalorder %s3242_s25, %s4004_s0 }
 0x464   : > { %p3244_p7 = pnand %p3243_p6, %p3457_p4 }
 0x465   : > { %p3249_p12 = por %p3248_p11, %p3247_p10 }
 0x466   : > { %p3245_p9 = pneg %p3244_p7 }
 0x467   : > { %p3251_p0 = por %p3250_p13, %p3249_p12 }
 0x469   : > { %p3252_p1 = pnand %p3251_p0, %p3245_p9 }
 0x46b   : > { %3255 = shalt.err (!%p3252_p1)
}
 0x46c   : > { %2966 = dma.vmem_to_hbm [thread:$0]  (%p3457_p4), %s4006_s24, 16, %s4004_s0, %s2506_s21  }
 0x46d PF: > { %s4113_s29 = sld [smem:[#allocation11_spill]]  ;;  %s4114_s1 = sld [smem:[#allocation7_spill]] }
 0x473   : > { %p2972_p2 = scmp.ge.s32.totalorder %s4113_s29, 2  ;;  %s2530_s20 = sand.u32 1, %s4114_s1  }
 0x474   : > { %s2531_s26 = scalar_lea.sflag [#allocation5], %s2530_s20 }
 0x475   : > { %p2969_p3 = pnand %p2972_p2, %p3464_p8 }
 0x477   : > { %3281 = dma.done.wait (!%p2969_p3), %s2531_s26, 16  }
 0x478   : > { %3283 = vsyncadd (!%p2969_p3), %s2531_s26, 4294967280  ;;  %s33_s25 = sadd.s32 1, %s4113_s29   ;;  %s4116_s5 = sld [smem:[#allocation8_spill]] }
 0x479   : > { %p30_p5 = scmp.ge.s32.totalorder %s33_s25, 4   ;;  %s4117_s23 = sld [smem:[#allocation15_spill]] }
 0x47a   : > { %s4118_s24 = sld [smem:[#allocation10_spill]]  ;;  %s4119_s2 = sld [smem:[#allocation12_spill]] }
 0x47b   : > { %s4120_s1 = smov %s3290_s22  ;;  %32 = sbr.rel (!%p30_p5) target bundleno = 13 (0xd), region = 152 }
 0x47e   : > { %s4121_s22 = smov %s4116_s5 }
 0x482   :  { %2535 = vsyncpa [#allocation5], 1 }
 0x483   :  { %2537 = vsyncpa [#allocation5 + $0x1], 1 }

</bundles_post_ra>
